<compile_context>
chip_gen: v7x
topology: tpu7x:2x2x1
jax: 0.10.0
libtpu: 0.0.40
codegen_flags: <defaults>
</compile_context>

<pallas_src>
import numpy as np
import jax
import jax.numpy as jnp
from jax import lax
from jax.experimental import pallas as pl
from jax.experimental.pallas import tpu as pltpu

_EPS = 1e-5  # PyTorch BatchNorm2d default eps


def _interp_matrix(out_size: int, in_size: int) -> np.ndarray:
    """Separable bilinear-interpolation matrix, align_corners=True (PyTorch)."""
    m = np.zeros((out_size, in_size), dtype=np.float32)
    if out_size == 1 or in_size == 1:
        m[:, 0] = 1.0
        return m
    src = np.arange(out_size, dtype=np.float64) * (in_size - 1) / (out_size - 1)
    i0 = np.clip(np.floor(src).astype(np.int64), 0, in_size - 1)
    i1 = np.clip(i0 + 1, 0, in_size - 1)
    frac = (src - i0).astype(np.float32)
    m[np.arange(out_size), i0] += 1.0 - frac
    m[np.arange(out_size), i1] += frac
    return m


def _make_kernel(C, Cx, H, W, h, w):
    Hp, Wp = H + 2, W + 2
    CW = C * Wp

    def kernel(
        x_ref,     # (1, Cx, H, W)   VMEM  high-res input
        y_ref,     # (1, C*h, w)     VMEM  low-res input (channel-major rows)
        rh_ref,    # (H+2, h)        VMEM  height interp matrix, conv pad folded
        rwt_ref,   # (w, W+2)        VMEM  width  interp matrix^T, conv pad folded
        wrow_ref,  # (9, C*(W+2))    VMEM  dw 3x3 weights (BN scale folded), per-lane rows
        dwb_ref,   # (1, C*(W+2))    VMEM  dw-branch BN shift, per-lane row
        wl_ref,    # (C, C)          VMEM  BN-folded 1x1 weights, low branch
        wh_ref,    # (C, Cx)         VMEM  BN-folded 1x1 weights, high branch
        b_ref,     # (C, 1)          VMEM  combined folded bias (low + high)
        out_ref,   # (1, C, H, W)    VMEM
        ylow_ref,  # (C, H, W)       VMEM scratch: low-branch activations
    ):
        # ---------------- low branch: bilinear upsample (2 batched matmuls) ---
        yb = y_ref[0]                                                   # (C*h, w)
        # width interpolation for all channels at once (MXU)
        t = jnp.dot(yb, rwt_ref[...], preferred_element_type=jnp.float32)  # (C*h, Wp)

        # un-interleave channels from sublane-groups to lane-groups
        # (== transpose/reshape to (h, C*Wp)); 2 trailing zero columns give
        # headroom for the shifted reads of the last channel group below.
        tt = jnp.concatenate(
            [t[c * h:(c + 1) * h, :] for c in range(C)]
            + [jnp.zeros((h, 2), jnp.float32)],
            axis=1)                                                     # (h, C*Wp+2)

        # height interpolation for all channels at once (MXU); the 3x3 conv
        # zero padding is already folded into rh/rwt, so u holds the padded
        # upsampled image of every channel side by side along lanes.
        u = jnp.dot(rh_ref[...], tt, preferred_element_type=jnp.float32)  # (Hp, C*Wp+2)

        # ---------------- depthwise 3x3 conv + BN + ReLU (VPU) ----------------
        # 9 shifted whole-block multiply-adds; per-channel weights are carried
        # as per-lane rows so no per-channel loop / scalar reads are needed.
        acc = jnp.zeros((H, CW), jnp.float32)
        for k in range(9):
            ki, kj = k // 3, k % 3
            acc = acc + u[ki:ki + H, kj:kj + CW] * wrow_ref[k:k + 1, :]
        y1 = jnp.maximum(acc + dwb_ref[...], 0.0)                       # (H, C*Wp)

        # un-interleave into a bounded channel-major VMEM scratch, dropping the
        # 2 junk lanes at the end of every channel group.
        for c in range(C):
            ylow_ref[c, :, :] = y1[:, c * Wp:c * Wp + W]

        # ---------------- fused 1x1 convs + add + ReLU (MXU) ------------------
        wl = wl_ref[...]          # (C, C)
        wh = wh_ref[...]          # (C, Cx)
        b = b_ref[...]            # (C, 1)
        for i in range(H):
            yrow = ylow_ref[:, i, :]                                    # (C, W)
            xrow = x_ref[0, :, i, :]                                    # (Cx, W)
            o = (jnp.dot(wl, yrow, preferred_element_type=jnp.float32)
                 + jnp.dot(wh, xrow, preferred_element_type=jnp.float32)
                 + b)
            out_ref[0, :, i, :] = jnp.maximum(o, 0.0)

    return kernel


def init_params(key, x_in_channels, out_channels):
    """Deterministic synthetic parameters (shapes match the PyTorch module)."""
    C, Cx = out_channels, x_in_channels
    ks = jax.random.split(key, 17)

    def n(k, shape, s=1.0):
        return s * jax.random.normal(k, shape, jnp.float32)

    return dict(
        # dwconv3x3_block: Conv2d(C, C, 3, pad=1, groups=C, bias=False) + BN + ReLU
        w_dw=n(ks[0], (C, 3, 3), 0.3),
        bn1_gamma=1.0 + n(ks[1], (C,), 0.1),
        bn1_beta=n(ks[2], (C,), 0.1),
        bn1_mean=n(ks[3], (C,), 0.1),
        bn1_var=0.5 + jnp.abs(n(ks[4], (C,))),
        # low_pw_conv: Conv2d(C, C, 1, bias=True) + BN, no activation
        w_pw=n(ks[5], (C, C), 0.3),
        b_pw=n(ks[6], (C,), 0.1),
        bn2_gamma=1.0 + n(ks[7], (C,), 0.1),
        bn2_beta=n(ks[8], (C,), 0.1),
        bn2_mean=n(ks[9], (C,), 0.1),
        bn2_var=0.5 + jnp.abs(n(ks[10], (C,))),
        # high_conv: Conv2d(Cx, C, 1, bias=True) + BN, no activation
        w_h=n(ks[11], (C, Cx), 0.3),
        b_h=n(ks[12], (C,), 0.1),
        bn3_gamma=1.0 + n(ks[13], (C,), 0.1),
        bn3_beta=n(ks[14], (C,), 0.1),
        bn3_mean=n(ks[15], (C,), 0.1),
        bn3_var=0.5 + jnp.abs(n(ks[16], (C,))),
    )


def feature_fusion_pallas(x, y, p, x_in_size):
    N, Cx, H0, W0 = x.shape
    _, Cy, h, w = y.shape
    C = p["w_pw"].shape[0]
    assert Cy == C, "y_in_channels must equal out_channels for the depthwise conv"
    H, W = x_in_size if x_in_size is not None else (H0, W0)
    Hp, Wp = H + 2, W + 2

    # Interpolation matrices with the depthwise-conv zero padding folded in.
    rh_np = np.zeros((Hp, h), np.float32)
    rh_np[1:H + 1] = _interp_matrix(H, h)
    rwt_np = np.zeros((w, Wp), np.float32)
    rwt_np[:, 1:W + 1] = _interp_matrix(W, w).T
    rh = jnp.asarray(rh_np)
    rwt = jnp.asarray(rwt_np)

    def fold(g, b, m, v):
        s = g / jnp.sqrt(v + _EPS)
        return s, b - m * s

    # dw branch: fold BN scale into the 9 depthwise weights, keep the shift.
    dws, dwb = fold(p["bn1_gamma"], p["bn1_beta"], p["bn1_mean"], p["bn1_var"])
    wdw = p["w_dw"].reshape(C, 9) * dws[:, None]                      # (C, 9)
    wrow = jnp.repeat(wdw.T[:, :, None], Wp, axis=2).reshape(9, C * Wp)
    dwbrow = jnp.repeat(dwb[:, None], Wp, axis=1).reshape(1, C * Wp)

    # 1x1 convs with BN folded; biases of both branches combined.
    s2, t2 = fold(p["bn2_gamma"], p["bn2_beta"], p["bn2_mean"], p["bn2_var"])
    wl = s2[:, None] * p["w_pw"]                                      # (C, C)
    s3, t3 = fold(p["bn3_gamma"], p["bn3_beta"], p["bn3_mean"], p["bn3_var"])
    wh = s3[:, None] * p["w_h"]                                       # (C, Cx)
    bias = (s2 * p["b_pw"] + t2 + s3 * p["b_h"] + t3)[:, None]        # (C, 1)

    y_r = y.reshape(N, C * h, w)                                      # channel-major rows

    kernel = _make_kernel(C, Cx, H, W, h, w)
    return pl.pallas_call(
        kernel,
        out_shape=jax.ShapeDtypeStruct((N, C, H, W), jnp.float32),
        grid=(N,),
        in_specs=[
            pl.BlockSpec((1, Cx, H, W), lambda n: (n, 0, 0, 0)),   # x (per batch)
            pl.BlockSpec((1, C * h, w), lambda n: (n, 0, 0)),      # y (per batch)
            pl.BlockSpec((Hp, h), lambda n: (0, 0)),               # Rh (padded)
            pl.BlockSpec((w, Wp), lambda n: (0, 0)),               # Rw^T (padded)
            pl.BlockSpec((9, C * Wp), lambda n: (0, 0)),           # dw tap weight rows
            pl.BlockSpec((1, C * Wp), lambda n: (0, 0)),           # dw BN shift row
            pl.BlockSpec((C, C), lambda n: (0, 0)),                # low 1x1 weights
            pl.BlockSpec((C, Cx), lambda n: (0, 0)),               # high 1x1 weights
            pl.BlockSpec((C, 1), lambda n: (0, 0)),                # combined bias
        ],
        out_specs=pl.BlockSpec((1, C, H, W), lambda n: (n, 0, 0, 0)),
        scratch_shapes=[pltpu.VMEM((C, H, W), jnp.float32)],
        compiler_params=pltpu.CompilerParams(dimension_semantics=("parallel",)),
    )(x, y_r, rh, rwt, wrow, dwbrow, wl, wh, bias)


def reference_forward(x, y, p, x_in_size):
    """Pure-JAX reference (eval-mode BN, explicit, unfolded)."""
    N, Cx, H, W = x.shape
    _, C, h, w = y.shape
    Rh = jnp.asarray(_interp_matrix(x_in_size[0], h))
    Rw = jnp.asarray(_interp_matrix(x_in_size[1], w))

    y_up = jnp.einsum("Hh,nchw->ncHw", Rh, y)
    y_up = jnp.einsum("Ww,ncHw->ncHW", Rw, y_up)

    def bn(t, g, b, m, v):
        sh = (1, -1, 1, 1)
        return (t - m.reshape(sh)) / jnp.sqrt(v.reshape(sh) + _EPS) * g.reshape(sh) + b.reshape(sh)

    z = lax.conv_general_dilated(
        y_up, p["w_dw"].reshape(C, 1, 3, 3), window_strides=(1, 1), padding="SAME",
        dimension_numbers=("NCHW", "OIHW", "NCHW"), feature_group_count=C)
    z = jnp.maximum(bn(z, p["bn1_gamma"], p["bn1_beta"], p["bn1_mean"], p["bn1_var"]), 0.0)

    y2 = jnp.einsum("oc,nchw->nohw", p["w_pw"], z) + p["b_pw"].reshape(1, -1, 1, 1)
    y2 = bn(y2, p["bn2_gamma"], p["bn2_beta"], p["bn2_mean"], p["bn2_var"])

    x2 = jnp.einsum("oc,nchw->nohw", p["w_h"], x) + p["b_h"].reshape(1, -1, 1, 1)
    x2 = bn(x2, p["bn3_gamma"], p["bn3_beta"], p["bn3_mean"], p["bn3_var"])

    return jnp.maximum(x2 + y2, 0.0)


if __name__ == "__main__":
    # Small Fast-SCNN-like configuration:
    #   x: high-res (N, Cx, H, W), y: low-res (N, C, h, w), out_channels = C
    N, Cx, C = 2, 4, 8
    H, W = 16, 16
    h, w = 8, 8
    x_in_size = (H, W)

    key = jax.random.PRNGKey(0)
    kx, ky, kp = jax.random.split(key, 3)
    x = jax.random.normal(kx, (N, Cx, H, W), jnp.float32)
    y = jax.random.normal(ky, (N, C, h, w), jnp.float32)
    params = init_params(kp, Cx, C)

    out = feature_fusion_pallas(x, y, params, x_in_size)
    out = jax.block_until_ready(out)

    ref = reference_forward(x, y, params, x_in_size)
    err = float(jnp.max(jnp.abs(out - ref)))
    if not np.isfinite(err) or err > 3e-2:
        raise AssertionError(f"Pallas kernel mismatch vs reference: max abs err = {err}")

    print("KERNEL_OK")
</pallas_src>

<mosaic_0001>
module attributes {stable_mosaic.version = 11 : i64} {
  func.func @kernel(%arg0: i32, %arg1: memref<1x4x16x16xf32, #tpu.memory_space<vmem>>, %arg2: memref<1x64x8xf32, #tpu.memory_space<vmem>>, %arg3: memref<18x8xf32, #tpu.memory_space<vmem>>, %arg4: memref<8x18xf32, #tpu.memory_space<vmem>>, %arg5: memref<9x144xf32, #tpu.memory_space<vmem>>, %arg6: memref<1x144xf32, #tpu.memory_space<vmem>>, %arg7: memref<8x8xf32, #tpu.memory_space<vmem>>, %arg8: memref<8x4xf32, #tpu.memory_space<vmem>>, %arg9: memref<8x1xf32, #tpu.memory_space<vmem>>, %arg10: memref<1x8x16x16xf32, #tpu.memory_space<vmem>>, %arg11: memref<8x16x16xf32, #tpu.memory_space<vmem>>) attributes {dimension_semantics = [#tpu.dimension_semantics<parallel>], iteration_bounds = array<i64: 2>, scalar_prefetch = 0 : i64, scratch_operands = 1 : i64, tpu.core_type = #tpu.core_type<tc>, window_params = [{transform_indices = @transform_0, window_bounds = array<i64: 1, 4, 16, 16>}, {transform_indices = @transform_1, window_bounds = array<i64: 1, 64, 8>}, {pipeline_mode = #tpu.pipeline_mode<synchronous>, transform_indices = @transform_2, window_bounds = array<i64: 18, 8>}, {pipeline_mode = #tpu.pipeline_mode<synchronous>, transform_indices = @transform_3, window_bounds = array<i64: 8, 18>}, {pipeline_mode = #tpu.pipeline_mode<synchronous>, transform_indices = @transform_4, window_bounds = array<i64: 9, 144>}, {pipeline_mode = #tpu.pipeline_mode<synchronous>, transform_indices = @transform_5, window_bounds = array<i64: 1, 144>}, {pipeline_mode = #tpu.pipeline_mode<synchronous>, transform_indices = @transform_6, window_bounds = array<i64: 8, 8>}, {pipeline_mode = #tpu.pipeline_mode<synchronous>, transform_indices = @transform_7, window_bounds = array<i64: 8, 4>}, {pipeline_mode = #tpu.pipeline_mode<synchronous>, transform_indices = @transform_8, window_bounds = array<i64: 8, 1>}, {transform_indices = @transform_9, window_bounds = array<i64: 1, 8, 16, 16>}]} {
    %c0 = arith.constant 0 : index
    %c0_0 = arith.constant 0 : index
    %c0_1 = arith.constant 0 : index
    %0 = vector.load %arg2[%c0, %c0_0, %c0_1] : memref<1x64x8xf32, #tpu.memory_space<vmem>>, vector<1x64x8xf32>
    %1 = vector.shape_cast %0 : vector<1x64x8xf32> to vector<64x8xf32>
    %c0_2 = arith.constant 0 : index
    %c0_3 = arith.constant 0 : index
    %2 = vector.load %arg4[%c0_2, %c0_3] : memref<8x18xf32, #tpu.memory_space<vmem>>, vector<8x18xf32>
    %cst = arith.constant dense<0.000000e+00> : vector<64x18xf32>
    %3 = tpu.matmul %1, %2, %cst {dimension_numbers = #tpu.dot_dimension_numbers<[1], [0], [0], [1], [0, 0, 1, 1], [], []>} : vector<64x8xf32>, vector<8x18xf32>, vector<64x18xf32> -> vector<64x18xf32>
    %4 = vector.extract_strided_slice %3 {offsets = [0, 0], sizes = [8, 18], strides = [1, 1]} : vector<64x18xf32> to vector<8x18xf32>
    %5 = vector.extract_strided_slice %3 {offsets = [8, 0], sizes = [8, 18], strides = [1, 1]} : vector<64x18xf32> to vector<8x18xf32>
    %6 = vector.extract_strided_slice %3 {offsets = [16, 0], sizes = [8, 18], strides = [1, 1]} : vector<64x18xf32> to vector<8x18xf32>
    %7 = vector.extract_strided_slice %3 {offsets = [24, 0], sizes = [8, 18], strides = [1, 1]} : vector<64x18xf32> to vector<8x18xf32>
    %8 = vector.extract_strided_slice %3 {offsets = [32, 0], sizes = [8, 18], strides = [1, 1]} : vector<64x18xf32> to vector<8x18xf32>
    %9 = vector.extract_strided_slice %3 {offsets = [40, 0], sizes = [8, 18], strides = [1, 1]} : vector<64x18xf32> to vector<8x18xf32>
    %10 = vector.extract_strided_slice %3 {offsets = [48, 0], sizes = [8, 18], strides = [1, 1]} : vector<64x18xf32> to vector<8x18xf32>
    %11 = vector.extract_strided_slice %3 {offsets = [56, 0], sizes = [8, 18], strides = [1, 1]} : vector<64x18xf32> to vector<8x18xf32>
    %cst_4 = arith.constant 0.000000e+00 : f32
    %12 = vector.broadcast %cst_4 : f32 to vector<8x2xf32>
    %13 = tpu.concatenate %4, %5, %6, %7, %8, %9, %10, %11, %12 in 1 : vector<8x18xf32>, vector<8x18xf32>, vector<8x18xf32>, vector<8x18xf32>, vector<8x18xf32>, vector<8x18xf32>, vector<8x18xf32>, vector<8x18xf32>, vector<8x2xf32> -> vector<8x146xf32>
    %c0_5 = arith.constant 0 : index
    %c0_6 = arith.constant 0 : index
    %14 = vector.load %arg3[%c0_5, %c0_6] : memref<18x8xf32, #tpu.memory_space<vmem>>, vector<18x8xf32>
    %cst_7 = arith.constant dense<0.000000e+00> : vector<18x146xf32>
    %15 = tpu.matmul %14, %13, %cst_7 {dimension_numbers = #tpu.dot_dimension_numbers<[1], [0], [0], [1], [0, 0, 1, 1], [], []>} : vector<18x8xf32>, vector<8x146xf32>, vector<18x146xf32> -> vector<18x146xf32>
    %cst_8 = arith.constant 0.000000e+00 : f32
    %16 = vector.broadcast %cst_8 : f32 to vector<16x144xf32>
    %17 = vector.extract_strided_slice %15 {offsets = [0, 0], sizes = [16, 144], strides = [1, 1]} : vector<18x146xf32> to vector<16x144xf32>
    %c0_9 = arith.constant 0 : index
    %c0_10 = arith.constant 0 : index
    %18 = vector.load %arg5[%c0_9, %c0_10] : memref<9x144xf32, #tpu.memory_space<vmem>>, vector<1x144xf32>
    %19 = vector.broadcast %18 : vector<1x144xf32> to vector<16x144xf32>
    %20 = arith.mulf %17, %19 : vector<16x144xf32>
    %21 = arith.addf %16, %20 : vector<16x144xf32>
    %22 = vector.extract_strided_slice %15 {offsets = [0, 1], sizes = [16, 144], strides = [1, 1]} : vector<18x146xf32> to vector<16x144xf32>
    %c1 = arith.constant 1 : index
    %c0_11 = arith.constant 0 : index
    %23 = vector.load %arg5[%c1, %c0_11] : memref<9x144xf32, #tpu.memory_space<vmem>>, vector<1x144xf32>
    %24 = vector.broadcast %23 : vector<1x144xf32> to vector<16x144xf32>
    %25 = arith.mulf %22, %24 : vector<16x144xf32>
    %26 = arith.addf %21, %25 : vector<16x144xf32>
    %27 = vector.extract_strided_slice %15 {offsets = [0, 2], sizes = [16, 144], strides = [1, 1]} : vector<18x146xf32> to vector<16x144xf32>
    %c2 = arith.constant 2 : index
    %c0_12 = arith.constant 0 : index
    %28 = vector.load %arg5[%c2, %c0_12] : memref<9x144xf32, #tpu.memory_space<vmem>>, vector<1x144xf32>
    %29 = vector.broadcast %28 : vector<1x144xf32> to vector<16x144xf32>
    %30 = arith.mulf %27, %29 : vector<16x144xf32>
    %31 = arith.addf %26, %30 : vector<16x144xf32>
    %32 = vector.extract_strided_slice %15 {offsets = [1, 0], sizes = [16, 144], strides = [1, 1]} : vector<18x146xf32> to vector<16x144xf32>
    %c3 = arith.constant 3 : index
    %c0_13 = arith.constant 0 : index
    %33 = vector.load %arg5[%c3, %c0_13] : memref<9x144xf32, #tpu.memory_space<vmem>>, vector<1x144xf32>
    %34 = vector.broadcast %33 : vector<1x144xf32> to vector<16x144xf32>
    %35 = arith.mulf %32, %34 : vector<16x144xf32>
    %36 = arith.addf %31, %35 : vector<16x144xf32>
    %37 = vector.extract_strided_slice %15 {offsets = [1, 1], sizes = [16, 144], strides = [1, 1]} : vector<18x146xf32> to vector<16x144xf32>
    %c4 = arith.constant 4 : index
    %c0_14 = arith.constant 0 : index
    %38 = vector.load %arg5[%c4, %c0_14] : memref<9x144xf32, #tpu.memory_space<vmem>>, vector<1x144xf32>
    %39 = vector.broadcast %38 : vector<1x144xf32> to vector<16x144xf32>
    %40 = arith.mulf %37, %39 : vector<16x144xf32>
    %41 = arith.addf %36, %40 : vector<16x144xf32>
    %42 = vector.extract_strided_slice %15 {offsets = [1, 2], sizes = [16, 144], strides = [1, 1]} : vector<18x146xf32> to vector<16x144xf32>
    %c5 = arith.constant 5 : index
    %c0_15 = arith.constant 0 : index
    %43 = vector.load %arg5[%c5, %c0_15] : memref<9x144xf32, #tpu.memory_space<vmem>>, vector<1x144xf32>
    %44 = vector.broadcast %43 : vector<1x144xf32> to vector<16x144xf32>
    %45 = arith.mulf %42, %44 : vector<16x144xf32>
    %46 = arith.addf %41, %45 : vector<16x144xf32>
    %47 = vector.extract_strided_slice %15 {offsets = [2, 0], sizes = [16, 144], strides = [1, 1]} : vector<18x146xf32> to vector<16x144xf32>
    %c6 = arith.constant 6 : index
    %c0_16 = arith.constant 0 : index
    %48 = vector.load %arg5[%c6, %c0_16] : memref<9x144xf32, #tpu.memory_space<vmem>>, vector<1x144xf32>
    %49 = vector.broadcast %48 : vector<1x144xf32> to vector<16x144xf32>
    %50 = arith.mulf %47, %49 : vector<16x144xf32>
    %51 = arith.addf %46, %50 : vector<16x144xf32>
    %52 = vector.extract_strided_slice %15 {offsets = [2, 1], sizes = [16, 144], strides = [1, 1]} : vector<18x146xf32> to vector<16x144xf32>
    %c7 = arith.constant 7 : index
    %c0_17 = arith.constant 0 : index
    %53 = vector.load %arg5[%c7, %c0_17] : memref<9x144xf32, #tpu.memory_space<vmem>>, vector<1x144xf32>
    %54 = vector.broadcast %53 : vector<1x144xf32> to vector<16x144xf32>
    %55 = arith.mulf %52, %54 : vector<16x144xf32>
    %56 = arith.addf %51, %55 : vector<16x144xf32>
    %57 = vector.extract_strided_slice %15 {offsets = [2, 2], sizes = [16, 144], strides = [1, 1]} : vector<18x146xf32> to vector<16x144xf32>
    %c8 = arith.constant 8 : index
    %c0_18 = arith.constant 0 : index
    %58 = vector.load %arg5[%c8, %c0_18] : memref<9x144xf32, #tpu.memory_space<vmem>>, vector<1x144xf32>
    %59 = vector.broadcast %58 : vector<1x144xf32> to vector<16x144xf32>
    %60 = arith.mulf %57, %59 : vector<16x144xf32>
    %61 = arith.addf %56, %60 : vector<16x144xf32>
    %c0_19 = arith.constant 0 : index
    %c0_20 = arith.constant 0 : index
    %62 = vector.load %arg6[%c0_19, %c0_20] : memref<1x144xf32, #tpu.memory_space<vmem>>, vector<1x144xf32>
    %63 = vector.broadcast %62 : vector<1x144xf32> to vector<16x144xf32>
    %64 = arith.addf %61, %63 : vector<16x144xf32>
    %cst_21 = arith.constant 0.000000e+00 : f32
    %65 = vector.broadcast %cst_21 : f32 to vector<16x144xf32>
    %66 = arith.maximumf %64, %65 : vector<16x144xf32>
    %67 = vector.extract_strided_slice %66 {offsets = [0, 0], sizes = [16, 16], strides = [1, 1]} : vector<16x144xf32> to vector<16x16xf32>
    %c0_22 = arith.constant 0 : index
    %c0_23 = arith.constant 0 : index
    %c0_24 = arith.constant 0 : index
    %68 = vector.load %arg11[%c0_22, %c0_23, %c0_24] : memref<8x16x16xf32, #tpu.memory_space<vmem>>, vector<1x16x16xf32>
    %69 = vector.shape_cast %68 : vector<1x16x16xf32> to vector<16x16xf32>
    %70 = vector.shape_cast %67 : vector<16x16xf32> to vector<1x16x16xf32>
    tpu.vector_store %arg11[%c0_22, %c0_23, %c0_24], %70 {strides = array<i32>} : memref<8x16x16xf32, #tpu.memory_space<vmem>>, vector<1x16x16xf32>,
    %71 = vector.extract_strided_slice %66 {offsets = [0, 18], sizes = [16, 16], strides = [1, 1]} : vector<16x144xf32> to vector<16x16xf32>
    %c1_25 = arith.constant 1 : index
    %c0_26 = arith.constant 0 : index
    %c0_27 = arith.constant 0 : index
    %72 = vector.load %arg11[%c1_25, %c0_26, %c0_27] : memref<8x16x16xf32, #tpu.memory_space<vmem>>, vector<1x16x16xf32>
    %73 = vector.shape_cast %72 : vector<1x16x16xf32> to vector<16x16xf32>
    %74 = vector.shape_cast %71 : vector<16x16xf32> to vector<1x16x16xf32>
    tpu.vector_store %arg11[%c1_25, %c0_26, %c0_27], %74 {strides = array<i32>} : memref<8x16x16xf32, #tpu.memory_space<vmem>>, vector<1x16x16xf32>,
    %75 = vector.extract_strided_slice %66 {offsets = [0, 36], sizes = [16, 16], strides = [1, 1]} : vector<16x144xf32> to vector<16x16xf32>
    %c2_28 = arith.constant 2 : index
    %c0_29 = arith.constant 0 : index
    %c0_30 = arith.constant 0 : index
    %76 = vector.load %arg11[%c2_28, %c0_29, %c0_30] : memref<8x16x16xf32, #tpu.memory_space<vmem>>, vector<1x16x16xf32>
    %77 = vector.shape_cast %76 : vector<1x16x16xf32> to vector<16x16xf32>
    %78 = vector.shape_cast %75 : vector<16x16xf32> to vector<1x16x16xf32>
    tpu.vector_store %arg11[%c2_28, %c0_29, %c0_30], %78 {strides = array<i32>} : memref<8x16x16xf32, #tpu.memory_space<vmem>>, vector<1x16x16xf32>,
    %79 = vector.extract_strided_slice %66 {offsets = [0, 54], sizes = [16, 16], strides = [1, 1]} : vector<16x144xf32> to vector<16x16xf32>
    %c3_31 = arith.constant 3 : index
    %c0_32 = arith.constant 0 : index
    %c0_33 = arith.constant 0 : index
    %80 = vector.load %arg11[%c3_31, %c0_32, %c0_33] : memref<8x16x16xf32, #tpu.memory_space<vmem>>, vector<1x16x16xf32>
    %81 = vector.shape_cast %80 : vector<1x16x16xf32> to vector<16x16xf32>
    %82 = vector.shape_cast %79 : vector<16x16xf32> to vector<1x16x16xf32>
    tpu.vector_store %arg11[%c3_31, %c0_32, %c0_33], %82 {strides = array<i32>} : memref<8x16x16xf32, #tpu.memory_space<vmem>>, vector<1x16x16xf32>,
    %83 = vector.extract_strided_slice %66 {offsets = [0, 72], sizes = [16, 16], strides = [1, 1]} : vector<16x144xf32> to vector<16x16xf32>
    %c4_34 = arith.constant 4 : index
    %c0_35 = arith.constant 0 : index
    %c0_36 = arith.constant 0 : index
    %84 = vector.load %arg11[%c4_34, %c0_35, %c0_36] : memref<8x16x16xf32, #tpu.memory_space<vmem>>, vector<1x16x16xf32>
    %85 = vector.shape_cast %84 : vector<1x16x16xf32> to vector<16x16xf32>
    %86 = vector.shape_cast %83 : vector<16x16xf32> to vector<1x16x16xf32>
    tpu.vector_store %arg11[%c4_34, %c0_35, %c0_36], %86 {strides = array<i32>} : memref<8x16x16xf32, #tpu.memory_space<vmem>>, vector<1x16x16xf32>,
    %87 = vector.extract_strided_slice %66 {offsets = [0, 90], sizes = [16, 16], strides = [1, 1]} : vector<16x144xf32> to vector<16x16xf32>
    %c5_37 = arith.constant 5 : index
    %c0_38 = arith.constant 0 : index
    %c0_39 = arith.constant 0 : index
    %88 = vector.load %arg11[%c5_37, %c0_38, %c0_39] : memref<8x16x16xf32, #tpu.memory_space<vmem>>, vector<1x16x16xf32>
    %89 = vector.shape_cast %88 : vector<1x16x16xf32> to vector<16x16xf32>
    %90 = vector.shape_cast %87 : vector<16x16xf32> to vector<1x16x16xf32>
    tpu.vector_store %arg11[%c5_37, %c0_38, %c0_39], %90 {strides = array<i32>} : memref<8x16x16xf32, #tpu.memory_space<vmem>>, vector<1x16x16xf32>,
    %91 = vector.extract_strided_slice %66 {offsets = [0, 108], sizes = [16, 16], strides = [1, 1]} : vector<16x144xf32> to vector<16x16xf32>
    %c6_40 = arith.constant 6 : index
    %c0_41 = arith.constant 0 : index
    %c0_42 = arith.constant 0 : index
    %92 = vector.load %arg11[%c6_40, %c0_41, %c0_42] : memref<8x16x16xf32, #tpu.memory_space<vmem>>, vector<1x16x16xf32>
    %93 = vector.shape_cast %92 : vector<1x16x16xf32> to vector<16x16xf32>
    %94 = vector.shape_cast %91 : vector<16x16xf32> to vector<1x16x16xf32>
    tpu.vector_store %arg11[%c6_40, %c0_41, %c0_42], %94 {strides = array<i32>} : memref<8x16x16xf32, #tpu.memory_space<vmem>>, vector<1x16x16xf32>,
    %95 = vector.extract_strided_slice %66 {offsets = [0, 126], sizes = [16, 16], strides = [1, 1]} : vector<16x144xf32> to vector<16x16xf32>
    %c7_43 = arith.constant 7 : index
    %c0_44 = arith.constant 0 : index
    %c0_45 = arith.constant 0 : index
    %96 = vector.load %arg11[%c7_43, %c0_44, %c0_45] : memref<8x16x16xf32, #tpu.memory_space<vmem>>, vector<1x16x16xf32>
    %97 = vector.shape_cast %96 : vector<1x16x16xf32> to vector<16x16xf32>
    %98 = vector.shape_cast %95 : vector<16x16xf32> to vector<1x16x16xf32>
    tpu.vector_store %arg11[%c7_43, %c0_44, %c0_45], %98 {strides = array<i32>} : memref<8x16x16xf32, #tpu.memory_space<vmem>>, vector<1x16x16xf32>,
    %c0_46 = arith.constant 0 : index
    %c0_47 = arith.constant 0 : index
    %99 = vector.load %arg7[%c0_46, %c0_47] : memref<8x8xf32, #tpu.memory_space<vmem>>, vector<8x8xf32>
    %c0_48 = arith.constant 0 : index
    %c0_49 = arith.constant 0 : index
    %100 = vector.load %arg8[%c0_48, %c0_49] : memref<8x4xf32, #tpu.memory_space<vmem>>, vector<8x4xf32>
    %c0_50 = arith.constant 0 : index
    %c0_51 = arith.constant 0 : index
    %101 = vector.load %arg9[%c0_50, %c0_51] : memref<8x1xf32, #tpu.memory_space<vmem>>, vector<8x1xf32>
    %c0_52 = arith.constant 0 : index
    %c0_53 = arith.constant 0 : index
    %c0_54 = arith.constant 0 : index
    %102 = vector.load %arg11[%c0_52, %c0_53, %c0_54] : memref<8x16x16xf32, #tpu.memory_space<vmem>>, vector<8x1x16xf32>
    %103 = vector.shape_cast %102 : vector<8x1x16xf32> to vector<8x16xf32>
    %c0_55 = arith.constant 0 : index
    %c0_56 = arith.constant 0 : index
    %c0_57 = arith.constant 0 : index
    %c0_58 = arith.constant 0 : index
    %104 = vector.load %arg1[%c0_55, %c0_56, %c0_57, %c0_58] : memref<1x4x16x16xf32, #tpu.memory_space<vmem>>, vector<1x4x1x16xf32>
    %105 = vector.shape_cast %104 : vector<1x4x1x16xf32> to vector<4x16xf32>
    %cst_59 = arith.constant dense<0.000000e+00> : vector<8x16xf32>
    %106 = tpu.matmul %99, %103, %cst_59 {dimension_numbers = #tpu.dot_dimension_numbers<[1], [0], [0], [1], [0, 0, 1, 1], [], []>} : vector<8x8xf32>, vector<8x16xf32>, vector<8x16xf32> -> vector<8x16xf32>
    %cst_60 = arith.constant dense<0.000000e+00> : vector<8x16xf32>
    %107 = tpu.matmul %100, %105, %cst_60 {dimension_numbers = #tpu.dot_dimension_numbers<[1], [0], [0], [1], [0, 0, 1, 1], [], []>} : vector<8x4xf32>, vector<4x16xf32>, vector<8x16xf32> -> vector<8x16xf32>
    %108 = arith.addf %106, %107 : vector<8x16xf32>
    %109 = vector.broadcast %101 : vector<8x1xf32> to vector<8x16xf32>
    %110 = arith.addf %108, %109 : vector<8x16xf32>
    %cst_61 = arith.constant 0.000000e+00 : f32
    %111 = vector.broadcast %cst_61 : f32 to vector<8x16xf32>
    %112 = arith.maximumf %110, %111 : vector<8x16xf32>
    %c0_62 = arith.constant 0 : index
    %c0_63 = arith.constant 0 : index
    %c0_64 = arith.constant 0 : index
    %c0_65 = arith.constant 0 : index
    %113 = vector.load %arg10[%c0_62, %c0_63, %c0_64, %c0_65] : memref<1x8x16x16xf32, #tpu.memory_space<vmem>>, vector<1x8x1x16xf32>
    %114 = vector.shape_cast %113 : vector<1x8x1x16xf32> to vector<8x16xf32>
    %115 = vector.shape_cast %112 : vector<8x16xf32> to vector<1x8x1x16xf32>
    tpu.vector_store %arg10[%c0_62, %c0_63, %c0_64, %c0_65], %115 {strides = array<i32>} : memref<1x8x16x16xf32, #tpu.memory_space<vmem>>, vector<1x8x1x16xf32>,
    %c0_66 = arith.constant 0 : index
    %c1_67 = arith.constant 1 : index
    %c0_68 = arith.constant 0 : index
    %116 = vector.load %arg11[%c0_66, %c1_67, %c0_68] : memref<8x16x16xf32, #tpu.memory_space<vmem>>, vector<8x1x16xf32>
    %117 = vector.shape_cast %116 : vector<8x1x16xf32> to vector<8x16xf32>
    %c0_69 = arith.constant 0 : index
    %c0_70 = arith.constant 0 : index
    %c1_71 = arith.constant 1 : index
    %c0_72 = arith.constant 0 : index
    %118 = vector.load %arg1[%c0_69, %c0_70, %c1_71, %c0_72] : memref<1x4x16x16xf32, #tpu.memory_space<vmem>>, vector<1x4x1x16xf32>
    %119 = vector.shape_cast %118 : vector<1x4x1x16xf32> to vector<4x16xf32>
    %cst_73 = arith.constant dense<0.000000e+00> : vector<8x16xf32>
    %120 = tpu.matmul %99, %117, %cst_73 {dimension_numbers = #tpu.dot_dimension_numbers<[1], [0], [0], [1], [0, 0, 1, 1], [], []>} : vector<8x8xf32>, vector<8x16xf32>, vector<8x16xf32> -> vector<8x16xf32>
    %cst_74 = arith.constant dense<0.000000e+00> : vector<8x16xf32>
    %121 = tpu.matmul %100, %119, %cst_74 {dimension_numbers = #tpu.dot_dimension_numbers<[1], [0], [0], [1], [0, 0, 1, 1], [], []>} : vector<8x4xf32>, vector<4x16xf32>, vector<8x16xf32> -> vector<8x16xf32>
    %122 = arith.addf %120, %121 : vector<8x16xf32>
    %123 = vector.broadcast %101 : vector<8x1xf32> to vector<8x16xf32>
    %124 = arith.addf %122, %123 : vector<8x16xf32>
    %cst_75 = arith.constant 0.000000e+00 : f32
    %125 = vector.broadcast %cst_75 : f32 to vector<8x16xf32>
    %126 = arith.maximumf %124, %125 : vector<8x16xf32>
    %c0_76 = arith.constant 0 : index
    %c0_77 = arith.constant 0 : index
    %c1_78 = arith.constant 1 : index
    %c0_79 = arith.constant 0 : index
    %127 = vector.load %arg10[%c0_76, %c0_77, %c1_78, %c0_79] : memref<1x8x16x16xf32, #tpu.memory_space<vmem>>, vector<1x8x1x16xf32>
    %128 = vector.shape_cast %127 : vector<1x8x1x16xf32> to vector<8x16xf32>
    %129 = vector.shape_cast %126 : vector<8x16xf32> to vector<1x8x1x16xf32>
    tpu.vector_store %arg10[%c0_76, %c0_77, %c1_78, %c0_79], %129 {strides = array<i32>} : memref<1x8x16x16xf32, #tpu.memory_space<vmem>>, vector<1x8x1x16xf32>,
    %c0_80 = arith.constant 0 : index
    %c2_81 = arith.constant 2 : index
    %c0_82 = arith.constant 0 : index
    %130 = vector.load %arg11[%c0_80, %c2_81, %c0_82] : memref<8x16x16xf32, #tpu.memory_space<vmem>>, vector<8x1x16xf32>
    %131 = vector.shape_cast %130 : vector<8x1x16xf32> to vector<8x16xf32>
    %c0_83 = arith.constant 0 : index
    %c0_84 = arith.constant 0 : index
    %c2_85 = arith.constant 2 : index
    %c0_86 = arith.constant 0 : index
    %132 = vector.load %arg1[%c0_83, %c0_84, %c2_85, %c0_86] : memref<1x4x16x16xf32, #tpu.memory_space<vmem>>, vector<1x4x1x16xf32>
    %133 = vector.shape_cast %132 : vector<1x4x1x16xf32> to vector<4x16xf32>
    %cst_87 = arith.constant dense<0.000000e+00> : vector<8x16xf32>
    %134 = tpu.matmul %99, %131, %cst_87 {dimension_numbers = #tpu.dot_dimension_numbers<[1], [0], [0], [1], [0, 0, 1, 1], [], []>} : vector<8x8xf32>, vector<8x16xf32>, vector<8x16xf32> -> vector<8x16xf32>
    %cst_88 = arith.constant dense<0.000000e+00> : vector<8x16xf32>
    %135 = tpu.matmul %100, %133, %cst_88 {dimension_numbers = #tpu.dot_dimension_numbers<[1], [0], [0], [1], [0, 0, 1, 1], [], []>} : vector<8x4xf32>, vector<4x16xf32>, vector<8x16xf32> -> vector<8x16xf32>
    %136 = arith.addf %134, %135 : vector<8x16xf32>
    %137 = vector.broadcast %101 : vector<8x1xf32> to vector<8x16xf32>
    %138 = arith.addf %136, %137 : vector<8x16xf32>
    %cst_89 = arith.constant 0.000000e+00 : f32
    %139 = vector.broadcast %cst_89 : f32 to vector<8x16xf32>
    %140 = arith.maximumf %138, %139 : vector<8x16xf32>
    %c0_90 = arith.constant 0 : index
    %c0_91 = arith.constant 0 : index
    %c2_92 = arith.constant 2 : index
    %c0_93 = arith.constant 0 : index
    %141 = vector.load %arg10[%c0_90, %c0_91, %c2_92, %c0_93] : memref<1x8x16x16xf32, #tpu.memory_space<vmem>>, vector<1x8x1x16xf32>
    %142 = vector.shape_cast %141 : vector<1x8x1x16xf32> to vector<8x16xf32>
    %143 = vector.shape_cast %140 : vector<8x16xf32> to vector<1x8x1x16xf32>
    tpu.vector_store %arg10[%c0_90, %c0_91, %c2_92, %c0_93], %143 {strides = array<i32>} : memref<1x8x16x16xf32, #tpu.memory_space<vmem>>, vector<1x8x1x16xf32>,
    %c0_94 = arith.constant 0 : index
    %c3_95 = arith.constant 3 : index
    %c0_96 = arith.constant 0 : index
    %144 = vector.load %arg11[%c0_94, %c3_95, %c0_96] : memref<8x16x16xf32, #tpu.memory_space<vmem>>, vector<8x1x16xf32>
    %145 = vector.shape_cast %144 : vector<8x1x16xf32> to vector<8x16xf32>
    %c0_97 = arith.constant 0 : index
    %c0_98 = arith.constant 0 : index
    %c3_99 = arith.constant 3 : index
    %c0_100 = arith.constant 0 : index
    %146 = vector.load %arg1[%c0_97, %c0_98, %c3_99, %c0_100] : memref<1x4x16x16xf32, #tpu.memory_space<vmem>>, vector<1x4x1x16xf32>
    %147 = vector.shape_cast %146 : vector<1x4x1x16xf32> to vector<4x16xf32>
    %cst_101 = arith.constant dense<0.000000e+00> : vector<8x16xf32>
    %148 = tpu.matmul %99, %145, %cst_101 {dimension_numbers = #tpu.dot_dimension_numbers<[1], [0], [0], [1], [0, 0, 1, 1], [], []>} : vector<8x8xf32>, vector<8x16xf32>, vector<8x16xf32> -> vector<8x16xf32>
    %cst_102 = arith.constant dense<0.000000e+00> : vector<8x16xf32>
    %149 = tpu.matmul %100, %147, %cst_102 {dimension_numbers = #tpu.dot_dimension_numbers<[1], [0], [0], [1], [0, 0, 1, 1], [], []>} : vector<8x4xf32>, vector<4x16xf32>, vector<8x16xf32> -> vector<8x16xf32>
    %150 = arith.addf %148, %149 : vector<8x16xf32>
    %151 = vector.broadcast %101 : vector<8x1xf32> to vector<8x16xf32>
    %152 = arith.addf %150, %151 : vector<8x16xf32>
    %cst_103 = arith.constant 0.000000e+00 : f32
    %153 = vector.broadcast %cst_103 : f32 to vector<8x16xf32>
    %154 = arith.maximumf %152, %153 : vector<8x16xf32>
    %c0_104 = arith.constant 0 : index
    %c0_105 = arith.constant 0 : index
    %c3_106 = arith.constant 3 : index
    %c0_107 = arith.constant 0 : index
    %155 = vector.load %arg10[%c0_104, %c0_105, %c3_106, %c0_107] : memref<1x8x16x16xf32, #tpu.memory_space<vmem>>, vector<1x8x1x16xf32>
    %156 = vector.shape_cast %155 : vector<1x8x1x16xf32> to vector<8x16xf32>
    %157 = vector.shape_cast %154 : vector<8x16xf32> to vector<1x8x1x16xf32>
    tpu.vector_store %arg10[%c0_104, %c0_105, %c3_106, %c0_107], %157 {strides = array<i32>} : memref<1x8x16x16xf32, #tpu.memory_space<vmem>>, vector<1x8x1x16xf32>,
    %c0_108 = arith.constant 0 : index
    %c4_109 = arith.constant 4 : index
    %c0_110 = arith.constant 0 : index
    %158 = vector.load %arg11[%c0_108, %c4_109, %c0_110] : memref<8x16x16xf32, #tpu.memory_space<vmem>>, vector<8x1x16xf32>
    %159 = vector.shape_cast %158 : vector<8x1x16xf32> to vector<8x16xf32>
    %c0_111 = arith.constant 0 : index
    %c0_112 = arith.constant 0 : index
    %c4_113 = arith.constant 4 : index
    %c0_114 = arith.constant 0 : index
    %160 = vector.load %arg1[%c0_111, %c0_112, %c4_113, %c0_114] : memref<1x4x16x16xf32, #tpu.memory_space<vmem>>, vector<1x4x1x16xf32>
    %161 = vector.shape_cast %160 : vector<1x4x1x16xf32> to vector<4x16xf32>
    %cst_115 = arith.constant dense<0.000000e+00> : vector<8x16xf32>
    %162 = tpu.matmul %99, %159, %cst_115 {dimension_numbers = #tpu.dot_dimension_numbers<[1], [0], [0], [1], [0, 0, 1, 1], [], []>} : vector<8x8xf32>, vector<8x16xf32>, vector<8x16xf32> -> vector<8x16xf32>
    %cst_116 = arith.constant dense<0.000000e+00> : vector<8x16xf32>
    %163 = tpu.matmul %100, %161, %cst_116 {dimension_numbers = #tpu.dot_dimension_numbers<[1], [0], [0], [1], [0, 0, 1, 1], [], []>} : vector<8x4xf32>, vector<4x16xf32>, vector<8x16xf32> -> vector<8x16xf32>
    %164 = arith.addf %162, %163 : vector<8x16xf32>
    %165 = vector.broadcast %101 : vector<8x1xf32> to vector<8x16xf32>
    %166 = arith.addf %164, %165 : vector<8x16xf32>
    %cst_117 = arith.constant 0.000000e+00 : f32
    %167 = vector.broadcast %cst_117 : f32 to vector<8x16xf32>
    %168 = arith.maximumf %166, %167 : vector<8x16xf32>
    %c0_118 = arith.constant 0 : index
    %c0_119 = arith.constant 0 : index
    %c4_120 = arith.constant 4 : index
    %c0_121 = arith.constant 0 : index
    %169 = vector.load %arg10[%c0_118, %c0_119, %c4_120, %c0_121] : memref<1x8x16x16xf32, #tpu.memory_space<vmem>>, vector<1x8x1x16xf32>
    %170 = vector.shape_cast %169 : vector<1x8x1x16xf32> to vector<8x16xf32>
    %171 = vector.shape_cast %168 : vector<8x16xf32> to vector<1x8x1x16xf32>
    tpu.vector_store %arg10[%c0_118, %c0_119, %c4_120, %c0_121], %171 {strides = array<i32>} : memref<1x8x16x16xf32, #tpu.memory_space<vmem>>, vector<1x8x1x16xf32>,
    %c0_122 = arith.constant 0 : index
    %c5_123 = arith.constant 5 : index
    %c0_124 = arith.constant 0 : index
    %172 = vector.load %arg11[%c0_122, %c5_123, %c0_124] : memref<8x16x16xf32, #tpu.memory_space<vmem>>, vector<8x1x16xf32>
    %173 = vector.shape_cast %172 : vector<8x1x16xf32> to vector<8x16xf32>
    %c0_125 = arith.constant 0 : index
    %c0_126 = arith.constant 0 : index
    %c5_127 = arith.constant 5 : index
    %c0_128 = arith.constant 0 : index
    %174 = vector.load %arg1[%c0_125, %c0_126, %c5_127, %c0_128] : memref<1x4x16x16xf32, #tpu.memory_space<vmem>>, vector<1x4x1x16xf32>
    %175 = vector.shape_cast %174 : vector<1x4x1x16xf32> to vector<4x16xf32>
    %cst_129 = arith.constant dense<0.000000e+00> : vector<8x16xf32>
    %176 = tpu.matmul %99, %173, %cst_129 {dimension_numbers = #tpu.dot_dimension_numbers<[1], [0], [0], [1], [0, 0, 1, 1], [], []>} : vector<8x8xf32>, vector<8x16xf32>, vector<8x16xf32> -> vector<8x16xf32>
    %cst_130 = arith.constant dense<0.000000e+00> : vector<8x16xf32>
    %177 = tpu.matmul %100, %175, %cst_130 {dimension_numbers = #tpu.dot_dimension_numbers<[1], [0], [0], [1], [0, 0, 1, 1], [], []>} : vector<8x4xf32>, vector<4x16xf32>, vector<8x16xf32> -> vector<8x16xf32>
    %178 = arith.addf %176, %177 : vector<8x16xf32>
    %179 = vector.broadcast %101 : vector<8x1xf32> to vector<8x16xf32>
    %180 = arith.addf %178, %179 : vector<8x16xf32>
    %cst_131 = arith.constant 0.000000e+00 : f32
    %181 = vector.broadcast %cst_131 : f32 to vector<8x16xf32>
    %182 = arith.maximumf %180, %181 : vector<8x16xf32>
    %c0_132 = arith.constant 0 : index
    %c0_133 = arith.constant 0 : index
    %c5_134 = arith.constant 5 : index
    %c0_135 = arith.constant 0 : index
    %183 = vector.load %arg10[%c0_132, %c0_133, %c5_134, %c0_135] : memref<1x8x16x16xf32, #tpu.memory_space<vmem>>, vector<1x8x1x16xf32>
    %184 = vector.shape_cast %183 : vector<1x8x1x16xf32> to vector<8x16xf32>
    %185 = vector.shape_cast %182 : vector<8x16xf32> to vector<1x8x1x16xf32>
    tpu.vector_store %arg10[%c0_132, %c0_133, %c5_134, %c0_135], %185 {strides = array<i32>} : memref<1x8x16x16xf32, #tpu.memory_space<vmem>>, vector<1x8x1x16xf32>,
    %c0_136 = arith.constant 0 : index
    %c6_137 = arith.constant 6 : index
    %c0_138 = arith.constant 0 : index
    %186 = vector.load %arg11[%c0_136, %c6_137, %c0_138] : memref<8x16x16xf32, #tpu.memory_space<vmem>>, vector<8x1x16xf32>
    %187 = vector.shape_cast %186 : vector<8x1x16xf32> to vector<8x16xf32>
    %c0_139 = arith.constant 0 : index
    %c0_140 = arith.constant 0 : index
    %c6_141 = arith.constant 6 : index
    %c0_142 = arith.constant 0 : index
    %188 = vector.load %arg1[%c0_139, %c0_140, %c6_141, %c0_142] : memref<1x4x16x16xf32, #tpu.memory_space<vmem>>, vector<1x4x1x16xf32>
    %189 = vector.shape_cast %188 : vector<1x4x1x16xf32> to vector<4x16xf32>
    %cst_143 = arith.constant dense<0.000000e+00> : vector<8x16xf32>
    %190 = tpu.matmul %99, %187, %cst_143 {dimension_numbers = #tpu.dot_dimension_numbers<[1], [0], [0], [1], [0, 0, 1, 1], [], []>} : vector<8x8xf32>, vector<8x16xf32>, vector<8x16xf32> -> vector<8x16xf32>
    %cst_144 = arith.constant dense<0.000000e+00> : vector<8x16xf32>
    %191 = tpu.matmul %100, %189, %cst_144 {dimension_numbers = #tpu.dot_dimension_numbers<[1], [0], [0], [1], [0, 0, 1, 1], [], []>} : vector<8x4xf32>, vector<4x16xf32>, vector<8x16xf32> -> vector<8x16xf32>
    %192 = arith.addf %190, %191 : vector<8x16xf32>
    %193 = vector.broadcast %101 : vector<8x1xf32> to vector<8x16xf32>
    %194 = arith.addf %192, %193 : vector<8x16xf32>
    %cst_145 = arith.constant 0.000000e+00 : f32
    %195 = vector.broadcast %cst_145 : f32 to vector<8x16xf32>
    %196 = arith.maximumf %194, %195 : vector<8x16xf32>
    %c0_146 = arith.constant 0 : index
    %c0_147 = arith.constant 0 : index
    %c6_148 = arith.constant 6 : index
    %c0_149 = arith.constant 0 : index
    %197 = vector.load %arg10[%c0_146, %c0_147, %c6_148, %c0_149] : memref<1x8x16x16xf32, #tpu.memory_space<vmem>>, vector<1x8x1x16xf32>
    %198 = vector.shape_cast %197 : vector<1x8x1x16xf32> to vector<8x16xf32>
    %199 = vector.shape_cast %196 : vector<8x16xf32> to vector<1x8x1x16xf32>
    tpu.vector_store %arg10[%c0_146, %c0_147, %c6_148, %c0_149], %199 {strides = array<i32>} : memref<1x8x16x16xf32, #tpu.memory_space<vmem>>, vector<1x8x1x16xf32>,
    %c0_150 = arith.constant 0 : index
    %c7_151 = arith.constant 7 : index
    %c0_152 = arith.constant 0 : index
    %200 = vector.load %arg11[%c0_150, %c7_151, %c0_152] : memref<8x16x16xf32, #tpu.memory_space<vmem>>, vector<8x1x16xf32>
    %201 = vector.shape_cast %200 : vector<8x1x16xf32> to vector<8x16xf32>
    %c0_153 = arith.constant 0 : index
    %c0_154 = arith.constant 0 : index
    %c7_155 = arith.constant 7 : index
    %c0_156 = arith.constant 0 : index
    %202 = vector.load %arg1[%c0_153, %c0_154, %c7_155, %c0_156] : memref<1x4x16x16xf32, #tpu.memory_space<vmem>>, vector<1x4x1x16xf32>
    %203 = vector.shape_cast %202 : vector<1x4x1x16xf32> to vector<4x16xf32>
    %cst_157 = arith.constant dense<0.000000e+00> : vector<8x16xf32>
    %204 = tpu.matmul %99, %201, %cst_157 {dimension_numbers = #tpu.dot_dimension_numbers<[1], [0], [0], [1], [0, 0, 1, 1], [], []>} : vector<8x8xf32>, vector<8x16xf32>, vector<8x16xf32> -> vector<8x16xf32>
    %cst_158 = arith.constant dense<0.000000e+00> : vector<8x16xf32>
    %205 = tpu.matmul %100, %203, %cst_158 {dimension_numbers = #tpu.dot_dimension_numbers<[1], [0], [0], [1], [0, 0, 1, 1], [], []>} : vector<8x4xf32>, vector<4x16xf32>, vector<8x16xf32> -> vector<8x16xf32>
    %206 = arith.addf %204, %205 : vector<8x16xf32>
    %207 = vector.broadcast %101 : vector<8x1xf32> to vector<8x16xf32>
    %208 = arith.addf %206, %207 : vector<8x16xf32>
    %cst_159 = arith.constant 0.000000e+00 : f32
    %209 = vector.broadcast %cst_159 : f32 to vector<8x16xf32>
    %210 = arith.maximumf %208, %209 : vector<8x16xf32>
    %c0_160 = arith.constant 0 : index
    %c0_161 = arith.constant 0 : index
    %c7_162 = arith.constant 7 : index
    %c0_163 = arith.constant 0 : index
    %211 = vector.load %arg10[%c0_160, %c0_161, %c7_162, %c0_163] : memref<1x8x16x16xf32, #tpu.memory_space<vmem>>, vector<1x8x1x16xf32>
    %212 = vector.shape_cast %211 : vector<1x8x1x16xf32> to vector<8x16xf32>
    %213 = vector.shape_cast %210 : vector<8x16xf32> to vector<1x8x1x16xf32>
    tpu.vector_store %arg10[%c0_160, %c0_161, %c7_162, %c0_163], %213 {strides = array<i32>} : memref<1x8x16x16xf32, #tpu.memory_space<vmem>>, vector<1x8x1x16xf32>,
    %c0_164 = arith.constant 0 : index
    %c8_165 = arith.constant 8 : index
    %c0_166 = arith.constant 0 : index
    %214 = vector.load %arg11[%c0_164, %c8_165, %c0_166] : memref<8x16x16xf32, #tpu.memory_space<vmem>>, vector<8x1x16xf32>
    %215 = vector.shape_cast %214 : vector<8x1x16xf32> to vector<8x16xf32>
    %c0_167 = arith.constant 0 : index
    %c0_168 = arith.constant 0 : index
    %c8_169 = arith.constant 8 : index
    %c0_170 = arith.constant 0 : index
    %216 = vector.load %arg1[%c0_167, %c0_168, %c8_169, %c0_170] : memref<1x4x16x16xf32, #tpu.memory_space<vmem>>, vector<1x4x1x16xf32>
    %217 = vector.shape_cast %216 : vector<1x4x1x16xf32> to vector<4x16xf32>
    %cst_171 = arith.constant dense<0.000000e+00> : vector<8x16xf32>
    %218 = tpu.matmul %99, %215, %cst_171 {dimension_numbers = #tpu.dot_dimension_numbers<[1], [0], [0], [1], [0, 0, 1, 1], [], []>} : vector<8x8xf32>, vector<8x16xf32>, vector<8x16xf32> -> vector<8x16xf32>
    %cst_172 = arith.constant dense<0.000000e+00> : vector<8x16xf32>
    %219 = tpu.matmul %100, %217, %cst_172 {dimension_numbers = #tpu.dot_dimension_numbers<[1], [0], [0], [1], [0, 0, 1, 1], [], []>} : vector<8x4xf32>, vector<4x16xf32>, vector<8x16xf32> -> vector<8x16xf32>
    %220 = arith.addf %218, %219 : vector<8x16xf32>
    %221 = vector.broadcast %101 : vector<8x1xf32> to vector<8x16xf32>
    %222 = arith.addf %220, %221 : vector<8x16xf32>
    %cst_173 = arith.constant 0.000000e+00 : f32
    %223 = vector.broadcast %cst_173 : f32 to vector<8x16xf32>
    %224 = arith.maximumf %222, %223 : vector<8x16xf32>
    %c0_174 = arith.constant 0 : index
    %c0_175 = arith.constant 0 : index
    %c8_176 = arith.constant 8 : index
    %c0_177 = arith.constant 0 : index
    %225 = vector.load %arg10[%c0_174, %c0_175, %c8_176, %c0_177] : memref<1x8x16x16xf32, #tpu.memory_space<vmem>>, vector<1x8x1x16xf32>
    %226 = vector.shape_cast %225 : vector<1x8x1x16xf32> to vector<8x16xf32>
    %227 = vector.shape_cast %224 : vector<8x16xf32> to vector<1x8x1x16xf32>
    tpu.vector_store %arg10[%c0_174, %c0_175, %c8_176, %c0_177], %227 {strides = array<i32>} : memref<1x8x16x16xf32, #tpu.memory_space<vmem>>, vector<1x8x1x16xf32>,
    %c0_178 = arith.constant 0 : index
    %c9 = arith.constant 9 : index
    %c0_179 = arith.constant 0 : index
    %228 = vector.load %arg11[%c0_178, %c9, %c0_179] : memref<8x16x16xf32, #tpu.memory_space<vmem>>, vector<8x1x16xf32>
    %229 = vector.shape_cast %228 : vector<8x1x16xf32> to vector<8x16xf32>
    %c0_180 = arith.constant 0 : index
    %c0_181 = arith.constant 0 : index
    %c9_182 = arith.constant 9 : index
    %c0_183 = arith.constant 0 : index
    %230 = vector.load %arg1[%c0_180, %c0_181, %c9_182, %c0_183] : memref<1x4x16x16xf32, #tpu.memory_space<vmem>>, vector<1x4x1x16xf32>
    %231 = vector.shape_cast %230 : vector<1x4x1x16xf32> to vector<4x16xf32>
    %cst_184 = arith.constant dense<0.000000e+00> : vector<8x16xf32>
    %232 = tpu.matmul %99, %229, %cst_184 {dimension_numbers = #tpu.dot_dimension_numbers<[1], [0], [0], [1], [0, 0, 1, 1], [], []>} : vector<8x8xf32>, vector<8x16xf32>, vector<8x16xf32> -> vector<8x16xf32>
    %cst_185 = arith.constant dense<0.000000e+00> : vector<8x16xf32>
    %233 = tpu.matmul %100, %231, %cst_185 {dimension_numbers = #tpu.dot_dimension_numbers<[1], [0], [0], [1], [0, 0, 1, 1], [], []>} : vector<8x4xf32>, vector<4x16xf32>, vector<8x16xf32> -> vector<8x16xf32>
    %234 = arith.addf %232, %233 : vector<8x16xf32>
    %235 = vector.broadcast %101 : vector<8x1xf32> to vector<8x16xf32>
    %236 = arith.addf %234, %235 : vector<8x16xf32>
    %cst_186 = arith.constant 0.000000e+00 : f32
    %237 = vector.broadcast %cst_186 : f32 to vector<8x16xf32>
    %238 = arith.maximumf %236, %237 : vector<8x16xf32>
    %c0_187 = arith.constant 0 : index
    %c0_188 = arith.constant 0 : index
    %c9_189 = arith.constant 9 : index
    %c0_190 = arith.constant 0 : index
    %239 = vector.load %arg10[%c0_187, %c0_188, %c9_189, %c0_190] : memref<1x8x16x16xf32, #tpu.memory_space<vmem>>, vector<1x8x1x16xf32>
    %240 = vector.shape_cast %239 : vector<1x8x1x16xf32> to vector<8x16xf32>
    %241 = vector.shape_cast %238 : vector<8x16xf32> to vector<1x8x1x16xf32>
    tpu.vector_store %arg10[%c0_187, %c0_188, %c9_189, %c0_190], %241 {strides = array<i32>} : memref<1x8x16x16xf32, #tpu.memory_space<vmem>>, vector<1x8x1x16xf32>,
    %c0_191 = arith.constant 0 : index
    %c10 = arith.constant 10 : index
    %c0_192 = arith.constant 0 : index
    %242 = vector.load %arg11[%c0_191, %c10, %c0_192] : memref<8x16x16xf32, #tpu.memory_space<vmem>>, vector<8x1x16xf32>
    %243 = vector.shape_cast %242 : vector<8x1x16xf32> to vector<8x16xf32>
    %c0_193 = arith.constant 0 : index
    %c0_194 = arith.constant 0 : index
    %c10_195 = arith.constant 10 : index
    %c0_196 = arith.constant 0 : index
    %244 = vector.load %arg1[%c0_193, %c0_194, %c10_195, %c0_196] : memref<1x4x16x16xf32, #tpu.memory_space<vmem>>, vector<1x4x1x16xf32>
    %245 = vector.shape_cast %244 : vector<1x4x1x16xf32> to vector<4x16xf32>
    %cst_197 = arith.constant dense<0.000000e+00> : vector<8x16xf32>
    %246 = tpu.matmul %99, %243, %cst_197 {dimension_numbers = #tpu.dot_dimension_numbers<[1], [0], [0], [1], [0, 0, 1, 1], [], []>} : vector<8x8xf32>, vector<8x16xf32>, vector<8x16xf32> -> vector<8x16xf32>
    %cst_198 = arith.constant dense<0.000000e+00> : vector<8x16xf32>
    %247 = tpu.matmul %100, %245, %cst_198 {dimension_numbers = #tpu.dot_dimension_numbers<[1], [0], [0], [1], [0, 0, 1, 1], [], []>} : vector<8x4xf32>, vector<4x16xf32>, vector<8x16xf32> -> vector<8x16xf32>
    %248 = arith.addf %246, %247 : vector<8x16xf32>
    %249 = vector.broadcast %101 : vector<8x1xf32> to vector<8x16xf32>
    %250 = arith.addf %248, %249 : vector<8x16xf32>
    %cst_199 = arith.constant 0.000000e+00 : f32
    %251 = vector.broadcast %cst_199 : f32 to vector<8x16xf32>
    %252 = arith.maximumf %250, %251 : vector<8x16xf32>
    %c0_200 = arith.constant 0 : index
    %c0_201 = arith.constant 0 : index
    %c10_202 = arith.constant 10 : index
    %c0_203 = arith.constant 0 : index
    %253 = vector.load %arg10[%c0_200, %c0_201, %c10_202, %c0_203] : memref<1x8x16x16xf32, #tpu.memory_space<vmem>>, vector<1x8x1x16xf32>
    %254 = vector.shape_cast %253 : vector<1x8x1x16xf32> to vector<8x16xf32>
    %255 = vector.shape_cast %252 : vector<8x16xf32> to vector<1x8x1x16xf32>
    tpu.vector_store %arg10[%c0_200, %c0_201, %c10_202, %c0_203], %255 {strides = array<i32>} : memref<1x8x16x16xf32, #tpu.memory_space<vmem>>, vector<1x8x1x16xf32>,
    %c0_204 = arith.constant 0 : index
    %c11 = arith.constant 11 : index
    %c0_205 = arith.constant 0 : index
    %256 = vector.load %arg11[%c0_204, %c11, %c0_205] : memref<8x16x16xf32, #tpu.memory_space<vmem>>, vector<8x1x16xf32>
    %257 = vector.shape_cast %256 : vector<8x1x16xf32> to vector<8x16xf32>
    %c0_206 = arith.constant 0 : index
    %c0_207 = arith.constant 0 : index
    %c11_208 = arith.constant 11 : index
    %c0_209 = arith.constant 0 : index
    %258 = vector.load %arg1[%c0_206, %c0_207, %c11_208, %c0_209] : memref<1x4x16x16xf32, #tpu.memory_space<vmem>>, vector<1x4x1x16xf32>
    %259 = vector.shape_cast %258 : vector<1x4x1x16xf32> to vector<4x16xf32>
    %cst_210 = arith.constant dense<0.000000e+00> : vector<8x16xf32>
    %260 = tpu.matmul %99, %257, %cst_210 {dimension_numbers = #tpu.dot_dimension_numbers<[1], [0], [0], [1], [0, 0, 1, 1], [], []>} : vector<8x8xf32>, vector<8x16xf32>, vector<8x16xf32> -> vector<8x16xf32>
    %cst_211 = arith.constant dense<0.000000e+00> : vector<8x16xf32>
    %261 = tpu.matmul %100, %259, %cst_211 {dimension_numbers = #tpu.dot_dimension_numbers<[1], [0], [0], [1], [0, 0, 1, 1], [], []>} : vector<8x4xf32>, vector<4x16xf32>, vector<8x16xf32> -> vector<8x16xf32>
    %262 = arith.addf %260, %261 : vector<8x16xf32>
    %263 = vector.broadcast %101 : vector<8x1xf32> to vector<8x16xf32>
    %264 = arith.addf %262, %263 : vector<8x16xf32>
    %cst_212 = arith.constant 0.000000e+00 : f32
    %265 = vector.broadcast %cst_212 : f32 to vector<8x16xf32>
    %266 = arith.maximumf %264, %265 : vector<8x16xf32>
    %c0_213 = arith.constant 0 : index
    %c0_214 = arith.constant 0 : index
    %c11_215 = arith.constant 11 : index
    %c0_216 = arith.constant 0 : index
    %267 = vector.load %arg10[%c0_213, %c0_214, %c11_215, %c0_216] : memref<1x8x16x16xf32, #tpu.memory_space<vmem>>, vector<1x8x1x16xf32>
    %268 = vector.shape_cast %267 : vector<1x8x1x16xf32> to vector<8x16xf32>
    %269 = vector.shape_cast %266 : vector<8x16xf32> to vector<1x8x1x16xf32>
    tpu.vector_store %arg10[%c0_213, %c0_214, %c11_215, %c0_216], %269 {strides = array<i32>} : memref<1x8x16x16xf32, #tpu.memory_space<vmem>>, vector<1x8x1x16xf32>,
    %c0_217 = arith.constant 0 : index
    %c12 = arith.constant 12 : index
    %c0_218 = arith.constant 0 : index
    %270 = vector.load %arg11[%c0_217, %c12, %c0_218] : memref<8x16x16xf32, #tpu.memory_space<vmem>>, vector<8x1x16xf32>
    %271 = vector.shape_cast %270 : vector<8x1x16xf32> to vector<8x16xf32>
    %c0_219 = arith.constant 0 : index
    %c0_220 = arith.constant 0 : index
    %c12_221 = arith.constant 12 : index
    %c0_222 = arith.constant 0 : index
    %272 = vector.load %arg1[%c0_219, %c0_220, %c12_221, %c0_222] : memref<1x4x16x16xf32, #tpu.memory_space<vmem>>, vector<1x4x1x16xf32>
    %273 = vector.shape_cast %272 : vector<1x4x1x16xf32> to vector<4x16xf32>
    %cst_223 = arith.constant dense<0.000000e+00> : vector<8x16xf32>
    %274 = tpu.matmul %99, %271, %cst_223 {dimension_numbers = #tpu.dot_dimension_numbers<[1], [0], [0], [1], [0, 0, 1, 1], [], []>} : vector<8x8xf32>, vector<8x16xf32>, vector<8x16xf32> -> vector<8x16xf32>
    %cst_224 = arith.constant dense<0.000000e+00> : vector<8x16xf32>
    %275 = tpu.matmul %100, %273, %cst_224 {dimension_numbers = #tpu.dot_dimension_numbers<[1], [0], [0], [1], [0, 0, 1, 1], [], []>} : vector<8x4xf32>, vector<4x16xf32>, vector<8x16xf32> -> vector<8x16xf32>
    %276 = arith.addf %274, %275 : vector<8x16xf32>
    %277 = vector.broadcast %101 : vector<8x1xf32> to vector<8x16xf32>
    %278 = arith.addf %276, %277 : vector<8x16xf32>
    %cst_225 = arith.constant 0.000000e+00 : f32
    %279 = vector.broadcast %cst_225 : f32 to vector<8x16xf32>
    %280 = arith.maximumf %278, %279 : vector<8x16xf32>
    %c0_226 = arith.constant 0 : index
    %c0_227 = arith.constant 0 : index
    %c12_228 = arith.constant 12 : index
    %c0_229 = arith.constant 0 : index
    %281 = vector.load %arg10[%c0_226, %c0_227, %c12_228, %c0_229] : memref<1x8x16x16xf32, #tpu.memory_space<vmem>>, vector<1x8x1x16xf32>
    %282 = vector.shape_cast %281 : vector<1x8x1x16xf32> to vector<8x16xf32>
    %283 = vector.shape_cast %280 : vector<8x16xf32> to vector<1x8x1x16xf32>
    tpu.vector_store %arg10[%c0_226, %c0_227, %c12_228, %c0_229], %283 {strides = array<i32>} : memref<1x8x16x16xf32, #tpu.memory_space<vmem>>, vector<1x8x1x16xf32>,
    %c0_230 = arith.constant 0 : index
    %c13 = arith.constant 13 : index
    %c0_231 = arith.constant 0 : index
    %284 = vector.load %arg11[%c0_230, %c13, %c0_231] : memref<8x16x16xf32, #tpu.memory_space<vmem>>, vector<8x1x16xf32>
    %285 = vector.shape_cast %284 : vector<8x1x16xf32> to vector<8x16xf32>
    %c0_232 = arith.constant 0 : index
    %c0_233 = arith.constant 0 : index
    %c13_234 = arith.constant 13 : index
    %c0_235 = arith.constant 0 : index
    %286 = vector.load %arg1[%c0_232, %c0_233, %c13_234, %c0_235] : memref<1x4x16x16xf32, #tpu.memory_space<vmem>>, vector<1x4x1x16xf32>
    %287 = vector.shape_cast %286 : vector<1x4x1x16xf32> to vector<4x16xf32>
    %cst_236 = arith.constant dense<0.000000e+00> : vector<8x16xf32>
    %288 = tpu.matmul %99, %285, %cst_236 {dimension_numbers = #tpu.dot_dimension_numbers<[1], [0], [0], [1], [0, 0, 1, 1], [], []>} : vector<8x8xf32>, vector<8x16xf32>, vector<8x16xf32> -> vector<8x16xf32>
    %cst_237 = arith.constant dense<0.000000e+00> : vector<8x16xf32>
    %289 = tpu.matmul %100, %287, %cst_237 {dimension_numbers = #tpu.dot_dimension_numbers<[1], [0], [0], [1], [0, 0, 1, 1], [], []>} : vector<8x4xf32>, vector<4x16xf32>, vector<8x16xf32> -> vector<8x16xf32>
    %290 = arith.addf %288, %289 : vector<8x16xf32>
    %291 = vector.broadcast %101 : vector<8x1xf32> to vector<8x16xf32>
    %292 = arith.addf %290, %291 : vector<8x16xf32>
    %cst_238 = arith.constant 0.000000e+00 : f32
    %293 = vector.broadcast %cst_238 : f32 to vector<8x16xf32>
    %294 = arith.maximumf %292, %293 : vector<8x16xf32>
    %c0_239 = arith.constant 0 : index
    %c0_240 = arith.constant 0 : index
    %c13_241 = arith.constant 13 : index
    %c0_242 = arith.constant 0 : index
    %295 = vector.load %arg10[%c0_239, %c0_240, %c13_241, %c0_242] : memref<1x8x16x16xf32, #tpu.memory_space<vmem>>, vector<1x8x1x16xf32>
    %296 = vector.shape_cast %295 : vector<1x8x1x16xf32> to vector<8x16xf32>
    %297 = vector.shape_cast %294 : vector<8x16xf32> to vector<1x8x1x16xf32>
    tpu.vector_store %arg10[%c0_239, %c0_240, %c13_241, %c0_242], %297 {strides = array<i32>} : memref<1x8x16x16xf32, #tpu.memory_space<vmem>>, vector<1x8x1x16xf32>,
    %c0_243 = arith.constant 0 : index
    %c14 = arith.constant 14 : index
    %c0_244 = arith.constant 0 : index
    %298 = vector.load %arg11[%c0_243, %c14, %c0_244] : memref<8x16x16xf32, #tpu.memory_space<vmem>>, vector<8x1x16xf32>
    %299 = vector.shape_cast %298 : vector<8x1x16xf32> to vector<8x16xf32>
    %c0_245 = arith.constant 0 : index
    %c0_246 = arith.constant 0 : index
    %c14_247 = arith.constant 14 : index
    %c0_248 = arith.constant 0 : index
    %300 = vector.load %arg1[%c0_245, %c0_246, %c14_247, %c0_248] : memref<1x4x16x16xf32, #tpu.memory_space<vmem>>, vector<1x4x1x16xf32>
    %301 = vector.shape_cast %300 : vector<1x4x1x16xf32> to vector<4x16xf32>
    %cst_249 = arith.constant dense<0.000000e+00> : vector<8x16xf32>
    %302 = tpu.matmul %99, %299, %cst_249 {dimension_numbers = #tpu.dot_dimension_numbers<[1], [0], [0], [1], [0, 0, 1, 1], [], []>} : vector<8x8xf32>, vector<8x16xf32>, vector<8x16xf32> -> vector<8x16xf32>
    %cst_250 = arith.constant dense<0.000000e+00> : vector<8x16xf32>
    %303 = tpu.matmul %100, %301, %cst_250 {dimension_numbers = #tpu.dot_dimension_numbers<[1], [0], [0], [1], [0, 0, 1, 1], [], []>} : vector<8x4xf32>, vector<4x16xf32>, vector<8x16xf32> -> vector<8x16xf32>
    %304 = arith.addf %302, %303 : vector<8x16xf32>
    %305 = vector.broadcast %101 : vector<8x1xf32> to vector<8x16xf32>
    %306 = arith.addf %304, %305 : vector<8x16xf32>
    %cst_251 = arith.constant 0.000000e+00 : f32
    %307 = vector.broadcast %cst_251 : f32 to vector<8x16xf32>
    %308 = arith.maximumf %306, %307 : vector<8x16xf32>
    %c0_252 = arith.constant 0 : index
    %c0_253 = arith.constant 0 : index
    %c14_254 = arith.constant 14 : index
    %c0_255 = arith.constant 0 : index
    %309 = vector.load %arg10[%c0_252, %c0_253, %c14_254, %c0_255] : memref<1x8x16x16xf32, #tpu.memory_space<vmem>>, vector<1x8x1x16xf32>
    %310 = vector.shape_cast %309 : vector<1x8x1x16xf32> to vector<8x16xf32>
    %311 = vector.shape_cast %308 : vector<8x16xf32> to vector<1x8x1x16xf32>
    tpu.vector_store %arg10[%c0_252, %c0_253, %c14_254, %c0_255], %311 {strides = array<i32>} : memref<1x8x16x16xf32, #tpu.memory_space<vmem>>, vector<1x8x1x16xf32>,
    %c0_256 = arith.constant 0 : index
    %c15 = arith.constant 15 : index
    %c0_257 = arith.constant 0 : index
    %312 = vector.load %arg11[%c0_256, %c15, %c0_257] : memref<8x16x16xf32, #tpu.memory_space<vmem>>, vector<8x1x16xf32>
    %313 = vector.shape_cast %312 : vector<8x1x16xf32> to vector<8x16xf32>
    %c0_258 = arith.constant 0 : index
    %c0_259 = arith.constant 0 : index
    %c15_260 = arith.constant 15 : index
    %c0_261 = arith.constant 0 : index
    %314 = vector.load %arg1[%c0_258, %c0_259, %c15_260, %c0_261] : memref<1x4x16x16xf32, #tpu.memory_space<vmem>>, vector<1x4x1x16xf32>
    %315 = vector.shape_cast %314 : vector<1x4x1x16xf32> to vector<4x16xf32>
    %cst_262 = arith.constant dense<0.000000e+00> : vector<8x16xf32>
    %316 = tpu.matmul %99, %313, %cst_262 {dimension_numbers = #tpu.dot_dimension_numbers<[1], [0], [0], [1], [0, 0, 1, 1], [], []>} : vector<8x8xf32>, vector<8x16xf32>, vector<8x16xf32> -> vector<8x16xf32>
    %cst_263 = arith.constant dense<0.000000e+00> : vector<8x16xf32>
    %317 = tpu.matmul %100, %315, %cst_263 {dimension_numbers = #tpu.dot_dimension_numbers<[1], [0], [0], [1], [0, 0, 1, 1], [], []>} : vector<8x4xf32>, vector<4x16xf32>, vector<8x16xf32> -> vector<8x16xf32>
    %318 = arith.addf %316, %317 : vector<8x16xf32>
    %319 = vector.broadcast %101 : vector<8x1xf32> to vector<8x16xf32>
    %320 = arith.addf %318, %319 : vector<8x16xf32>
    %cst_264 = arith.constant 0.000000e+00 : f32
    %321 = vector.broadcast %cst_264 : f32 to vector<8x16xf32>
    %322 = arith.maximumf %320, %321 : vector<8x16xf32>
    %c0_265 = arith.constant 0 : index
    %c0_266 = arith.constant 0 : index
    %c15_267 = arith.constant 15 : index
    %c0_268 = arith.constant 0 : index
    %323 = vector.load %arg10[%c0_265, %c0_266, %c15_267, %c0_268] : memref<1x8x16x16xf32, #tpu.memory_space<vmem>>, vector<1x8x1x16xf32>
    %324 = vector.shape_cast %323 : vector<1x8x1x16xf32> to vector<8x16xf32>
    %325 = vector.shape_cast %322 : vector<8x16xf32> to vector<1x8x1x16xf32>
    tpu.vector_store %arg10[%c0_265, %c0_266, %c15_267, %c0_268], %325 {strides = array<i32>} : memref<1x8x16x16xf32, #tpu.memory_space<vmem>>, vector<1x8x1x16xf32>,
    return
  }
  func.func @transform_0(%arg0: i32) -> (i32, i32, i32, i32) {
    %c0_i32 = arith.constant 0 : i32
    %c0_i32_0 = arith.constant 0 : i32
    %c0_i32_1 = arith.constant 0 : i32
    %c0_i32_2 = arith.constant 0 : i32
    return %arg0, %c0_i32, %c0_i32_0, %c0_i32_1 : i32, i32, i32, i32
  }
  func.func @transform_1(%arg0: i32) -> (i32, i32, i32) {
    %c0_i32 = arith.constant 0 : i32
    %c0_i32_0 = arith.constant 0 : i32
    %c0_i32_1 = arith.constant 0 : i32
    return %arg0, %c0_i32, %c0_i32_0 : i32, i32, i32
  }
  func.func @transform_2(%arg0: i32) -> (i32, i32) {
    %c0_i32 = arith.constant 0 : i32
    %c0_i32_0 = arith.constant 0 : i32
    %c0_i32_1 = arith.constant 0 : i32
    return %c0_i32, %c0_i32_0 : i32, i32
  }
  func.func @transform_3(%arg0: i32) -> (i32, i32) {
    %c0_i32 = arith.constant 0 : i32
    %c0_i32_0 = arith.constant 0 : i32
    %c0_i32_1 = arith.constant 0 : i32
    return %c0_i32, %c0_i32_0 : i32, i32
  }
  func.func @transform_4(%arg0: i32) -> (i32, i32) {
    %c0_i32 = arith.constant 0 : i32
    %c0_i32_0 = arith.constant 0 : i32
    %c0_i32_1 = arith.constant 0 : i32
    return %c0_i32, %c0_i32_0 : i32, i32
  }
  func.func @transform_5(%arg0: i32) -> (i32, i32) {
    %c0_i32 = arith.constant 0 : i32
    %c0_i32_0 = arith.constant 0 : i32
    %c0_i32_1 = arith.constant 0 : i32
    return %c0_i32, %c0_i32_0 : i32, i32
  }
  func.func @transform_6(%arg0: i32) -> (i32, i32) {
    %c0_i32 = arith.constant 0 : i32
    %c0_i32_0 = arith.constant 0 : i32
    %c0_i32_1 = arith.constant 0 : i32
    return %c0_i32, %c0_i32_0 : i32, i32
  }
  func.func @transform_7(%arg0: i32) -> (i32, i32) {
    %c0_i32 = arith.constant 0 : i32
    %c0_i32_0 = arith.constant 0 : i32
    %c0_i32_1 = arith.constant 0 : i32
    return %c0_i32, %c0_i32_0 : i32, i32
  }
  func.func @transform_8(%arg0: i32) -> (i32, i32) {
    %c0_i32 = arith.constant 0 : i32
    %c0_i32_0 = arith.constant 0 : i32
    %c0_i32_1 = arith.constant 0 : i32
    return %c0_i32, %c0_i32_0 : i32, i32
  }
  func.func @transform_9(%arg0: i32) -> (i32, i32, i32, i32) {
    %c0_i32 = arith.constant 0 : i32
    %c0_i32_0 = arith.constant 0 : i32
    %c0_i32_1 = arith.constant 0 : i32
    %c0_i32_2 = arith.constant 0 : i32
    return %arg0, %c0_i32, %c0_i32_0, %c0_i32_1 : i32, i32, i32, i32
  }
}

</mosaic_0001>

<bundles_post_ra>
// kernel: tpu_custom_call.1
= control target key start
LH: loop header
LB: loop body
LE: loop exit
PB: predicated region body
PF: predicated region fallthrough
CT: control target
= control target key end

     0   :  { %14 = vsyncpa [#allocation4], 0  ;;  %s7188_s0 = inlined_call_operand.vmem [shape: f32[2,4,16,16], index: 0, kind: input, shape index: {}]   ;;  %s7189_s1 = inlined_call_operand.vmem [shape: f32[2,64,8], index: 1, kind: input, shape index: {}]   ;;  %s7190_s2 = inlined_call_operand.vmem [shape: f32[18,8], index: 2, kind: input, shape index: {}]   ;;  %s7191_s3 = inlined_call_operand.vmem [shape: f32[8,18], index: 3, kind: input, shape index: {}]   ;;  %s7192_s4 = inlined_call_operand.vmem [shape: f32[9,144], index: 4, kind: input, shape index: {}]   ;;  %s7193_s5 = inlined_call_operand.vmem [shape: f32[1,144], index: 5, kind: input, shape index: {}]   ;;  %s7194_s6 = inlined_call_operand.vmem [shape: f32[8,8], index: 6, kind: input, shape index: {}]   ;;  %s7195_s7 = inlined_call_operand.vmem [shape: f32[8,4], index: 7, kind: input, shape index: {}]   ;;  %s7196_s8 = inlined_call_operand.vmem [shape: f32[8,1], index: 8, kind: input, shape index: {}]   ;;  %s7197_s9 = inlined_call_operand.hbm [shape: f32[2,8,16,16], index: 9, kind: output, shape index: {}]  }
   0x1   :  { %16 = vsyncpa [#allocation4 + $0x1], 0  ;;  %s5879_s30 = smov 0   ;;  %s5881_s10 = smov 0  }
   0x2   :  { %s5883_s11 = smov 0   ;;  %s5885_s12 = smov 0  }
   0x3 LB: > { %s5900_s13 = sadd.s32 4294967295, %s5804_s12   ;;  %s5347_s14 = sadd.s32 4294967294, %s5804_s12   ;;  %s5804_s12 = sphi %s5885_s12, %s7203_s12   ;;  %s5800_s11 = sphi %s5883_s11, %s7202_s11   ;;  %s5796_s10 = sphi %s5881_s10, %s7201_s10   ;;  %s5792_s30 = sphi %s5879_s30, %s7200_s30  }
   0x4   : > { %s5904_s15 = sadd.s32 1, %s5804_s12   ;;  %s228_s16 = sadd.s32 1, %s5800_s11 }
   0x5   : > { %s225_s17 = ssub.s32 %s5804_s12, %s5904_s15  ;;  %p238_p0 = scmp.ne.s32.totalorder %s5800_s11, %s5796_s10 }
   0x6   : > { %p226_p1 = scmp.eq.s32.totalorder %s225_s17, 0  ;;  %p239_p2 = scmp.eq.s32.totalorder %s5900_s13, 1 }
   0x7   : > { %p244_p3 = scmp.ne.s32.totalorder %s5796_s10, %s5792_s30  ;;  %p245_p4 = scmp.eq.s32.totalorder %s5347_s14, 1 }
   0x8   : > { %s5915_s18 = scalar_select %p226_p1, %s5800_s11, %s228_s16  }
   0x9   : > { %p5917_p5 = por %p239_p2, %p238_p0  ;;  %p5921_p6 = por %p245_p4, %p244_p3 }
   0xa   : > { %p5350_p7 = scmp.ge.s32.totalorder %s5804_s12, 1  ;;  %p300_p8 = scmp.lt.s32.totalorder %s5804_s12, 3 }
   0xc   : > { %p301_p9 = pnand %p5350_p7, %p300_p8 }
   0xd   : > { %v359_v0 = vld [vmem:[%s7191_s3] sm:$0xff] (!%p301_p9)  ;;  %p341_p10 = scmp.lt.s32.totalorder (!%p301_p9), %s5900_s13, 1  ;;  %vm360_vm0 = vcmask (!%p301_p9), 64512   ;;  %s5806_s28 = smov (!%p301_p9), 18   ;;  %v5807_v11 = vmov (!%p301_p9), 0.0   ;;  %v631_v17 = vlaneseq (!%p301_p9)  ;;  %vm518_vm1 = vcmask (!%p301_p9), 146432  }
   0xe   : > { %304 = sbr.rel (%p301_p9) target bundleno = 1179 (0x49b), region = 56  ;;  %5505 = vmatprep.subr.mxu0 (!%p301_p9), %v359_v0  ;;  %610 = vmatprep.mubr.f32.mxu1 (!%p301_p9), %v5807_v11  ;;  %s5808_s29 = smov (!%p301_p9), 54   ;;  %v5368_v20 = vld [vmem:[%s7192_s4 + $0x1] ss:$8 sm:$0x3] (!%p301_p9)  ;;  %vm520_vm2 = vcmask (!%p301_p9), 293888  }
   0xf   : > { %5506 = vmatpush3.msra.mxu0 (!%p301_p9), %v359_v0  ;;  %s5809_s14 = smov (!%p301_p9), 36   ;;  %s5810_s16 = smov (!%p301_p9), 90   ;;  %v5953_v19 = vshrl.u32 (!%p301_p9), %v631_v17, 7  ;;  %v5369_v23 = vld [vmem:[%s7192_s4 + $0x2] ss:$8 sm:$0x3] (!%p301_p9) }
  0x10   : > { %5524 = vmatprep.subr.mxu0 (!%p301_p9), %v5807_v11  ;;  %s5811_s17 = smov (!%p301_p9), 72   ;;  %s5812_s21 = smov (!%p301_p9), 126   ;;  %v5371_v28 = vld [vmem:[%s7192_s4 + $0x4] ss:$8 sm:$0x3] (!%p301_p9)  ;;  %vm522_vm3 = vcmask (!%p301_p9), 441344  }
  0x11   : > { %s5813_s22 = smov (!%p301_p9), 108   ;;  %v5959_v21 = vsub.s32 (!%p301_p9), 1, %v5953_v19  ;;  %v5962_v22 = vsub.s32 (!%p301_p9), 0, %v5953_v19  ;;  %v5372_v31 = vld [vmem:[%s7192_s4 + $0x5] ss:$8 sm:$0x3] (!%p301_p9) }
  0x12   : > { %v5374_v34 = vld [vmem:[%s7192_s4 + $0x7] ss:$8 sm:$0x3] (!%p301_p9)  ;;  %v5375_v37 = vld [vmem:[%s7192_s4 + $0x10] ss:$8 sm:$0x3] (!%p301_p9) }
  0x13   : > { %v659_v24 = vrot.slane (!%p301_p9), %v5368_v20, %v5959_v21  ;;  %v655_v25 = vrot.slane (!%p301_p9), %v5368_v20, %v5962_v22  ;;  %v705_v26 = vrot.slane (!%p301_p9), %v5369_v23, %v5959_v21  ;;  %v701_v27 = vrot.slane (!%p301_p9), %v5369_v23, %v5962_v22  ;;  %v534_v53 = vld [vmem:[%s7190_s2] sm:$0xff] (!%p301_p9)  ;;  %v535_v55 = vld [vmem:[%s7190_s2 + $0x8] sm:$0xff] (!%p301_p9)  ;;  %v536_v56 = vld [vmem:[%s7190_s2 + $0x10] sm:$0x3] (!%p301_p9)  ;;  %s5822_s25 = smov (!%p301_p9), 38   ;;  %s5431_s26 = sshll.u32 (!%p301_p9), %s5900_s13, 11 }
  0x14   : > { %v794_v29 = vrot.slane (!%p301_p9), %v5371_v28, %v5959_v21  ;;  %v790_v30 = vrot.slane (!%p301_p9), %v5371_v28, %v5962_v22  ;;  %v852_v32 = vrot.slane (!%p301_p9), %v5372_v31, %v5959_v21  ;;  %v848_v33 = vrot.slane (!%p301_p9), %v5372_v31, %v5962_v22 }
  0x15   : > { %s5932_s23 = scalar_select %p341_p10, %s5900_s13, 1  ;;  %v954_v35 = vrot.slane %v5374_v34, %v5959_v21  ;;  %v950_v36 = vrot.slane %v5374_v34, %v5962_v22  ;;  %v1012_v38 = vrot.slane %v5375_v37, %v5959_v21  ;;  %v1008_v39 = vrot.slane %v5375_v37, %v5962_v22 }
  0x16   : > { %vm524_vm4 = vcmask 588800   ;;  %vm526_vm5 = vcmask 736256   ;;  %vm528_vm6 = vcmask 883712   ;;  %vm532_vm7 = vcmask 130048  }
  0x17   : > { %s5429_s24 = sshll.u32 %s5932_s23, 6  ;;  %vm530_vm8 = vcmask 1031168   ;;  %vm664_vm9 = vcmask 7168   ;;  %vm710_vm10 = vcmask 15360   ;;  %vm765_vm11 = vcmask 1046528  }
  0x18   : > { %s350_s27 = scalar_lea.vmem %s7189_s1, %s5429_s24  ;;  %vm925_vm12 = vcmask 1045504   ;;  %vm684_vm13 = vcmask 1039360   ;;  %vm5823_vm14 = vmmov 0   ;;  %vm1175_vm15 = vcmask 1041409  }
  0x19   : > { %v351_v1 = vld [vmem:[%s350_s27] sm:$0xff]  ;;  %v352_v2 = vld [vmem:[%s350_s27 + $0x8] sm:$0xff]  ;;  %v353_v3 = vld [vmem:[%s350_s27 + $0x10] sm:$0xff] }
  0x1a   : > { %5507 = vmatprep.mubr.msk.f32.mxu0 %vm360_vm0, %v351_v1  ;;  %v354_v4 = vld [vmem:[%s350_s27 + $0x18] sm:$0xff]  ;;  %v355_v5 = vld [vmem:[%s350_s27 + $0x20] sm:$0xff]  ;;  %v356_v6 = vld [vmem:[%s350_s27 + $0x28] sm:$0xff] }
  0x1b   : > { %5508 = vmatmul.mubr.msk.f32.vlgmr.msra.gmra.mrb[0].mxu0 %vm360_vm0, %v352_v2  ;;  %v357_v7 = vld [vmem:[%s350_s27 + $0x30] sm:$0xff]  ;;  %v358_v8 = vld [vmem:[%s350_s27 + $0x38] sm:$0xff]  ;;  %s6247_s27 = scalar_lea.vmem %s7188_s0, %s5429_s24  ;;  %s7133_s24 = scalar_lea.hbm %s7197_s9, %s5431_s26 }
  0x1c   : > { %5510 = vmatprep.mubr.msk.f32.mxu0 %vm360_vm0, %v353_v3 }
  0x1f   : > { %5511 = vmatmul.mubr.msk.f32.gmra.mrb[2].mxu0 %vm360_vm0, %v354_v4 }
  0x20   : > { %5513 = vmatprep.mubr.msk.f32.mxu0 %vm360_vm0, %v355_v5 }
  0x23   : > { %5514 = vmatmul.mubr.msk.f32.gmra.mrb[4].mxu0 %vm360_vm0, %v356_v6 }
  0x24   : > { %5516 = vmatprep.mubr.msk.f32.mxu0 %vm360_vm0, %v357_v7 }
  0x27   : > { %5517 = vmatmul.mubr.msk.f32.gmra.mrb[6].mxu0 %vm360_vm0, %v358_v8 }
  0x28   : > { %5526 = vmatprep.mubr.msk.f32.mxu0 %vm5823_vm14, %v5807_v11 }
  0xee   : > { %v5509_v9 = vpop.f32.mrb[0].mxu0 }
  0xef   : > { %491 = vrot.lane.b32.xlu0 %v5509_v9, %s5806_s28  ;;  %v5948_v10 = vpop.f32.mrb[1].mxu0  ;;  %s5816_s28 = smov 127  }
  0xf2   : > { %v5512_v12 = vpop.f32.mrb[2].mxu0 }
  0xf3   : > { %499 = vrot.lane.b32.xlu1 %v5512_v12, %s5808_s29  ;;  %v461_v13 = vpop.f32.mrb[3].mxu0  ;;  %s5814_s29 = smov 1  }
  0xf4   : > { %495 = vrot.lane.b32.xlu0 %v461_v13, %s5809_s14  ;;  %s5818_s14 = smov 110  }
  0xf6   : > { %v5515_v14 = vpop.f32.mrb[4].mxu0 }
  0xf7   : > { %v471_v15 = vpop.f32.mrb[5].mxu0 }
  0xf8   : > { %507 = vrot.lane.b32.xlu0 %v5515_v14, %s5810_s16  ;;  %503 = vrot.lane.b32.xlu1 %v471_v15, %s5811_s17  ;;  %s5815_s17 = smov 2   ;;  %s5820_s16 = smov 74  }
  0xfa   : > { %v5518_v16 = vpop.f32.mrb[6].mxu0 }
  0xfb   : > { %v481_v18 = vpop.f32.mrb[7].mxu0 }
  0xfc   : > { %515 = vrot.lane.b32.xlu0 %v5518_v16, %s5812_s21  ;;  %511 = vrot.lane.b32.xlu1 %v481_v18, %s5813_s22  ;;  %s5821_s22 = smov 20  }
 0x100   : > { %662 = vrot.lane.b32.xlu0 %v659_v24, %s5814_s29  ;;  %660 = vrot.lane.b32.xlu1 %v655_v25, %s5814_s29 }
 0x104   : > { %708 = vrot.lane.b32.xlu0 %v705_v26, %s5815_s17  ;;  %706 = vrot.lane.b32.xlu1 %v701_v27, %s5815_s17 }
 0x108   : > { %797 = vrot.lane.b32.xlu0 %v794_v29, %s5814_s29  ;;  %795 = vrot.lane.b32.xlu1 %v790_v30, %s5814_s29 }
 0x10c   : > { %855 = vrot.lane.b32.xlu0 %v852_v32, %s5815_s17  ;;  %853 = vrot.lane.b32.xlu1 %v848_v33, %s5815_s17 }
 0x110   : > { %957 = vrot.lane.b32.xlu0 %v954_v35, %s5814_s29  ;;  %955 = vrot.lane.b32.xlu1 %v950_v36, %s5814_s29  ;;  %s5819_s29 = smov 56  }
 0x114   : > { %1015 = vrot.lane.b32.xlu0 %v1012_v38, %s5815_s17  ;;  %1013 = vrot.lane.b32.xlu1 %v1008_v39, %s5815_s17 }
 0x161   : > { %v492_v40 = vpop.permute.xlu0 %491 }
 0x162   : > { %v519_v42 = vsel %vm518_vm1, %v5948_v10, %v492_v40  ;;  %vm1178_vm1 = vcmask 1042434  }
 0x165   : > { %v500_v41 = vpop.permute.xlu1 %499 }
 0x166   : > { %v496_v43 = vpop.permute.xlu0 %495 }
 0x167   : > { %v521_v44 = vsel %vm520_vm2, %v519_v42, %v496_v43  ;;  %v5370_v43 = vld [vmem:[%s7192_s4 + $0x3] ss:$8 sm:$0x3]  ;;  %vm1187_vm2 = vcmask 1043456  }
 0x168   : > { %v523_v46 = vsel %vm522_vm3, %v521_v44, %v500_v41  ;;  %vm1181_vm3 = vcmask 1043459  }
 0x16a   : > { %v508_v45 = vpop.permute.xlu0 %507  ;;  %v504_v47 = vpop.permute.xlu1 %503 }
 0x16b   : > { %v525_v48 = vsel %vm524_vm4, %v523_v46, %v504_v47  ;;  %vm1183_vm4 = vcmask 31744  }
 0x16c   : > { %v527_v50 = vsel %vm526_vm5, %v525_v48, %v508_v45  ;;  %vm1275_vm5 = vcmask 1044484  }
 0x16e   : > { %v516_v49 = vpop.permute.xlu0 %515  ;;  %v512_v51 = vpop.permute.xlu1 %511 }
 0x16f   : > { %v529_v52 = vsel %vm528_vm6, %v527_v50, %v512_v51  ;;  %5364 = vmatprep.subr.msk.mxu1 %vm532_vm7, %v516_v49  ;;  %vm1278_vm6 = vcmask 1045509  }
 0x170   : > { %v531_v54 = vsel %vm530_vm8, %v529_v52, %v516_v49 }
 0x171   : > { %547 = vmatpush1.msra.mxu1 %v531_v54 }
 0x172   : > { %5365 = vmatmul.mubr.msk.f32.vlgmr.msra.gmra.mrb[0].mxu1 %vm360_vm0, %v534_v53  ;;  %5519 = vmatprep.subr.mxu1 %v5807_v11  ;;  %v663_v57 = vpop.permute.xlu0 %662  ;;  %v6015_v58 = vpop.permute.xlu1 %660 }
 0x173   : > { %616 = vmatprep.mubr.f32.mxu1 %v5807_v11  ;;  %v6028_v5 = vsel %vm664_vm9, %v6015_v58, %v663_v57 }
 0x176   : > { %5366 = vmatmul.mubr.msk.f32.gmra.mrb[2].mxu1 %vm360_vm0, %v535_v55  ;;  %v709_v59 = vpop.permute.xlu0 %708  ;;  %v6017_v60 = vpop.permute.xlu1 %706 }
 0x177   : > { %622 = vmatprep.mubr.f32.mxu1 %v5807_v11  ;;  %v6032_v6 = vsel %vm710_vm10, %v6017_v60, %v709_v59  ;;  %v5373_v59 = vld [vmem:[%s7192_s4 + $0x6] ss:$8 sm:$0x3] }
 0x17a   : > { %5367 = vmatmul.mubr.msk.f32.gmra.mrb[4].mxu1 %vm360_vm0, %v536_v56  ;;  %v798_v61 = vpop.permute.xlu0 %797  ;;  %v6019_v62 = vpop.permute.xlu1 %795 }
 0x17b   : > { %v6035_v7 = vsel %vm664_vm9, %v6019_v62, %v798_v61  ;;  %5521 = vmatprep.mubr.msk.f32.mxu1 %vm5823_vm14, %v5807_v11 }
 0x17e   : > { %v856_v63 = vpop.permute.xlu0 %855  ;;  %v6021_v0 = vpop.permute.xlu1 %853 }
 0x17f   : > { %v6039_v8 = vsel %vm710_vm10, %v6021_v0, %v856_v63 }
 0x182   : > { %v958_v1 = vpop.permute.xlu0 %957  ;;  %v6023_v2 = vpop.permute.xlu1 %955 }
 0x183   : > { %v6042_v9 = vsel %vm664_vm9, %v6023_v2, %v958_v1  ;;  %vm1284_vm9 = vcmask 1047559  }
 0x186   : > { %v1016_v3 = vpop.permute.xlu0 %1015  ;;  %v6025_v4 = vpop.permute.xlu1 %1013 }
 0x187   : > { %v6048_v12 = vsel %vm710_vm10, %v6025_v4, %v1016_v3 }
 0x245   : > { %v6044_v10 = vpop.f32.mrb[0].mxu1 }
 0x246   : > { %v1020_v13 = vmul.f32 %v6025_v4, %v6044_v10  ;;  %v6052_v14 = vpop.f32.mrb[1].mxu1  ;;  %v668_v15 = vmul.f32 %v6015_v58, %v6044_v10  ;;  %v714_v16 = vmul.f32 %v6017_v60, %v6044_v10  ;;  %v802_v17 = vmul.f32 %v6019_v62, %v6044_v10 }
 0x247   : > { %v669_v18 = vmul.f32 %v6028_v5, %v6052_v14  ;;  %v715_v20 = vmul.f32 %v6032_v6, %v6052_v14  ;;  %v803_v23 = vmul.f32 %v6035_v7, %v6052_v14  ;;  %v860_v24 = vmul.f32 %v6021_v0, %v6044_v10 }
 0x248   : > { %676 = vrot.lane.b32.xlu1 %v668_v15, %s5816_s28  ;;  %v814_v25 = vrot.slane %v802_v17, 1  ;;  %v861_v26 = vmul.f32 %v6039_v8, %v6052_v14  ;;  %v962_v27 = vmul.f32 %v6023_v2, %v6044_v10  ;;  %v963_v28 = vmul.f32 %v6042_v9, %v6052_v14 }
 0x249   : > { %v6075_v29 = vpop.f32.mrb[2].mxu1  ;;  %678 = vrot.lane.b32.xlu0 %v669_v18, %s5816_s28  ;;  %v817_v30 = vrot.slane %v803_v23, 1  ;;  %v872_v31 = vrot.slane %v860_v24, 1  ;;  %v1032_v32 = vrot.slane %v1020_v13, 2  ;;  %v1021_v33 = vmul.f32 %v6048_v12, %v6052_v14 }
 0x24a   : > { %v6080_v34 = vpop.f32.mrb[3].mxu1  ;;  %v804_v35 = vmul.f32 %v6019_v62, %v6075_v29  ;;  %v862_v36 = vmul.f32 %v6021_v0, %v6075_v29  ;;  %v875_v37 = vrot.slane %v861_v26, 1  ;;  %v964_v38 = vmul.f32 %v6023_v2, %v6075_v29 }
 0x24b   : > { %v805_v39 = vmul.f32 %v6035_v7, %v6080_v34  ;;  %v863_v40 = vmul.f32 %v6039_v8, %v6080_v34  ;;  %v974_v41 = vrot.slane %v962_v27, 2  ;;  %v965_v42 = vmul.f32 %v6042_v9, %v6080_v34 }
 0x24c   : > { %722 = vrot.lane.b32.xlu1 %v714_v16, %s5812_s21  ;;  %v815_v44 = vrot.slane %v804_v35, 1  ;;  %v873_v45 = vrot.slane %v862_v36, 1  ;;  %v975_v46 = vrot.slane %v964_v38, 2  ;;  %v977_v47 = vrot.slane %v963_v28, 2 }
 0x24d   : > { %v6098_v48 = vpop.f32.mrb[4].mxu1  ;;  %724 = vrot.lane.b32.xlu0 %v715_v20, %s5812_s21  ;;  %v818_v49 = vrot.slane %v805_v39, 1  ;;  %v876_v50 = vrot.slane %v863_v40, 1  ;;  %v978_v51 = vrot.slane %v965_v42, 2  ;;  %v1022_v52 = vmul.f32 %v6025_v4, %v6075_v29 }
 0x24e   : > { %v6103_v53 = vpop.f32.mrb[5].mxu1  ;;  %v816_v54 = vsel %vm765_vm11, %v814_v25, %v815_v44  ;;  %v874_v55 = vsel %vm765_vm11, %v872_v31, %v873_v45  ;;  %v976_v56 = vsel %vm925_vm12, %v974_v41, %v975_v46  ;;  %v1023_v57 = vmul.f32 %v6048_v12, %v6080_v34 }
 0x24f   : > { %v819_v61 = vsel %vm765_vm11, %v817_v30, %v818_v49  ;;  %v877_v63 = vsel %vm765_vm11, %v875_v37, %v876_v50  ;;  %v979_v1 = vsel %vm925_vm12, %v977_v47, %v978_v51  ;;  %v1033_v3 = vrot.slane %v1022_v52, 2 }
 0x250   : > { %824 = vrot.lane.b32.xlu1 %v816_v54, %s5816_s28  ;;  %v1035_v13 = vrot.slane %v1021_v33, 2  ;;  %v1036_v15 = vrot.slane %v1023_v57, 2  ;;  %v746_v16 = vrot.slane %v5370_v43, %v5962_v22  ;;  %v750_v17 = vrot.slane %v5370_v43, %v5959_v21 }
 0x251   : > { %826 = vrot.lane.b32.xlu0 %v819_v61, %s5816_s28  ;;  %v1034_v18 = vsel %vm925_vm12, %v1032_v32, %v1033_v3  ;;  %v806_v20 = vmul.f32 %v6019_v62, %v6098_v48  ;;  %v906_v23 = vrot.slane %v5373_v59, %v5962_v22  ;;  %v910_v24 = vrot.slane %v5373_v59, %v5959_v21 }
 0x252   : > { %v1037_v25 = vsel %vm925_vm12, %v1035_v13, %v1036_v15  ;;  %v807_v26 = vmul.f32 %v6035_v7, %v6103_v53  ;;  %v864_v27 = vmul.f32 %v6021_v0, %v6098_v48  ;;  %v865_v28 = vmul.f32 %v6039_v8, %v6103_v53 }
 0x253   : > { %v820_v30 = vrot.slane %v806_v20, 1  ;;  %v966_v31 = vmul.f32 %v6023_v2, %v6098_v48  ;;  %v967_v62 = vmul.f32 %v6042_v9, %v6103_v53  ;;  %v1024_v32 = vmul.f32 %v6025_v4, %v6098_v48 }
 0x254   : > { %882 = vrot.lane.b32.xlu1 %v874_v55, %s5812_s21  ;;  %v822_v33 = vrot.slane %v807_v26, 1  ;;  %v878_v7 = vrot.slane %v864_v27, 1  ;;  %v880_v35 = vrot.slane %v865_v28, 1  ;;  %v1025_v0 = vmul.f32 %v6048_v12, %v6103_v53 }
 0x255   : > { %884 = vrot.lane.b32.xlu0 %v877_v63, %s5812_s21  ;;  %v821_v8 = vsel %vm765_vm11, %v815_v44, %v820_v30  ;;  %v980_v36 = vrot.slane %v966_v31, 2  ;;  %v982_v2 = vrot.slane %v967_v62, 2  ;;  %v1038_v37 = vrot.slane %v1024_v32, 2 }
 0x256   : > { %v823_v9 = vsel %vm765_vm11, %v818_v49, %v822_v33  ;;  %v879_v38 = vsel %vm765_vm11, %v873_v45, %v878_v7  ;;  %v881_v4 = vsel %vm765_vm11, %v876_v50, %v880_v35  ;;  %v1040_v39 = vrot.slane %v1025_v0, 2 }
 0x257   : > { %v981_v40 = vsel %vm925_vm12, %v975_v46, %v980_v36  ;;  %v983_v41 = vsel %vm925_vm12, %v978_v51, %v982_v2  ;;  %v1039_v12 = vsel %vm925_vm12, %v1033_v3, %v1038_v37  ;;  %v753_v43 = vmul.f32 %v746_v16, %v6044_v10 }
 0x258   : > { %984 = vrot.lane.b32.xlu1 %v976_v56, %s5816_s28  ;;  %v1041_v42 = vsel %vm925_vm12, %v1036_v15, %v1040_v39  ;;  %v754_v44 = vmul.f32 %v750_v17, %v6052_v14  ;;  %v755_v45 = vmul.f32 %v746_v16, %v6075_v29  ;;  %v756_v47 = vmul.f32 %v750_v17, %v6080_v34 }
 0x259   : > { %986 = vrot.lane.b32.xlu0 %v979_v1, %s5816_s28  ;;  %v913_v46 = vmul.f32 %v906_v23, %v6044_v10  ;;  %v914_v49 = vmul.f32 %v910_v24, %v6052_v14  ;;  %v915_v50 = vmul.f32 %v906_v23, %v6075_v29  ;;  %v916_v51 = vmul.f32 %v910_v24, %v6080_v34 }
 0x25a   : > { %v766_v52 = vrot.slane %v753_v43, 1  ;;  %v767_v54 = vrot.slane %v755_v45, 1  ;;  %v769_v55 = vrot.slane %v754_v44, 1  ;;  %v770_v56 = vrot.slane %v756_v47, 1 }
 0x25b   : > { %v926_v57 = vrot.slane %v913_v46, 2  ;;  %v927_v59 = vrot.slane %v915_v50, 2  ;;  %v929_v61 = vrot.slane %v914_v49, 2  ;;  %v930_v63 = vrot.slane %v916_v51, 2 }
 0x25c   : > { %1042 = vrot.lane.b32.xlu1 %v1034_v18, %s5812_s21  ;;  %v670_v1 = vmul.f32 %v6015_v58, %v6075_v29  ;;  %v768_v3 = vsel %vm765_vm11, %v766_v52, %v767_v54  ;;  %v771_v13 = vsel %vm765_vm11, %v769_v55, %v770_v56  ;;  %v757_v26 = vmul.f32 %v746_v16, %v6098_v48  ;;  %v1060_v55 = vld [vmem:[%s7193_s5] sm:$0x3] }
 0x25d   : > { %1044 = vrot.lane.b32.xlu0 %v1037_v25, %s5812_s21  ;;  %v928_v15 = vsel %vm925_vm12, %v926_v57, %v927_v59  ;;  %v931_v20 = vsel %vm925_vm12, %v929_v61, %v930_v63  ;;  %v758_v18 = vmul.f32 %v750_v17, %v6103_v53  ;;  %v671_v27 = vmul.f32 %v6028_v5, %v6080_v34 }
 0x25e   : > { %v917_v25 = vmul.f32 %v906_v23, %v6098_v48  ;;  %v918_v28 = vmul.f32 %v910_v24, %v6103_v53  ;;  %v772_v58 = vrot.slane %v757_v26, 1  ;;  %v716_v16 = vmul.f32 %v6017_v60, %v6075_v29  ;;  %v629_v60 = vld [vmem:[%s7192_s4] ss:$8 sm:$0x3] }
 0x25f   : > { %v774_v30 = vrot.slane %v758_v18, 1  ;;  %v717_v48 = vmul.f32 %v6032_v6, %v6080_v34  ;;  %v638_v6 = vrot.slane %v629_v60, %v5959_v21  ;;  %v634_v24 = vrot.slane %v629_v60, %v5962_v22 }
 0x260   : > { %680 = vrot.lane.b32.xlu1 %v670_v1, %s5816_s28  ;;  %v932_v31 = vrot.slane %v917_v25, 2  ;;  %v934_v62 = vrot.slane %v918_v28, 2  ;;  %v6179_v17 = vsel %vm765_vm11, %v767_v54, %v772_v58 }
 0x261   : > { %682 = vrot.lane.b32.xlu0 %v671_v27, %s5816_s28  ;;  %v6182_v5 = vsel %vm765_vm11, %v770_v56, %v774_v30  ;;  %v642_v7 = vmul.f32 %v638_v6, %v6052_v14  ;;  %v641_v0 = vmul.f32 %v634_v24, %v6044_v10  ;;  %v643_v27 = vmul.f32 %v634_v24, %v6075_v29 }
 0x262   : > { %v6187_v53 = vsel %vm925_vm12, %v927_v59, %v932_v31  ;;  %v6190_v23 = vsel %vm925_vm12, %v930_v63, %v934_v62  ;;  %v6218_v59 = vrot.slane %v1060_v55, %v5962_v22  ;;  %v6230_v62 = vrot.slane %v1060_v55, %v5959_v21  ;;  %v1442_v55 = vld [vmem:[%s6247_s27 + $0x1] sm:$0x1] }
 0x264   : > { %726 = vrot.lane.b32.xlu1 %v716_v16, %s5812_s21 }
 0x265   : > { %728 = vrot.lane.b32.xlu0 %v717_v48, %s5812_s21 }
 0x268   : > { %828 = vrot.lane.b32.xlu1 %v821_v8, %s5816_s28 }
 0x269   : > { %830 = vrot.lane.b32.xlu0 %v823_v9, %s5816_s28 }
 0x26c   : > { %886 = vrot.lane.b32.xlu1 %v879_v38, %s5812_s21 }
 0x26d   : > { %888 = vrot.lane.b32.xlu0 %v881_v4, %s5812_s21 }
 0x270   : > { %988 = vrot.lane.b32.xlu1 %v981_v40, %s5816_s28 }
 0x271   : > { %990 = vrot.lane.b32.xlu0 %v983_v41, %s5816_s28  ;;  %s5817_s28 = smov 92  }
 0x274   : > { %1046 = vrot.lane.b32.xlu1 %v1039_v12, %s5812_s21 }
 0x275   : > { %1048 = vrot.lane.b32.xlu0 %v1041_v42, %s5812_s21 }
 0x2ba   : > { %v677_v32 = vpop.permute.xlu1 %676 }
 0x2bb   : > { %v679_v33 = vpop.permute.xlu0 %678 }
 0x2bc   : > { %v685_v35 = vsel %vm684_vm13, %v677_v32, %v679_v33  ;;  %v692_v8 = vadd.f32 %v679_v33, %v642_v7 }
 0x2bd   : > { %v691_v2 = vadd.f32 %v685_v35, %v641_v0 }
 0x2be   : > { %v723_v36 = vpop.permute.xlu1 %722 }
 0x2bf   : > { %v725_v37 = vpop.permute.xlu0 %724 }
 0x2c0   : > { %v730_v9 = vsel %vm530_vm8, %v723_v36, %v725_v37  ;;  %v737_v38 = vadd.f32 %v725_v37, %v692_v8 }
 0x2c1   : > { %v736_v4 = vadd.f32 %v730_v9, %v691_v2 }
 0x2c2   : > { %v825_v39 = vpop.permute.xlu1 %824  ;;  %v781_v40 = vadd.f32 %v771_v13, %v737_v38 }
 0x2c3   : > { %v827_v41 = vpop.permute.xlu0 %826  ;;  %v780_v12 = vadd.f32 %v768_v3, %v736_v4 }
 0x2c4   : > { %v832_v42 = vsel %vm684_vm13, %v825_v39, %v827_v41  ;;  %v839_v43 = vadd.f32 %v827_v41, %v781_v40  ;;  %v1166_v39 = vld [vmem:[%s6247_s27] sm:$0x1]  ;;  %v1167_v40 = vld [vmem:[%s6247_s27 + $0x10] sm:$0x1] }
 0x2c5   : > { %v838_v44 = vadd.f32 %v832_v42, %v780_v12  ;;  %v1168_v41 = vld [vmem:[%s6247_s27 + $0x20] sm:$0x1] }
 0x2c6   : > { %v883_v14 = vpop.permute.xlu1 %882 }
 0x2c7   : > { %v885_v45 = vpop.permute.xlu0 %884 }
 0x2c8   : > { %v890_v10 = vsel %vm530_vm8, %v883_v14, %v885_v45  ;;  %v897_v47 = vadd.f32 %v885_v45, %v839_v43  ;;  %v1174_v43 = vrot.slane %v1167_v40, 7  ;;  %v1177_v14 = vrot.slane %v1168_v41, 6  ;;  %v2465_v41 = vld [vmem:[%s6247_s27 + $0x35] sm:$0x1] }
 0x2c9   : > { %v896_v46 = vadd.f32 %v890_v10, %v838_v44 }
 0x2ca   : > { %v985_v49 = vpop.permute.xlu1 %984  ;;  %v941_v50 = vadd.f32 %v931_v20, %v897_v47  ;;  %v1176_v47 = vsel %vm1175_vm15, %v1174_v43, %v1166_v39  ;;  %v2464_v39 = vld [vmem:[%s6247_s27 + $0x25] sm:$0x1] }
 0x2cb   : > { %v987_v51 = vpop.permute.xlu0 %986  ;;  %v940_v52 = vadd.f32 %v928_v15, %v896_v46  ;;  %v644_v15 = vmul.f32 %v638_v6, %v6080_v34  ;;  %v1179_v46 = vsel %vm1178_vm1, %v1177_v14, %v1176_v47 }
 0x2cc   : > { %v992_v54 = vsel %vm684_vm13, %v985_v49, %v987_v51  ;;  %v999_v58 = vadd.f32 %v987_v51, %v941_v50 }
 0x2cd   : > { %v998_v57 = vadd.f32 %v992_v54, %v940_v52  ;;  %v6274_v54 = vld [vmem:[%s7195_s7] sm:$0xff] }
 0x2ce   : > { %v1043_v56 = vpop.permute.xlu1 %1042 }
 0x2cf   : > { %v1045_v61 = vpop.permute.xlu0 %1044 }
 0x2d0   : > { %v1050_v63 = vsel %vm530_vm8, %v1043_v56, %v1045_v61  ;;  %v1057_v29 = vadd.f32 %v1045_v61, %v999_v58  ;;  %v1443_v56 = vld [vmem:[%s6247_s27 + $0x11] sm:$0x1] }
 0x2d1   : > { %v1056_v1 = vadd.f32 %v1050_v63, %v998_v57  ;;  %v1445_v61 = vld [vmem:[%s6247_s27 + $0x31] sm:$0x1]  ;;  %v1450_v63 = vrot.slane %v1443_v56, 7  ;;  %v2972_v56 = vld [vmem:[%s6247_s27 + $0x7] sm:$0x1] }
 0x2d2   : > { %v681_v3 = vpop.permute.xlu1 %680  ;;  %v1073_v21 = vadd.f32 %v6230_v62, %v1057_v29  ;;  %v1953_v29 = vld [vmem:[%s6247_s27 + $0x13] sm:$0x1] }
 0x2d3   : > { %v1072_v13 = vadd.f32 %v6218_v59, %v1056_v1  ;;  %v683_v20 = vpop.permute.xlu0 %682 }
 0x2d4   : > { %v686_v26 = vsel %vm684_vm13, %v681_v3, %v683_v20  ;;  %v694_v25 = vadd.f32 %v683_v20, %v644_v15  ;;  %v1077_v36 = vmax.f32 %v1073_v21, 0.0  ;;  %v1454_v3 = vrot.slane %v1445_v61, 5  ;;  %v1697_v15 = vld [vmem:[%s6247_s27 + $0x2] sm:$0x1] }
 0x2d5   : > { %v1076_v18 = vmax.f32 %v1072_v13, 0.0  ;;  %v693_v22 = vadd.f32 %v686_v26, %v643_v27  ;;  %v1451_v13 = vsel %vm1175_vm15, %v1450_v63, %v1442_v55  ;;  %v1698_v26 = vld [vmem:[%s6247_s27 + $0x12] sm:$0x1]  ;;  %v2975_v63 = vld [vmem:[%s6247_s27 + $0x37] sm:$0x1] }
 0x2d6   : > { %v727_v28 = vpop.permute.xlu1 %726  ;;  %v1705_v58 = vrot.slane %v1698_v26, 7  ;;  %v3227_v26 = vld [vmem:[%s6247_s27 + $0x8] sm:$0x1] }
 0x2d7   : > { %1080 = vst.msk [vmem:[#allocation2] sm:$0xff] %vm532_vm7, %v1076_v18  ;;  %v729_v30 = vpop.permute.xlu0 %728  ;;  %1093 = vrot.lane.b32.xlu0 %v1076_v18, %s5817_s28  ;;  %1084 = vrot.lane.b32.xlu1 %v1076_v18, %s5818_s14 }
 0x2d8   : > { %v731_v34 = vsel %vm530_vm8, %v727_v28, %v729_v30  ;;  %v739_v31 = vadd.f32 %v729_v30, %v694_v25  ;;  %v1700_v28 = vld [vmem:[%s6247_s27 + $0x32] sm:$0x1] }
 0x2d9   : > { %v738_v16 = vadd.f32 %v731_v34, %v693_v22  ;;  %v1709_v30 = vrot.slane %v1700_v28, 5  ;;  %v1706_v34 = vsel %vm1175_vm15, %v1705_v58, %v1697_v15  ;;  %v3230_v28 = vld [vmem:[%s6247_s27 + $0x38] sm:$0x1] }
 0x2da   : > { %v829_v48 = vpop.permute.xlu1 %828  ;;  %v783_v60 = vadd.f32 %v6182_v5, %v739_v31 }
 0x2db   : > { %v831_v6 = vpop.permute.xlu0 %830  ;;  %v782_v24 = vadd.f32 %v6179_v17, %v738_v16  ;;  %1111 = vrot.lane.b32.xlu0 %v1076_v18, %s5819_s29  ;;  %1102 = vrot.lane.b32.xlu1 %v1076_v18, %s5820_s16  ;;  %v1954_v16 = vld [vmem:[%s6247_s27 + $0x23] sm:$0x1] }
 0x2dc   : > { %v833_v32 = vsel %vm684_vm13, %v829_v48, %v831_v6  ;;  %v841_v33 = vadd.f32 %v831_v6, %v783_v60  ;;  %v1955_v6 = vld [vmem:[%s6247_s27 + $0x33] sm:$0x1] }
 0x2dd   : > { %v840_v35 = vadd.f32 %v833_v32, %v782_v24  ;;  %v1960_v24 = vrot.slane %v1953_v29, 7  ;;  %v1962_v32 = vrot.slane %v1954_v16, 6  ;;  %v1964_v21 = vrot.slane %v1955_v6, 5  ;;  %v3483_v29 = vld [vmem:[%s6247_s27 + $0x19] sm:$0x1] }
 0x2de   : > { %v887_v7 = vpop.permute.xlu1 %886  ;;  %v3484_v16 = vld [vmem:[%s6247_s27 + $0x29] sm:$0x1]  ;;  %v3490_v6 = vrot.slane %v3483_v29, 7 }
 0x2df   : > { %v889_v0 = vpop.permute.xlu0 %888  ;;  %1129 = vrot.lane.b32.xlu0 %v1076_v18, %s5821_s22  ;;  %1120 = vrot.lane.b32.xlu1 %v1076_v18, %s5822_s25 }
 0x2e0   : > { %v891_v17 = vsel %vm530_vm8, %v887_v7, %v889_v0  ;;  %v899_v5 = vadd.f32 %v889_v0, %v841_v33  ;;  %v2208_v0 = vld [vmem:[%s6247_s27 + $0x14] sm:$0x1] }
 0x2e1   : > { %v898_v8 = vadd.f32 %v891_v17, %v840_v35  ;;  %v2207_v35 = vld [vmem:[%s6247_s27 + $0x4] sm:$0x1] }
 0x2e2   : > { %v989_v2 = vpop.permute.xlu1 %988  ;;  %v943_v37 = vadd.f32 %v6190_v23, %v899_v5  ;;  %v2209_v17 = vld [vmem:[%s6247_s27 + $0x24] sm:$0x1] }
 0x2e3   : > { %v991_v9 = vpop.permute.xlu0 %990  ;;  %v942_v38 = vadd.f32 %v6187_v53, %v898_v8  ;;  %1142 = vrot.lane.b32.xlu0 %v1077_v36, %s5815_s17  ;;  %1140 = vrot.lane.b32.xlu1 %v1076_v18, %s5815_s17  ;;  %v1169_v53 = vld [vmem:[%s6247_s27 + $0x30] sm:$0x1]  ;;  %v1699_v18 = vld [vmem:[%s6247_s27 + $0x22] sm:$0x1]  ;;  %v2215_v36 = vrot.slane %v2208_v0, 7 }
 0x2e4   : > { %v993_v4 = vsel %vm684_vm13, %v989_v2, %v991_v9  ;;  %v1180_v45 = vrot.slane %v1169_v53, 5  ;;  %v1001_v52 = vadd.f32 %v991_v9, %v943_v37  ;;  %v1707_v22 = vrot.slane %v1699_v18, 6  ;;  %v2210_v8 = vld [vmem:[%s6247_s27 + $0x34] sm:$0x1]  ;;  %v3228_v18 = vld [vmem:[%s6247_s27 + $0x18] sm:$0x1] }
 0x2e5   : > { %v1000_v12 = vadd.f32 %v993_v4, %v942_v38  ;;  %v2217_v2 = vrot.slane %v2209_v17, 6  ;;  %v2219_v37 = vrot.slane %v2210_v8, 5  ;;  %v2216_v9 = vsel %vm1175_vm15, %v2215_v36, %v2207_v35  ;;  %v2462_v4 = vld [vmem:[%s6247_s27 + $0x5] sm:$0x1]  ;;  %v3738_v35 = vld [vmem:[%s6247_s27 + $0x1a] sm:$0x1] }
 0x2e6   : > { %v1047_v23 = vpop.permute.xlu1 %1046  ;;  %v1182_v50 = vsel %vm1181_vm3, %v1180_v45, %v1179_v46  ;;  %v1708_v31 = vsel %vm1178_vm1, %v1707_v22, %v1706_v34  ;;  %v2474_v53 = vrot.slane %v2465_v41, 5  ;;  %v2718_v45 = vld [vmem:[%s6247_s27 + $0x16] sm:$0x1]  ;;  %v3235_v58 = vrot.slane %v3228_v18, 7  ;;  %v3739_v0 = vld [vmem:[%s6247_s27 + $0x2a] sm:$0x1] }
 0x2e7   : > { %v1049_v42 = vpop.permute.xlu0 %1048  ;;  %5520 = vmatpush3.msk.msra.mxu1 %vm1187_vm2, %v1182_v50  ;;  %v1710_v60 = vsel %vm1181_vm3, %v1709_v30, %v1708_v31  ;;  %v2218_v38 = vsel %vm1178_vm1, %v2217_v2, %v2216_v9  ;;  %v2720_v46 = vld [vmem:[%s6247_s27 + $0x36] sm:$0x1]  ;;  %v3239_v30 = vrot.slane %v3230_v28, 5  ;;  %v3745_v8 = vrot.slane %v3738_v35, 7  ;;  %v4760_v18 = vld [vmem:[%s6247_s27 + $0x3e] sm:$0x1] }
 0x2e8   : > { %v1051_v44 = vsel %vm530_vm8, %v1047_v23, %v1049_v42  ;;  %5529 = vmatprep.subr.mxu1 %v5807_v11  ;;  %v1059_v57 = vadd.f32 %v1049_v42, %v1001_v52  ;;  %5522 = vmatmul.mubr.msk.f32.vlgmr.msra.gmra.mrb[6].mxu1 %vm1183_vm4, %v6274_v54  ;;  %v2463_v23 = vld [vmem:[%s6247_s27 + $0x15] sm:$0x1]  ;;  %v2220_v40 = vsel %vm1181_vm3, %v2219_v37, %v2218_v38  ;;  %v2472_v42 = vrot.slane %v2464_v39, 6  ;;  %v3992_v38 = vld [vmem:[%s6247_s27 + $0xb] sm:$0x1] }
 0x2e9   : > { %v1058_v10 = vadd.f32 %v1051_v44, %v1000_v12  ;;  %5531 = vmatprep.mubr.msk.f32.mxu1 %vm5823_vm14, %v5807_v11  ;;  %v2470_v12 = vrot.slane %v2463_v23, 7  ;;  %v2717_v44 = vld [vmem:[%s6247_s27 + $0x6] sm:$0x1]  ;;  %v3236_v34 = vsel %vm1175_vm15, %v3235_v58, %v3227_v26  ;;  %v3747_v36 = vrot.slane %v3739_v0, 6  ;;  %v3994_v23 = vld [vmem:[%s6247_s27 + $0x2b] sm:$0x1] }
 0x2ea   : > { %v1075_v27 = vadd.f32 %v6230_v62, %v1059_v57  ;;  %v1952_v62 = vld [vmem:[%s6247_s27 + $0x3] sm:$0x1]  ;;  %v2973_v57 = vld [vmem:[%s6247_s27 + $0x17] sm:$0x1]  ;;  %v5012_v28 = vld [vmem:[%s6247_s27 + $0xf] sm:$0x1] }
 0x2eb   : > { %v1074_v49 = vadd.f32 %v6218_v59, %v1058_v10  ;;  %v1444_v59 = vld [vmem:[%s6247_s27 + $0x21] sm:$0x1]  ;;  %v1961_v33 = vsel %vm1175_vm15, %v1960_v24, %v1952_v62  ;;  %v2471_v43 = vsel %vm1175_vm15, %v2470_v12, %v2462_v4  ;;  %v2719_v10 = vld [vmem:[%s6247_s27 + $0x26] sm:$0x1]  ;;  %v3482_v62 = vld [vmem:[%s6247_s27 + $0x9] sm:$0x1] }
 0x2ec   : > { %v1452_v1 = vrot.slane %v1444_v59, 6  ;;  %v1079_v48 = vmax.f32 %v1075_v27, 0.0  ;;  %v1963_v7 = vsel %vm1178_vm1, %v1962_v32, %v1961_v33  ;;  %v2473_v14 = vsel %vm1178_vm1, %v2472_v42, %v2471_v43  ;;  %v2974_v59 = vld [vmem:[%s6247_s27 + $0x27] sm:$0x1]  ;;  %v3229_v27 = vld [vmem:[%s6247_s27 + $0x28] sm:$0x1] }
 0x2ed   : > { %v1078_v51 = vmax.f32 %v1074_v49, 0.0  ;;  %v1965_v5 = vsel %vm1181_vm3, %v1964_v21, %v1963_v7  ;;  %v2475_v47 = vsel %vm1181_vm3, %v2474_v53, %v2473_v14  ;;  %v2725_v49 = vrot.slane %v2718_v45, 7  ;;  %v3737_v7 = vld [vmem:[%s6247_s27 + $0xa] sm:$0x1]  ;;  %v3993_v4 = vld [vmem:[%s6247_s27 + $0x1b] sm:$0x1] }
 0x2ee   : > { %v1453_v20 = vsel %vm1178_vm1, %v1452_v1, %v1451_v13  ;;  %v2727_v50 = vrot.slane %v2719_v10, 6  ;;  %v2980_v1 = vrot.slane %v2973_v57, 7  ;;  %v2984_v13 = vrot.slane %v2975_v63, 5  ;;  %v4247_v14 = vld [vmem:[%s6247_s27 + $0xc] sm:$0x1] }
 0x2ef   : > { %1081 = vst.msk [vmem:[#allocation2 + $0x8] sm:$0xff] %vm532_vm7, %v1078_v51  ;;  %1095 = vrot.lane.b32.xlu0 %v1078_v51, %s5817_s28  ;;  %1086 = vrot.lane.b32.xlu1 %v1078_v51, %s5818_s14  ;;  %v1455_v25 = vsel %vm1181_vm3, %v1454_v3, %v1453_v20  ;;  %v2726_v52 = vsel %vm1175_vm15, %v2725_v49, %v2717_v44  ;;  %v2982_v3 = vrot.slane %v2974_v59, 6  ;;  %v3237_v22 = vrot.slane %v3229_v27, 6  ;;  %v4248_v44 = vld [vmem:[%s6247_s27 + $0x1c] sm:$0x1]  ;;  %s5826_s28 = smov [#allocation3]  }
 0x2f0   : > { %5530 = vmatpush3.msk.msra.mxu1 %vm1187_vm2, %v1455_v25  ;;  %v2728_v55 = vsel %vm1178_vm1, %v2727_v50, %v2726_v52  ;;  %v2981_v20 = vsel %vm1175_vm15, %v2980_v1, %v2972_v56  ;;  %v3492_v24 = vrot.slane %v3484_v16, 6  ;;  %v3491_v21 = vsel %vm1175_vm15, %v3490_v6, %v3482_v62  ;;  %v4249_v45 = vld [vmem:[%s6247_s27 + $0x2c] sm:$0x1]  ;;  %v4502_v50 = vld [vmem:[%s6247_s27 + $0xd] sm:$0x1]  ;;  %v1157_v62 = vld [vmem:[%s7196_s8] sm:$0xff] }
 0x2f1   : > { %5532 = vmatmul.mubr.msk.f32.vlgmr.msra.gmra.mrb[8].mxu1 %vm1183_vm4, %v6274_v54  ;;  %5539 = vmatprep.subr.mxu1 %v5807_v11  ;;  %v2983_v15 = vsel %vm1178_vm1, %v2982_v3, %v2981_v20  ;;  %v3238_v31 = vsel %vm1178_vm1, %v3237_v22, %v3236_v34  ;;  %v3746_v37 = vsel %vm1175_vm15, %v3745_v8, %v3737_v7  ;;  %v4000_v41 = vrot.slane %v3993_v4, 7  ;;  %v4503_v52 = vld [vmem:[%s6247_s27 + $0x1d] sm:$0x1]  ;;  %v4757_v63 = vld [vmem:[%s6247_s27 + $0xe] sm:$0x1]  ;;  %s5746_s14 = sshll.u32 %s5826_s28, 4  ;;  %s5747_s14 = int_to_ptr.vmem [resolvable:$false] %s5746_s14 }
 0x2f2   : > { %5541 = vmatprep.mubr.msk.f32.mxu1 %vm5823_vm14, %v5807_v11  ;;  %5540 = vmatpush3.msk.msra.mxu1 %vm1187_vm2, %v1710_v60  ;;  %v2985_v25 = vsel %vm1181_vm3, %v2984_v13, %v2983_v15  ;;  %v3485_v60 = vld [vmem:[%s6247_s27 + $0x39] sm:$0x1]  ;;  %v3493_v33 = vsel %vm1178_vm1, %v3492_v24, %v3491_v21  ;;  %v3748_v9 = vsel %vm1178_vm1, %v3747_v36, %v3746_v37  ;;  %v4002_v12 = vrot.slane %v3994_v23, 6  ;;  %v4505_v57 = vld [vmem:[%s6247_s27 + $0x3d] sm:$0x1] }
 0x2f3   : > { %1113 = vrot.lane.b32.xlu0 %v1078_v51, %s5819_s29  ;;  %1104 = vrot.lane.b32.xlu1 %v1078_v51, %s5820_s16  ;;  %v3494_v32 = vrot.slane %v3485_v60, 5  ;;  %v4001_v53 = vsel %vm1175_vm15, %v4000_v41, %v3992_v38  ;;  %v4257_v49 = vrot.slane %v4249_v45, 6  ;;  %v4510_v59 = vrot.slane %v4503_v52, 7  ;;  %v4758_v13 = vld [vmem:[%s6247_s27 + $0x1e] sm:$0x1]  ;;  %s338_s16 = sand.u32 1, %s5796_s10  }
 0x2f4   : > { %5549 = vmatprep.subr.mxu1 %v5807_v11  ;;  %v4003_v43 = vsel %vm1178_vm1, %v4002_v12, %v4001_v53  ;;  %v4514_v3 = vrot.slane %v4505_v57, 5  ;;  %v4759_v20 = vld [vmem:[%s6247_s27 + $0x2e] sm:$0x1]  ;;  %v4765_v27 = vrot.slane %v4758_v13, 7  ;;  %v5824_v58 = vmov 0   ;;  %s7147_s13 = scalar_lea.sflag [#allocation4], %s338_s16 }
 0x2f5   : > { %5542 = vmatmul.mubr.msk.f32.vlgmr.msra.gmra.mrb[10].mxu1 %vm1183_vm4, %v6274_v54  ;;  %v3495_v17 = vsel %vm1181_vm3, %v3494_v32, %v3493_v33  ;;  %v4511_v26 = vsel %vm1175_vm15, %v4510_v59, %v4502_v50  ;;  %5740 = vset.pattern.permute.xlu1 %v5824_v58  ;;  %v5013_v34 = vld [vmem:[%s6247_s27 + $0x1f] sm:$0x1]  ;;  %v1158_v37 = vld [vmem:[#allocation2] sm:$0x1]  ;;  %v1434_v23 = vld [vmem:[#allocation2 + $0x1] sm:$0x1] }
 0x2f6   : > { %5551 = vmatprep.mubr.msk.f32.mxu1 %vm5823_vm14, %v5807_v11  ;;  %5550 = vmatpush3.msk.msra.mxu1 %vm1187_vm2, %v1965_v5  ;;  %v3740_v5 = vld [vmem:[%s6247_s27 + $0x3a] sm:$0x1]  ;;  %v4766_v16 = vsel %vm1175_vm15, %v4765_v27, %v4757_v63  ;;  %v5020_v60 = vrot.slane %v5013_v34, 7  ;;  %vm1281_vm8 = vcmask 1046534   ;;  %s5748_s29 = scalar_lea.vmem %s5747_s14, 4096 }
 0x2f7   : > { %1131 = vrot.lane.b32.xlu0 %v1078_v51, %s5821_s22  ;;  %1122 = vrot.lane.b32.xlu1 %v1078_v51, %s5822_s25  ;;  %v3749_v2 = vrot.slane %v3740_v5, 5  ;;  %s5351_s22 = sshll.u32 %s338_s16, 7 }
 0x2f8   : > { %5559 = vmatprep.subr.mxu1 %v5807_v11  ;;  %5741 = vset.pattern.permute.xlu0 %v5824_v58  ;;  %v5021_v32 = vsel %vm1175_vm15, %v5020_v60, %v5012_v28  ;;  %s6760_s25 = scalar_lea.vmem [#allocation3], %s5351_s22 }
 0x2f9   : > { %5552 = vmatmul.mubr.msk.f32.vlgmr.msra.gmra.mrb[12].mxu1 %vm1183_vm4, %v6274_v54  ;;  %v3750_v39 = vsel %vm1181_vm3, %v3749_v2, %v3748_v9  ;;  %s5273_s21 = sshll.u32 %s6760_s25, 4  ;;  %s7135_s21 = int_to_ptr.vmem [resolvable:$true] %s5273_s21 }
 0x2fa   : > { %5561 = vmatprep.mubr.msk.f32.mxu1 %vm5823_vm14, %v5807_v11  ;;  %5560 = vmatpush3.msk.msra.mxu1 %vm1187_vm2, %v2220_v40  ;;  %v3995_v40 = vld [vmem:[%s6247_s27 + $0x3b] sm:$0x1]  ;;  %p5749_p0 = scmp.lt.s32.totalorder %s7135_s21, %s5747_s14 }
 0x2fb   : > { %1146 = vrot.lane.b32.xlu0 %v1079_v48, %s5815_s17  ;;  %1144 = vrot.lane.b32.xlu1 %v1078_v51, %s5815_s17  ;;  %v2729_v51 = vrot.slane %v2720_v46, 5  ;;  %v3240_v48 = vsel %vm1181_vm3, %v3239_v30, %v3238_v31  ;;  %v4004_v42 = vrot.slane %v3995_v40, 5  ;;  %v4255_v46 = vrot.slane %v4248_v44, 7  ;;  %v5014_v31 = vld [vmem:[%s6247_s27 + $0x2f] sm:$0x1]  ;;  %s5742_s17 = scalar_lea.vmem %s7135_s21, 2048 }
 0x2fc   : > { %5569 = vmatprep.subr.mxu1 %v5807_v11  ;;  %v4769_v30 = vrot.slane %v4760_v18, 5  ;;  %v5022_v6 = vrot.slane %v5014_v31, 6  ;;  %p5743_p11 = scmp.ne.s32.totalorder %s7135_s21, %s5742_s17  ;;  %p5750_p1 = scmp.lt.s32.totalorder %s5748_s29, %s5742_s17 }
 0x2fd   : > { %5562 = vmatmul.mubr.msk.f32.vlgmr.msra.gmra.mrb[14].mxu1 %vm1183_vm4, %v6274_v54  ;;  %v2730_v61 = vsel %vm1181_vm3, %v2729_v51, %v2728_v55  ;;  %v4005_v10 = vsel %vm1181_vm3, %v4004_v42, %v4003_v43  ;;  %v4504_v55 = vld [vmem:[%s6247_s27 + $0x2d] sm:$0x1]  ;;  %v4256_v56 = vsel %vm1175_vm15, %v4255_v46, %v4247_v14 }
 0x2fe   : > { %5571 = vmatprep.mubr.msk.f32.mxu1 %vm5823_vm14, %v5807_v11  ;;  %5570 = vmatpush3.msk.msra.mxu1 %vm1187_vm2, %v2475_v47  ;;  %v4250_v47 = vld [vmem:[%s6247_s27 + $0x3c] sm:$0x1]  ;;  %v4258_v1 = vsel %vm1178_vm1, %v4257_v49, %v4256_v56  ;;  %v5023_v7 = vsel %vm1178_vm1, %v5022_v6, %v5021_v32  ;;  %p5744_p12 = pnand %p5743_p11, %p5917_p5  ;;  %p5751_p2 = por %p5750_p1, %p5749_p0 }
 0x2ff   : > { %5579 = vmatprep.subr.mxu1 %v5807_v11  ;;  %v4259_v51 = vrot.slane %v4250_v47, 5  ;;  %1362 = vperm.xlu1 %5740, %v1157_v62  }
 0x300   : > { %p5745_p13 = pneg %p5744_p12 }
 0x301   : > { %5572 = vmatmul.mubr.msk.f32.vlgmr.msra.gmra.mrb[16].mxu1 %vm1183_vm4, %v6274_v54  ;;  %v4260_v15 = vsel %vm1181_vm3, %v4259_v51, %v4258_v1 }
 0x302   : > { %5581 = vmatprep.mubr.msk.f32.mxu1 %vm5823_vm14, %v5807_v11  ;;  %5580 = vmatpush3.msk.msra.mxu1 %vm1187_vm2, %v2730_v61  ;;  %v4512_v61 = vrot.slane %v4504_v55, 6  ;;  %p5752_p3 = pnand %p5751_p2, %p5745_p13 }
 0x303   : > { %5589 = vmatprep.subr.mxu1 %v5807_v11 }
 0x304   : > { %v4513_v22 = vsel %vm1178_vm1, %v4512_v61, %v4511_v26  ;;  %v1689_v61 = vld [vmem:[#allocation2 + $0x2] sm:$0x1] }
 0x305   : > { %5582 = vmatmul.mubr.msk.f32.vlgmr.msra.gmra.mrb[18].mxu1 %vm1183_vm4, %v6274_v54  ;;  %v4515_v29 = vsel %vm1181_vm3, %v4514_v3, %v4513_v22 }
 0x306   : > { %5591 = vmatprep.mubr.msk.f32.mxu1 %vm5823_vm14, %v5807_v11  ;;  %5590 = vmatpush3.msk.msra.mxu1 %vm1187_vm2, %v2985_v25  ;;  %v4767_v25 = vrot.slane %v4759_v20, 6 }
 0x307   : > { %5599 = vmatprep.subr.mxu1 %v5807_v11 }
 0x308   : > { %v4768_v24 = vsel %vm1178_vm1, %v4767_v25, %v4766_v16 }
 0x309   : > { %5592 = vmatmul.mubr.msk.f32.vlgmr.msra.gmra.mrb[20].mxu1 %vm1183_vm4, %v6274_v54  ;;  %v4770_v21 = vsel %vm1181_vm3, %v4769_v30, %v4768_v24 }
 0x30a   : > { %5601 = vmatprep.mubr.msk.f32.mxu1 %vm5823_vm14, %v5807_v11  ;;  %5600 = vmatpush3.msk.msra.mxu1 %vm1187_vm2, %v3240_v48  ;;  %v5015_v48 = vld [vmem:[%s6247_s27 + $0x3f] sm:$0x1] }
 0x30b   : > { %5609 = vmatprep.subr.mxu1 %v5807_v11  ;;  %v5024_v33 = vrot.slane %v5015_v48, 5 }
 0x30d   : > { %5602 = vmatmul.mubr.msk.f32.vlgmr.msra.gmra.mrb[22].mxu1 %vm1183_vm4, %v6274_v54  ;;  %v5025_v35 = vsel %vm1181_vm3, %v5024_v33, %v5023_v7 }
 0x30e   : > { %5611 = vmatprep.mubr.msk.f32.mxu1 %vm5823_vm14, %v5807_v11  ;;  %5610 = vmatpush3.msk.msra.mxu1 %vm1187_vm2, %v3495_v17 }
 0x30f   : > { %5619 = vmatprep.subr.mxu1 %v5807_v11 }
 0x311   : > { %5612 = vmatmul.mubr.msk.f32.vlgmr.msra.gmra.mrb[24].mxu1 %vm1183_vm4, %v6274_v54 }
 0x312   : > { %5621 = vmatprep.mubr.msk.f32.mxu1 %vm5823_vm14, %v5807_v11  ;;  %5620 = vmatpush3.msk.msra.mxu1 %vm1187_vm2, %v3750_v39 }
 0x313   : > { %5629 = vmatprep.subr.mxu1 %v5807_v11 }
 0x315   : > { %5622 = vmatmul.mubr.msk.f32.vlgmr.msra.gmra.mrb[26].mxu1 %vm1183_vm4, %v6274_v54 }
 0x316   : > { %5631 = vmatprep.mubr.msk.f32.mxu1 %vm5823_vm14, %v5807_v11  ;;  %5630 = vmatpush3.msk.msra.mxu1 %vm1187_vm2, %v4005_v10 }
 0x317   : > { %5639 = vmatprep.subr.mxu1 %v5807_v11 }
 0x319   : > { %5632 = vmatmul.mubr.msk.f32.vlgmr.msra.gmra.mrb[28].mxu1 %vm1183_vm4, %v6274_v54 }
 0x31a   : > { %5641 = vmatprep.mubr.msk.f32.mxu1 %vm5823_vm14, %v5807_v11  ;;  %5640 = vmatpush3.msk.msra.mxu1 %vm1187_vm2, %v4260_v15 }
 0x31b   : > { %5649 = vmatprep.subr.mxu1 %v5807_v11 }
 0x31d   : > { %5642 = vmatmul.mubr.msk.f32.vlgmr.msra.gmra.mrb[30].mxu1 %vm1183_vm4, %v6274_v54 }
 0x31e   : > { %5650 = vmatpush3.msk.msra.mxu1 %vm1187_vm2, %v4515_v29  ;;  %5651 = vmatprep.mubr.msk.f32.mxu1 %vm5823_vm14, %v5807_v11 }
 0x31f   : > { %5659 = vmatprep.subr.mxu1 %v5807_v11 }
 0x321   : > { %5652 = vmatmul.mubr.msk.f32.vlgmr.msra.gmra.mrb[32].mxu1 %vm1183_vm4, %v6274_v54 }
 0x322   : > { %5660 = vmatpush3.msk.msra.mxu1 %vm1187_vm2, %v4770_v21  ;;  %5661 = vmatprep.mubr.msk.f32.mxu1 %vm5823_vm14, %v5807_v11  ;;  %v1944_v21 = vld [vmem:[#allocation2 + $0x3] sm:$0x1] }
 0x323   : > { %5669 = vmatprep.subr.mxu1 %v5807_v11 }
 0x325   : > { %5662 = vmatmul.mubr.msk.f32.vlgmr.msra.gmra.mrb[34].mxu1 %vm1183_vm4, %v6274_v54 }
 0x326   : > { %5670 = vmatpush3.msk.msra.mxu1 %vm1187_vm2, %v5025_v35  ;;  %5671 = vmatprep.mubr.msk.f32.mxu1 %vm5823_vm14, %v5807_v11 }
 0x329   : > { %5672 = vmatmul.mubr.msk.f32.vlgmr.msra.gmra.mrb[36].mxu1 %vm1183_vm4, %v6274_v54 }
 0x349   : > { %v1094_v0 = vpop.permute.xlu0 %1093  ;;  %v1085_v17 = vpop.permute.xlu1 %1084 }
 0x34a   : > { %1100 = vst.msk [vmem:[#allocation2 + $0x20] sm:$0xff] %vm532_vm7, %v1094_v0  ;;  %1091 = vst.msk [vmem:[#allocation2 + $0x10] sm:$0xff] %vm532_vm7, %v1085_v17 }
 0x34d   : > { %v1112_v5 = vpop.permute.xlu0 %1111  ;;  %v1103_v8 = vpop.permute.xlu1 %1102 }
 0x34e   : > { %1118 = vst.msk [vmem:[#allocation2 + $0x40] sm:$0xff] %vm532_vm7, %v1112_v5  ;;  %1109 = vst.msk [vmem:[#allocation2 + $0x30] sm:$0xff] %vm532_vm7, %v1103_v8 }
 0x351   : > { %v1130_v36 = vpop.permute.xlu0 %1129  ;;  %v1121_v2 = vpop.permute.xlu1 %1120  ;;  %v1159_v9 = vld [vmem:[#allocation2 + $0x10] sm:$0x1]  ;;  %v1160_v38 = vld [vmem:[#allocation2 + $0x20] sm:$0x1]  ;;  %v1435_v4 = vld [vmem:[#allocation2 + $0x11] sm:$0x1] }
 0x352   : > { %1136 = vst.msk [vmem:[#allocation2 + $0x60] sm:$0xff] %vm532_vm7, %v1130_v36  ;;  %1127 = vst.msk [vmem:[#allocation2 + $0x50] sm:$0xff] %vm532_vm7, %v1121_v2  ;;  %v1268_v54 = vrot.slane %v1159_v9, 7  ;;  %v1436_v39 = vld [vmem:[#allocation2 + $0x21] sm:$0x1]  ;;  %v1536_v40 = vrot.slane %v1435_v4, 7 }
 0x353   : > { %v1270_v41 = vrot.slane %v1160_v38, 6  ;;  %v1538_v12 = vrot.slane %v1436_v39, 6  ;;  %v1690_v42 = vld [vmem:[#allocation2 + $0x12] sm:$0x1]  ;;  %v1691_v14 = vld [vmem:[#allocation2 + $0x22] sm:$0x1] }
 0x354   : > { %v1269_v53 = vsel %vm1175_vm15, %v1268_v54, %v1158_v37  ;;  %v1537_v43 = vsel %vm1175_vm15, %v1536_v40, %v1434_v23  ;;  %v1791_v44 = vrot.slane %v1690_v42, 7  ;;  %v1793_v1 = vrot.slane %v1691_v14, 6  ;;  %v1945_v18 = vld [vmem:[#allocation2 + $0x13] sm:$0x1]  ;;  %v1946_v31 = vld [vmem:[#allocation2 + $0x23] sm:$0x1] }
 0x355   : > { %v1143_v45 = vpop.permute.xlu0 %1142  ;;  %v1141_v10 = vpop.permute.xlu1 %1140  ;;  %v1161_v47 = vld [vmem:[#allocation2 + $0x30] sm:$0x1]  ;;  %v1162_v46 = vld [vmem:[#allocation2 + $0x40] sm:$0x1]  ;;  %v1437_v49 = vld [vmem:[#allocation2 + $0x31] sm:$0x1]  ;;  %v1271_v56 = vsel %vm1178_vm1, %v1270_v41, %v1269_v53  ;;  %v1539_v59 = vsel %vm1178_vm1, %v1538_v12, %v1537_v43 }
 0x356   : > { %v1148_v50 = vsel %vm710_vm10, %v1141_v10, %v1143_v45  ;;  %v1272_v51 = vrot.slane %v1161_v47, 5  ;;  %v1438_v52 = vld [vmem:[#allocation2 + $0x41] sm:$0x1]  ;;  %v1540_v55 = vrot.slane %v1437_v49, 5  ;;  %v1274_v57 = vrot.slane %v1162_v46, 4 }
 0x357   : > { %1153 = vst.msk [vmem:[#allocation2 + $0x70] sm:$0xff] %vm532_vm7, %v1148_v50  ;;  %v1692_v63 = vld [vmem:[#allocation2 + $0x32] sm:$0x1]  ;;  %v1542_v13 = vrot.slane %v1438_v52, 4  ;;  %v1693_v20 = vld [vmem:[#allocation2 + $0x42] sm:$0x1]  ;;  %v1792_v15 = vsel %vm1175_vm15, %v1791_v44, %v1689_v61 }
 0x358   : > { %v1273_v3 = vsel %vm1181_vm3, %v1272_v51, %v1271_v56  ;;  %v1795_v26 = vrot.slane %v1692_v63, 5  ;;  %v1541_v58 = vsel %vm1181_vm3, %v1540_v55, %v1539_v59  ;;  %v1794_v16 = vsel %vm1178_vm1, %v1793_v1, %v1792_v15  ;;  %v1947_v33 = vld [vmem:[#allocation2 + $0x33] sm:$0x1]  ;;  %v6502_v5 = vld [vmem:[#allocation2 + $0x43] sm:$0x1] }
 0x359   : > { %v1163_v27 = vld [vmem:[#allocation2 + $0x50] sm:$0x1]  ;;  %v1164_v25 = vld [vmem:[#allocation2 + $0x60] sm:$0x1]  ;;  %v1439_v28 = vld [vmem:[#allocation2 + $0x51] sm:$0x1]  ;;  %v1276_v62 = vsel %vm1275_vm5, %v1274_v57, %v1273_v3  ;;  %v1543_v6 = vsel %vm1275_vm5, %v1542_v13, %v1541_v58 }
 0x35a   : > { %v1277_v22 = vrot.slane %v1163_v27, 3  ;;  %v1440_v30 = vld [vmem:[#allocation2 + $0x61] sm:$0x1]  ;;  %v1544_v34 = vrot.slane %v1439_v28, 3  ;;  %v1694_v29 = vld [vmem:[#allocation2 + $0x52] sm:$0x1]  ;;  %v1796_v24 = vsel %vm1181_vm3, %v1795_v26, %v1794_v16 }
 0x35b   : > { %v2046_v48 = vrot.slane %v1945_v18, 7  ;;  %v1280_v60 = vrot.slane %v1164_v25, 2  ;;  %v1797_v32 = vrot.slane %v1693_v20, 4  ;;  %v1546_v35 = vrot.slane %v1440_v30, 2  ;;  %v1695_v0 = vld [vmem:[#allocation2 + $0x62] sm:$0x1] }
 0x35c   : > { %v1279_v7 = vsel %vm1278_vm6, %v1277_v22, %v1276_v62  ;;  %v1799_v17 = vrot.slane %v1694_v29, 3  ;;  %v2048_v8 = vrot.slane %v1946_v31, 6  ;;  %v6507_v2 = vld [vmem:[%s7194_s6] sm:$0xff]  ;;  %v1545_v9 = vsel %vm1278_vm6, %v1544_v34, %v1543_v6  ;;  %v6512_v23 = vld [vmem:[#allocation2 + $0x53] sm:$0x1] }
 0x35d   : > { %v2047_v39 = vsel %vm1175_vm15, %v2046_v48, %v1944_v21  ;;  %v2200_v40 = vld [vmem:[#allocation2 + $0x14] sm:$0x1]  ;;  %v1282_v41 = vsel %vm1281_vm8, %v1280_v60, %v1279_v7  ;;  %v1798_v12 = vsel %vm1275_vm5, %v1797_v32, %v1796_v24  ;;  %v1801_v42 = vrot.slane %v1695_v0, 2  ;;  %v2201_v43 = vld [vmem:[#allocation2 + $0x24] sm:$0x1] }
 0x35e   : > { %v1165_v36 = vld [vmem:[#allocation2 + $0x70] sm:$0x1]  ;;  %v1441_v37 = vld [vmem:[#allocation2 + $0x71] sm:$0x1]  ;;  %v6510_v38 = vld [vmem:[#allocation2 + $0x72] sm:$0x1]  ;;  %v1547_v47 = vsel %vm1281_vm8, %v1546_v35, %v1545_v9  ;;  %v1800_v46 = vsel %vm1278_vm6, %v1799_v17, %v1798_v12  ;;  %v2049_v55 = vsel %vm1178_vm1, %v2048_v8, %v2047_v39 }
 0x35f   : > { %v1283_v4 = vrot.slane %v1165_v36, 1  ;;  %v1548_v54 = vrot.slane %v1441_v37, 1  ;;  %v2050_v53 = vrot.slane %v1947_v33, 5  ;;  %v2202_v14 = vld [vmem:[#allocation2 + $0x34] sm:$0x1]  ;;  %v1803_v49 = vrot.slane %v6510_v38, 1 }
 0x360   : > { %v6521_v50 = vld [vmem:[#allocation2 + $0x63] sm:$0x1]  ;;  %v2199_v51 = vld [vmem:[#allocation2 + $0x4] sm:$0x1]  ;;  %v2052_v56 = vrot.slane %v6502_v5, 4  ;;  %v2054_v57 = vrot.slane %v6512_v23, 3  ;;  %v1802_v34 = vsel %vm1281_vm8, %v1801_v42, %v1800_v46 }
 0x361   : > { %v1096_v44 = vpop.permute.xlu0 %1095  ;;  %v1087_v45 = vpop.permute.xlu1 %1086  ;;  %v1285_v10 = vsel %vm1284_vm9, %v1283_v4, %v1282_v41  ;;  %v2203_v52 = vld [vmem:[#allocation2 + $0x44] sm:$0x1]  ;;  %v2204_v59 = vld [vmem:[#allocation2 + $0x54] sm:$0x1]  ;;  %v2301_v61 = vrot.slane %v2200_v40, 7  ;;  %v1549_v63 = vsel %vm1284_vm9, %v1548_v54, %v1547_v47  ;;  %v2051_v3 = vsel %vm1181_vm3, %v2050_v53, %v2049_v55 }
 0x362   : > { %1101 = vst.msk [vmem:[#allocation2 + $0x28] sm:$0xff] %vm532_vm7, %v1096_v44  ;;  %1092 = vst.msk [vmem:[#allocation2 + $0x18] sm:$0xff] %vm532_vm7, %v1087_v45  ;;  %5525 = vmatpush3.msra.mxu0 %v1285_v10  ;;  %v6532_v1 = vld [vmem:[#allocation2 + $0x73] sm:$0x1]  ;;  %v2303_v13 = vrot.slane %v2201_v43, 6  ;;  %v2305_v20 = vrot.slane %v2202_v14, 5  ;;  %v2053_v60 = vsel %vm1275_vm5, %v2052_v56, %v2051_v3  ;;  %v1804_v7 = vsel %vm1284_vm9, %v1803_v49, %v1802_v34 }
 0x363   : > { %5527 = vmatmul.mubr.msk.f32.vlgmr.msra.gmra.mrb[8].mxu0 %vm360_vm0, %v6507_v2  ;;  %5534 = vmatprep.subr.mxu0 %v5807_v11  ;;  %v2455_v15 = vld [vmem:[#allocation2 + $0x15] sm:$0x1]  ;;  %v2056_v26 = vrot.slane %v6521_v50, 2  ;;  %v2302_v18 = vsel %vm1175_vm15, %v2301_v61, %v2199_v51  ;;  %v2307_v27 = vrot.slane %v2203_v52, 4  ;;  %v2454_v25 = vld [vmem:[#allocation2 + $0x5] sm:$0x1]  ;;  %v2055_v35 = vsel %vm1278_vm6, %v2054_v57, %v2053_v60 }
 0x364   : > { %5535 = vmatpush3.msra.mxu0 %v1549_v63  ;;  %5536 = vmatprep.mubr.msk.f32.mxu0 %vm5823_vm14, %v5807_v11  ;;  %v2456_v28 = vld [vmem:[#allocation2 + $0x25] sm:$0x1]  ;;  %v2457_v58 = vld [vmem:[#allocation2 + $0x35] sm:$0x1]  ;;  %v2205_v31 = vld [vmem:[#allocation2 + $0x64] sm:$0x1]  ;;  %v2304_v62 = vsel %vm1178_vm1, %v2303_v13, %v2302_v18 }
 0x365   : > { %v1114_v22 = vpop.permute.xlu0 %1113  ;;  %v1105_v30 = vpop.permute.xlu1 %1104  ;;  %5544 = vmatprep.subr.mxu0 %v5807_v11  ;;  %v2309_v29 = vrot.slane %v2204_v59, 3  ;;  %v2458_v16 = vld [vmem:[#allocation2 + $0x45] sm:$0x1]  ;;  %v2556_v48 = vrot.slane %v2455_v15, 7  ;;  %v2206_v6 = vld [vmem:[#allocation2 + $0x74] sm:$0x1]  ;;  %v2306_v24 = vsel %vm1181_vm3, %v2305_v20, %v2304_v62  ;;  %v2057_v14 = vsel %vm1281_vm8, %v2056_v26, %v2055_v35 }
 0x366   : > { %1119 = vst.msk [vmem:[#allocation2 + $0x48] sm:$0xff] %vm532_vm7, %v1114_v22  ;;  %1110 = vst.msk [vmem:[#allocation2 + $0x38] sm:$0xff] %vm532_vm7, %v1105_v30  ;;  %v2459_v32 = vld [vmem:[#allocation2 + $0x55] sm:$0x1]  ;;  %v2558_v21 = vrot.slane %v2456_v28, 6  ;;  %v2560_v33 = vrot.slane %v2457_v58, 5  ;;  %v2308_v36 = vsel %vm1275_vm5, %v2307_v27, %v2306_v24 }
 0x367   : > { %5537 = vmatmul.mubr.msk.f32.vlgmr.msra.gmra.mrb[10].mxu0 %vm360_vm0, %v6507_v2  ;;  %v2058_v0 = vrot.slane %v6532_v1, 1  ;;  %v2557_v17 = vsel %vm1175_vm15, %v2556_v48, %v2454_v25  ;;  %v2710_v5 = vld [vmem:[#allocation2 + $0x16] sm:$0x1]  ;;  %v2711_v8 = vld [vmem:[#allocation2 + $0x26] sm:$0x1]  ;;  %v2311_v37 = vrot.slane %v2205_v31, 2  ;;  %v2310_v40 = vsel %vm1278_vm6, %v2309_v29, %v2308_v36 }
 0x368   : > { %5545 = vmatpush3.msra.mxu0 %v1804_v7  ;;  %5546 = vmatprep.mubr.msk.f32.mxu0 %vm5823_vm14, %v5807_v11  ;;  %v6555_v9 = vld [vmem:[#allocation2 + $0x65] sm:$0x1]  ;;  %v2559_v38 = vsel %vm1178_vm1, %v2558_v21, %v2557_v17  ;;  %v2562_v4 = vrot.slane %v2458_v16, 4  ;;  %v2712_v54 = vld [vmem:[#allocation2 + $0x36] sm:$0x1]  ;;  %v2313_v41 = vrot.slane %v2206_v6, 1 }
 0x369   : > { %v1132_v23 = vpop.permute.xlu0 %1131  ;;  %v1123_v39 = vpop.permute.xlu1 %1122  ;;  %5554 = vmatprep.subr.mxu0 %v5807_v11  ;;  %v6560_v12 = vld [vmem:[#allocation2 + $0x75] sm:$0x1]  ;;  %v2561_v42 = vsel %vm1181_vm3, %v2560_v33, %v2559_v38  ;;  %v2564_v53 = vrot.slane %v2459_v32, 3  ;;  %v2709_v43 = vld [vmem:[#allocation2 + $0x6] sm:$0x1]  ;;  %v2811_v45 = vrot.slane %v2710_v5, 7  ;;  %v2059_v46 = vsel %vm1284_vm9, %v2058_v0, %v2057_v14 }
 0x36a   : > { %1137 = vst.msk [vmem:[#allocation2 + $0x68] sm:$0xff] %vm532_vm7, %v1132_v23  ;;  %1128 = vst.msk [vmem:[#allocation2 + $0x58] sm:$0xff] %vm532_vm7, %v1123_v39  ;;  %v2713_v44 = vld [vmem:[#allocation2 + $0x46] sm:$0x1]  ;;  %v2813_v10 = vrot.slane %v2711_v8, 6  ;;  %v2566_v49 = vrot.slane %v6555_v9, 2  ;;  %v2312_v55 = vsel %vm1281_vm8, %v2311_v37, %v2310_v40  ;;  %v2563_v56 = vsel %vm1275_vm5, %v2562_v4, %v2561_v42 }
 0x36b   : > { %v2965_v47 = vld [vmem:[#allocation2 + $0x17] sm:$0x1]  ;;  %5547 = vmatmul.mubr.msk.f32.vlgmr.msra.gmra.mrb[12].mxu0 %vm360_vm0, %v6507_v2  ;;  %v2714_v50 = vld [vmem:[#allocation2 + $0x56] sm:$0x1]  ;;  %v2815_v51 = vrot.slane %v2712_v54, 5  ;;  %v2568_v57 = vrot.slane %v6560_v12, 1  ;;  %v2812_v61 = vsel %vm1175_vm15, %v2811_v45, %v2709_v43  ;;  %v2314_v13 = vsel %vm1284_vm9, %v2313_v41, %v2312_v55 }
 0x36c   : > { %v2966_v52 = vld [vmem:[#allocation2 + $0x27] sm:$0x1]  ;;  %5555 = vmatpush3.msra.mxu0 %v2059_v46  ;;  %5556 = vmatprep.mubr.msk.f32.mxu0 %vm5823_vm14, %v5807_v11  ;;  %v6575_v59 = vld [vmem:[#allocation2 + $0x66] sm:$0x1]  ;;  %v2967_v63 = vld [vmem:[#allocation2 + $0x37] sm:$0x1]  ;;  %v2565_v20 = vsel %vm1278_vm6, %v2564_v53, %v2563_v56  ;;  %v2814_v28 = vsel %vm1178_vm1, %v2813_v10, %v2812_v61 }
 0x36d   : > { %v1147_v1 = vpop.permute.xlu0 %1146  ;;  %v1145_v3 = vpop.permute.xlu1 %1144  ;;  %5564 = vmatprep.subr.mxu0 %v5807_v11  ;;  %v6581_v15 = vld [vmem:[#allocation2 + $0x76] sm:$0x1]  ;;  %v2817_v26 = vrot.slane %v2713_v44, 4  ;;  %v2964_v18 = vld [vmem:[#allocation2 + $0x7] sm:$0x1]  ;;  %v3066_v27 = vrot.slane %v2965_v47, 7  ;;  %v2816_v31 = vsel %vm1181_vm3, %v2815_v51, %v2814_v28  ;;  %v2567_v7 = vsel %vm1281_vm8, %v2566_v49, %v2565_v20 }
 0x36e   : > { %v1149_v25 = vsel %vm710_vm10, %v1145_v3, %v1147_v1  ;;  %v2819_v58 = vrot.slane %v2714_v50, 3  ;;  %v3068_v22 = vrot.slane %v2966_v52, 6  ;;  %v3220_v30 = vld [vmem:[#allocation2 + $0x18] sm:$0x1]  ;;  %v3221_v34 = vld [vmem:[#allocation2 + $0x28] sm:$0x1]  ;;  %v2569_v54 = vsel %vm1284_vm9, %v2568_v57, %v2567_v7 }
 0x36f   : > { %1154 = vst.msk [vmem:[#allocation2 + $0x78] sm:$0xff] %vm532_vm7, %v1149_v25  ;;  %5557 = vmatmul.mubr.msk.f32.vlgmr.msra.gmra.mrb[14].mxu0 %vm360_vm0, %v6507_v2  ;;  %v2821_v62 = vrot.slane %v6575_v59, 2  ;;  %v2968_v29 = vld [vmem:[#allocation2 + $0x47] sm:$0x1]  ;;  %v3067_v16 = vsel %vm1175_vm15, %v3066_v27, %v2964_v18  ;;  %v3070_v48 = vrot.slane %v2967_v63, 5  ;;  %v2823_v24 = vrot.slane %v6581_v15, 1 }
 0x370   : > { %v3219_v60 = vld [vmem:[#allocation2 + $0x8] sm:$0x1]  ;;  %v3222_v6 = vld [vmem:[#allocation2 + $0x38] sm:$0x1]  ;;  %5565 = vmatpush3.msra.mxu0 %v2314_v13  ;;  %5566 = vmatprep.mubr.msk.f32.mxu0 %vm5823_vm14, %v5807_v11  ;;  %v2969_v32 = vld [vmem:[#allocation2 + $0x57] sm:$0x1]  ;;  %v2818_v8 = vsel %vm1275_vm5, %v2817_v26, %v2816_v31  ;;  %v3069_v36 = vsel %vm1178_vm1, %v3068_v22, %v3067_v16 }
 0x371   : > { %v2970_v21 = vld [vmem:[#allocation2 + $0x67] sm:$0x1]  ;;  %v3321_v33 = vrot.slane %v3220_v30, 7  ;;  %5574 = vmatprep.subr.mxu0 %v5807_v11  ;;  %v3223_v35 = vld [vmem:[#allocation2 + $0x48] sm:$0x1]  ;;  %v3323_v0 = vrot.slane %v3221_v34, 6  ;;  %v2820_v23 = vsel %vm1278_vm6, %v2819_v58, %v2818_v8  ;;  %v3071_v39 = vsel %vm1181_vm3, %v3070_v48, %v3069_v36 }
 0x372   : > { %v3325_v17 = vrot.slane %v3222_v6, 5  ;;  %v3475_v5 = vld [vmem:[#allocation2 + $0x19] sm:$0x1]  ;;  %v3072_v37 = vrot.slane %v2968_v29, 4  ;;  %v3224_v9 = vld [vmem:[#allocation2 + $0x58] sm:$0x1]  ;;  %v2822_v50 = vsel %vm1281_vm8, %v2821_v62, %v2820_v23 }
 0x373   : > { %v3322_v38 = vsel %vm1175_vm15, %v3321_v33, %v3219_v60  ;;  %v3476_v4 = vld [vmem:[#allocation2 + $0x29] sm:$0x1]  ;;  %5567 = vmatmul.mubr.msk.f32.vlgmr.msra.gmra.mrb[16].mxu0 %vm360_vm0, %v6507_v2  ;;  %v3074_v40 = vrot.slane %v2969_v32, 3  ;;  %v3477_v12 = vld [vmem:[#allocation2 + $0x39] sm:$0x1]  ;;  %v3076_v53 = vrot.slane %v2970_v21, 2  ;;  %v2824_v59 = vsel %vm1284_vm9, %v2823_v24, %v2822_v50 }
 0x374   : > { %v3474_v41 = vld [vmem:[#allocation2 + $0x9] sm:$0x1]  ;;  %5575 = vmatpush3.msra.mxu0 %v2569_v54  ;;  %5576 = vmatprep.mubr.msk.f32.mxu0 %vm5823_vm14, %v5807_v11  ;;  %v2971_v42 = vld [vmem:[#allocation2 + $0x77] sm:$0x1]  ;;  %v3324_v43 = vsel %vm1178_vm1, %v3323_v0, %v3322_v38  ;;  %v3327_v14 = vrot.slane %v3223_v35, 4  ;;  %v3576_v44 = vrot.slane %v3475_v5, 7  ;;  %v3073_v51 = vsel %vm1275_vm5, %v3072_v37, %v3071_v39 }
 0x375   : > { %5584 = vmatprep.subr.mxu0 %v5807_v11  ;;  %v3225_v45 = vld [vmem:[#allocation2 + $0x68] sm:$0x1]  ;;  %v3326_v10 = vsel %vm1181_vm3, %v3325_v17, %v3324_v43  ;;  %v3329_v47 = vrot.slane %v3224_v9, 3  ;;  %v3578_v46 = vrot.slane %v3476_v4, 6  ;;  %v3730_v49 = vld [vmem:[#allocation2 + $0x1a] sm:$0x1]  ;;  %v3075_v61 = vsel %vm1278_vm6, %v3074_v40, %v3073_v51 }
 0x376   : > { %v3226_v52 = vld [vmem:[#allocation2 + $0x78] sm:$0x1]  ;;  %v3478_v55 = vld [vmem:[#allocation2 + $0x49] sm:$0x1]  ;;  %v3577_v56 = vsel %vm1175_vm15, %v3576_v44, %v3474_v41  ;;  %v3580_v57 = vrot.slane %v3477_v12, 5  ;;  %v3078_v63 = vrot.slane %v2971_v42, 1  ;;  %v3328_v13 = vsel %vm1275_vm5, %v3327_v14, %v3326_v10 }
 0x377   : > { %5577 = vmatmul.mubr.msk.f32.vlgmr.msra.gmra.mrb[18].mxu0 %vm360_vm0, %v6507_v2  ;;  %v3479_v1 = vld [vmem:[#allocation2 + $0x59] sm:$0x1]  ;;  %v3731_v3 = vld [vmem:[#allocation2 + $0x2a] sm:$0x1]  ;;  %v3331_v20 = vrot.slane %v3225_v45, 2  ;;  %v3831_v18 = vrot.slane %v3730_v49, 7  ;;  %v3330_v27 = vsel %vm1278_vm6, %v3329_v47, %v3328_v13  ;;  %v3579_v58 = vsel %vm1178_vm1, %v3578_v46, %v3577_v56 }
 0x378   : > { %5585 = vmatpush3.msra.mxu0 %v2824_v59  ;;  %5586 = vmatprep.mubr.msk.f32.mxu0 %vm5823_vm14, %v5807_v11  ;;  %v3729_v15 = vld [vmem:[#allocation2 + $0xa] sm:$0x1]  ;;  %v3732_v26 = vld [vmem:[#allocation2 + $0x3a] sm:$0x1]  ;;  %v3333_v25 = vrot.slane %v3226_v52, 1  ;;  %v3582_v22 = vrot.slane %v3478_v55, 4  ;;  %v3077_v34 = vsel %vm1281_vm8, %v3076_v53, %v3075_v61  ;;  %v3581_v62 = vsel %vm1181_vm3, %v3580_v57, %v3579_v58 }
 0x379   : > { %5594 = vmatprep.subr.mxu0 %v5807_v11  ;;  %v3480_v28 = vld [vmem:[#allocation2 + $0x69] sm:$0x1]  ;;  %v3985_v30 = vld [vmem:[#allocation2 + $0x1b] sm:$0x1]  ;;  %v3481_v31 = vld [vmem:[#allocation2 + $0x79] sm:$0x1]  ;;  %v3079_v60 = vsel %vm1284_vm9, %v3078_v63, %v3077_v34  ;;  %v3832_v24 = vsel %vm1175_vm15, %v3831_v18, %v3729_v15  ;;  %v3332_v33 = vsel %vm1281_vm8, %v3331_v20, %v3330_v27 }
 0x37a   : > { %v3584_v29 = vrot.slane %v3479_v1, 3  ;;  %v3733_v16 = vld [vmem:[#allocation2 + $0x4a] sm:$0x1]  ;;  %v3833_v48 = vrot.slane %v3731_v3, 6  ;;  %v3734_v6 = vld [vmem:[#allocation2 + $0x5a] sm:$0x1]  ;;  %v3334_v8 = vsel %vm1284_vm9, %v3333_v25, %v3332_v33  ;;  %v3583_v36 = vsel %vm1275_vm5, %v3582_v22, %v3581_v62 }
 0x37b   : > { %5587 = vmatmul.mubr.msk.f32.vlgmr.msra.gmra.mrb[20].mxu0 %vm360_vm0, %v6507_v2  ;;  %v3835_v32 = vrot.slane %v3732_v26, 5  ;;  %v3986_v21 = vld [vmem:[#allocation2 + $0x2b] sm:$0x1]  ;;  %v3586_v7 = vrot.slane %v3480_v28, 2  ;;  %v3987_v0 = vld [vmem:[#allocation2 + $0x3b] sm:$0x1] }
 0x37c   : > { %5595 = vmatpush3.msra.mxu0 %v3079_v60  ;;  %5596 = vmatprep.mubr.msk.f32.mxu0 %vm5823_vm14, %v5807_v11  ;;  %v3984_v35 = vld [vmem:[#allocation2 + $0xb] sm:$0x1]  ;;  %v4086_v17 = vrot.slane %v3985_v30, 7  ;;  %v4240_v5 = vld [vmem:[#allocation2 + $0x1c] sm:$0x1]  ;;  %v3588_v37 = vrot.slane %v3481_v31, 1  ;;  %v3585_v54 = vsel %vm1278_vm6, %v3584_v29, %v3583_v36  ;;  %v3834_v39 = vsel %vm1178_vm1, %v3833_v48, %v3832_v24 }
 0x37d   : > { %5604 = vmatprep.subr.mxu0 %v5807_v11  ;;  %v3735_v9 = vld [vmem:[#allocation2 + $0x6a] sm:$0x1]  ;;  %v3837_v38 = vrot.slane %v3733_v16, 4  ;;  %v4241_v4 = vld [vmem:[#allocation2 + $0x2c] sm:$0x1]  ;;  %v3839_v40 = vrot.slane %v3734_v6, 3  ;;  %v3836_v42 = vsel %vm1181_vm3, %v3835_v32, %v3834_v39  ;;  %v3587_v50 = vsel %vm1281_vm8, %v3586_v7, %v3585_v54 }
 0x37e   : > { %v3736_v23 = vld [vmem:[#allocation2 + $0x7a] sm:$0x1]  ;;  %v4088_v41 = vrot.slane %v3986_v21, 6  ;;  %v4242_v12 = vld [vmem:[#allocation2 + $0x3c] sm:$0x1]  ;;  %v4087_v43 = vsel %vm1175_vm15, %v4086_v17, %v3984_v35  ;;  %v4090_v14 = vrot.slane %v3987_v0, 5  ;;  %v3589_v20 = vsel %vm1284_vm9, %v3588_v37, %v3587_v50 }
 0x37f   : > { %5597 = vmatmul.mubr.msk.f32.vlgmr.msra.gmra.mrb[22].mxu0 %vm360_vm0, %v6507_v2  ;;  %v3988_v53 = vld [vmem:[#allocation2 + $0x4b] sm:$0x1]  ;;  %v4239_v44 = vld [vmem:[#allocation2 + $0xc] sm:$0x1]  ;;  %v4341_v45 = vrot.slane %v4240_v5, 7  ;;  %v3841_v10 = vrot.slane %v3735_v9, 2  ;;  %v3838_v59 = vsel %vm1275_vm5, %v3837_v38, %v3836_v42 }
 0x380   : > { %5605 = vmatpush3.msra.mxu0 %v3334_v8  ;;  %5606 = vmatprep.mubr.msk.f32.mxu0 %vm5823_vm14, %v5807_v11  ;;  %v3989_v47 = vld [vmem:[#allocation2 + $0x5b] sm:$0x1]  ;;  %v4343_v46 = vrot.slane %v4241_v4, 6  ;;  %v4495_v49 = vld [vmem:[#allocation2 + $0x1d] sm:$0x1]  ;;  %v3843_v51 = vrot.slane %v3736_v23, 1  ;;  %v4089_v61 = vsel %vm1178_vm1, %v4088_v41, %v4087_v43  ;;  %v3840_v15 = vsel %vm1278_vm6, %v3839_v40, %v3838_v59 }
 0x381   : > { %5614 = vmatprep.subr.mxu0 %v5807_v11  ;;  %v3990_v52 = vld [vmem:[#allocation2 + $0x6b] sm:$0x1]  ;;  %v4243_v55 = vld [vmem:[#allocation2 + $0x4c] sm:$0x1]  ;;  %v4342_v56 = vsel %vm1175_vm15, %v4341_v45, %v4239_v44  ;;  %v4345_v57 = vrot.slane %v4242_v12, 5  ;;  %v4092_v63 = vrot.slane %v3988_v53, 4  ;;  %v4091_v26 = vsel %vm1181_vm3, %v4090_v14, %v4089_v61 }
 0x382   : > { %v4244_v1 = vld [vmem:[#allocation2 + $0x5c] sm:$0x1]  ;;  %v4496_v3 = vld [vmem:[#allocation2 + $0x2d] sm:$0x1]  ;;  %v4596_v13 = vrot.slane %v4495_v49, 7  ;;  %v4094_v18 = vrot.slane %v3989_v47, 3  ;;  %v4344_v58 = vsel %vm1178_vm1, %v4343_v46, %v4342_v56  ;;  %v3842_v48 = vsel %vm1281_vm8, %v3841_v10, %v3840_v15 }
 0x383   : > { %5607 = vmatmul.mubr.msk.f32.vlgmr.msra.gmra.mrb[24].mxu0 %vm360_vm0, %v6507_v2  ;;  %v4494_v27 = vld [vmem:[#allocation2 + $0xd] sm:$0x1]  ;;  %v4497_v25 = vld [vmem:[#allocation2 + $0x3d] sm:$0x1]  ;;  %v3991_v28 = vld [vmem:[#allocation2 + $0x7b] sm:$0x1]  ;;  %v4346_v62 = vsel %vm1181_vm3, %v4345_v57, %v4344_v58  ;;  %v4093_v60 = vsel %vm1275_vm5, %v4092_v63, %v4091_v26  ;;  %v3844_v33 = vsel %vm1284_vm9, %v3843_v51, %v3842_v48 }
 0x384   : > { %5615 = vmatpush3.msra.mxu0 %v3589_v20  ;;  %5616 = vmatprep.mubr.msk.f32.mxu0 %vm5823_vm14, %v5807_v11  ;;  %v4347_v22 = vrot.slane %v4243_v55, 4  ;;  %v4750_v30 = vld [vmem:[#allocation2 + $0x1e] sm:$0x1]  ;;  %v4096_v34 = vrot.slane %v3990_v52, 2  ;;  %v4245_v31 = vld [vmem:[#allocation2 + $0x6c] sm:$0x1]  ;;  %v4597_v32 = vsel %vm1175_vm15, %v4596_v13, %v4494_v27  ;;  %v4095_v7 = vsel %vm1278_vm6, %v4094_v18, %v4093_v60 }
 0x385   : > { %5624 = vmatprep.subr.mxu0 %v5807_v11  ;;  %v4349_v29 = vrot.slane %v4244_v1, 3  ;;  %v4598_v16 = vrot.slane %v4496_v3, 6  ;;  %v4246_v6 = vld [vmem:[#allocation2 + $0x7c] sm:$0x1]  ;;  %v4498_v24 = vld [vmem:[#allocation2 + $0x4d] sm:$0x1] }
 0x386   : > { %v4600_v21 = vrot.slane %v4497_v25, 5  ;;  %v4098_v35 = vrot.slane %v3991_v28, 1  ;;  %v4499_v0 = vld [vmem:[#allocation2 + $0x5d] sm:$0x1]  ;;  %v4751_v17 = vld [vmem:[#allocation2 + $0x2e] sm:$0x1]  ;;  %v4348_v8 = vsel %vm1275_vm5, %v4347_v22, %v4346_v62  ;;  %v4097_v40 = vsel %vm1281_vm8, %v4096_v34, %v4095_v7 }
 0x387   : > { %5617 = vmatmul.mubr.msk.f32.vlgmr.msra.gmra.mrb[26].mxu0 %vm360_vm0, %v6507_v2  ;;  %v4851_v5 = vrot.slane %v4750_v30, 7  ;;  %v4351_v36 = vrot.slane %v4245_v31, 2  ;;  %v4752_v37 = vld [vmem:[#allocation2 + $0x3e] sm:$0x1]  ;;  %v5005_v9 = vld [vmem:[#allocation2 + $0x1f] sm:$0x1]  ;;  %v4350_v38 = vsel %vm1278_vm6, %v4349_v29, %v4348_v8  ;;  %v4599_v54 = vsel %vm1178_vm1, %v4598_v16, %v4597_v32 }
 0x388   : > { %5625 = vmatpush3.msra.mxu0 %v3844_v33  ;;  %5626 = vmatprep.mubr.msk.f32.mxu0 %vm5823_vm14, %v5807_v11  ;;  %v4353_v4 = vrot.slane %v4246_v6, 1  ;;  %v4602_v23 = vrot.slane %v4498_v24, 4  ;;  %v4749_v39 = vld [vmem:[#allocation2 + $0xe] sm:$0x1]  ;;  %v4500_v41 = vld [vmem:[#allocation2 + $0x6d] sm:$0x1]  ;;  %v4601_v42 = vsel %vm1181_vm3, %v4600_v21, %v4599_v54  ;;  %v4099_v14 = vsel %vm1284_vm9, %v4098_v35, %v4097_v40 }
 0x389   : > { %5634 = vmatprep.subr.mxu0 %v5807_v11  ;;  %v4501_v12 = vld [vmem:[#allocation2 + $0x7d] sm:$0x1]  ;;  %v4604_v53 = vrot.slane %v4499_v0, 3  ;;  %v4853_v43 = vrot.slane %v4751_v17, 6  ;;  %v4753_v44 = vld [vmem:[#allocation2 + $0x4e] sm:$0x1]  ;;  %v4852_v45 = vsel %vm1175_vm15, %v4851_v5, %v4749_v39  ;;  %v4352_v49 = vsel %vm1281_vm8, %v4351_v36, %v4350_v38 }
 0x38a   : > { %v4855_v10 = vrot.slane %v4752_v37, 5  ;;  %v5006_v47 = vld [vmem:[#allocation2 + $0x2f] sm:$0x1]  ;;  %v5106_v46 = vrot.slane %v5005_v9, 7  ;;  %v4754_v50 = vld [vmem:[#allocation2 + $0x5e] sm:$0x1]  ;;  %v4354_v52 = vsel %vm1284_vm9, %v4353_v4, %v4352_v49  ;;  %v4603_v55 = vsel %vm1275_vm5, %v4602_v23, %v4601_v42 }
 0x38b   : > { %5627 = vmatmul.mubr.msk.f32.vlgmr.msra.gmra.mrb[28].mxu0 %vm360_vm0, %v6507_v2  ;;  %v5007_v51 = vld [vmem:[#allocation2 + $0x3f] sm:$0x1]  ;;  %v4606_v56 = vrot.slane %v4500_v41, 2  ;;  %v4608_v57 = vrot.slane %v4501_v12, 1  ;;  %v4605_v59 = vsel %vm1278_vm6, %v4604_v53, %v4603_v55  ;;  %v4755_v61 = vld [vmem:[#allocation2 + $0x6e] sm:$0x1]  ;;  %v4854_v63 = vsel %vm1178_vm1, %v4853_v43, %v4852_v45 }
 0x38c   : > { %5635 = vmatpush3.msra.mxu0 %v4099_v14  ;;  %5636 = vmatprep.mubr.msk.f32.mxu0 %vm5823_vm14, %v5807_v11  ;;  %v4857_v1 = vrot.slane %v4753_v44, 4  ;;  %v5004_v3 = vld [vmem:[#allocation2 + $0xf] sm:$0x1]  ;;  %v5108_v13 = vrot.slane %v5006_v47, 6  ;;  %v4756_v20 = vld [vmem:[#allocation2 + $0x7e] sm:$0x1]  ;;  %v4856_v15 = vsel %vm1181_vm3, %v4855_v10, %v4854_v63 }
 0x38d   : > { %5644 = vmatprep.subr.mxu0 %v5807_v11  ;;  %v4859_v26 = vrot.slane %v4754_v50, 3  ;;  %v5008_v18 = vld [vmem:[#allocation2 + $0x4f] sm:$0x1]  ;;  %v5107_v27 = vsel %vm1175_vm15, %v5106_v46, %v5004_v3  ;;  %v5110_v25 = vrot.slane %v5007_v51, 5  ;;  %v5009_v28 = vld [vmem:[#allocation2 + $0x5f] sm:$0x1]  ;;  %v4607_v58 = vsel %vm1281_vm8, %v4606_v56, %v4605_v59 }
 0x38e   : > { %v4861_v22 = vrot.slane %v4755_v61, 2  ;;  %v4858_v30 = vsel %vm1275_vm5, %v4857_v1, %v4856_v15  ;;  %v4863_v34 = vrot.slane %v4756_v20, 1  ;;  %v5109_v31 = vsel %vm1178_vm1, %v5108_v13, %v5107_v27  ;;  %v5010_v48 = vld [vmem:[#allocation2 + $0x6f] sm:$0x1]  ;;  %v5011_v24 = vld [vmem:[#allocation2 + $0x7f] sm:$0x1]  ;;  %v6745_v20 = vpop.permute.xlu1 %1362 }
 0x38f   : > { %5637 = vmatmul.mubr.msk.f32.vlgmr.msra.gmra.mrb[30].mxu0 %vm360_vm0, %v6507_v2  ;;  %v5112_v62 = vrot.slane %v5008_v18, 4  ;;  %v4609_v29 = vsel %vm1284_vm9, %v4608_v57, %v4607_v58  ;;  %v4860_v16 = vsel %vm1278_vm6, %v4859_v26, %v4858_v30  ;;  %v5111_v60 = vsel %vm1181_vm3, %v5110_v25, %v5109_v31 }
 0x390   : > { %5645 = vmatpush3.msra.mxu0 %v4354_v52  ;;  %5646 = vmatprep.mubr.msk.f32.mxu0 %vm5823_vm14, %v5807_v11  ;;  %v5114_v6 = vrot.slane %v5009_v28, 3  ;;  %v4862_v32 = vsel %vm1281_vm8, %v4861_v22, %v4860_v16  ;;  %v5116_v33 = vrot.slane %v5010_v48, 2  ;;  %v5118_v0 = vrot.slane %v5011_v24, 1 }
 0x391   : > { %5654 = vmatprep.subr.mxu0 %v5807_v11  ;;  %v5113_v21 = vsel %vm1275_vm5, %v5112_v62, %v5111_v60  ;;  %v4864_v7 = vsel %vm1284_vm9, %v4863_v34, %v4862_v32  ;;  %v5825_v63 = vmov 1966171168  }
 0x392   : > { %v5115_v35 = vsel %vm1278_vm6, %v5114_v6, %v5113_v21  ;;  %v1370_v1 = vunpack.c.l.s4 %v5825_v63 }
 0x393   : > { %5647 = vmatmul.mubr.msk.f32.vlgmr.msra.gmra.mrb[32].mxu0 %vm360_vm0, %v6507_v2  ;;  %v5117_v17 = vsel %vm1281_vm8, %v5116_v33, %v5115_v35 }
 0x394   : > { %5655 = vmatpush3.msra.mxu0 %v4609_v29  ;;  %5656 = vmatprep.mubr.msk.f32.mxu0 %vm5823_vm14, %v5807_v11  ;;  %v5119_v5 = vsel %vm1284_vm9, %v5118_v0, %v5117_v17  ;;  %v1371_v3 = vunpack.c.0.s8 %v1370_v1 }
 0x395   : > { %5664 = vmatprep.subr.mxu0 %v5807_v11 }
 0x396   : > { %v6749_v18 = vsub.s32 %v1371_v3, %v5953_v19 }
 0x397   : > { %5657 = vmatmul.mubr.msk.f32.vlgmr.msra.gmra.mrb[34].mxu0 %vm360_vm0, %v6507_v2 }
 0x398   : > { %5665 = vmatpush3.msra.mxu0 %v4864_v7  ;;  %5666 = vmatprep.mubr.msk.f32.mxu0 %vm5823_vm14, %v5807_v11 }
 0x399   : > { %5674 = vmatprep.subr.mxu0 %v5807_v11 }
 0x39b   : > { %5667 = vmatmul.mubr.msk.f32.vlgmr.msra.gmra.mrb[36].mxu0 %vm360_vm0, %v6507_v2 }
 0x39c   : > { %5675 = vmatpush3.msra.mxu0 %v5119_v5  ;;  %5676 = vmatprep.mubr.msk.f32.mxu0 %vm5823_vm14, %v5807_v11 }
 0x39f   : > { %5677 = vmatmul.mubr.msk.f32.vlgmr.msra.gmra.mrb[38].mxu0 %vm360_vm0, %v6507_v2  ;;  %vm1425_vm0 = vcmask 122880  }
 0x3bb   : > { %v1256_v8 = vpop.f32.mrb[6].mxu1 }
 0x3bc   : > { %v5523_v36 = vpop.f32.mrb[7].mxu1 }
 0x3c4   : > { %v1524_v37 = vpop.f32.mrb[8].mxu1 }
 0x3c5   : > { %v5533_v9 = vpop.f32.mrb[9].mxu1 }
 0x3c8   : > { %v1779_v38 = vpop.f32.mrb[10].mxu1 }
 0x3c9   : > { %v5543_v4 = vpop.f32.mrb[11].mxu1 }
 0x3cc   : > { %v6719_v54 = vpop.f32.mrb[12].mxu1 }
 0x3cd   : > { %v5553_v23 = vpop.f32.mrb[13].mxu1 }
 0x3d0   : > { %v6721_v39 = vpop.f32.mrb[14].mxu1 }
 0x3d1   : > { %v5563_v40 = vpop.f32.mrb[15].mxu1 }
 0x3d4   : > { %v6723_v41 = vpop.f32.mrb[16].mxu1 }
 0x3d5   : > { %v5573_v12 = vpop.f32.mrb[17].mxu1 }
 0x3d8   : > { %v6725_v42 = vpop.f32.mrb[18].mxu1 }
 0x3d9   : > { %v5583_v11 = vpop.f32.mrb[19].mxu1 }
 0x3dc   : > { %v6727_v53 = vpop.f32.mrb[20].mxu1 }
 0x3dd   : > { %v5593_v2 = vpop.f32.mrb[21].mxu1 }
 0x3e0   : > { %v6729_v43 = vpop.f32.mrb[22].mxu1 }
 0x3e1   : > { %v5603_v14 = vpop.f32.mrb[23].mxu1 }
 0x3e4   : > { %v6731_v44 = vpop.f32.mrb[24].mxu1 }
 0x3e5   : > { %v5613_v45 = vpop.f32.mrb[25].mxu1 }
 0x3e8   : > { %v6733_v10 = vpop.f32.mrb[26].mxu1 }
 0x3e9   : > { %v5623_v47 = vpop.f32.mrb[27].mxu1 }
 0x3ec   : > { %v6735_v46 = vpop.f32.mrb[28].mxu1 }
 0x3ed   : > { %v5633_v49 = vpop.f32.mrb[29].mxu1 }
 0x3f0   : > { %v6737_v50 = vpop.f32.mrb[30].mxu1 }
 0x3f1   : > { %v5643_v51 = vpop.f32.mrb[31].mxu1 }
 0x3f4   : > { %v6739_v52 = vpop.f32.mrb[32].mxu1 }
 0x3f5   : > { %v5653_v55 = vpop.f32.mrb[33].mxu1 }
 0x3f8   : > { %v6741_v56 = vpop.f32.mrb[34].mxu1 }
 0x3f9   : > { %v5663_v57 = vpop.f32.mrb[35].mxu1 }
 0x3fc   : > { %v6743_v59 = vpop.f32.mrb[36].mxu1 }
 0x3fd   : > { %v5673_v61 = vpop.f32.mrb[37].mxu1 }
 0x436   : > { %v1356_v13 = vpop.f32.mrb[8].mxu0 }
 0x437   : > { %v1357_v15 = vadd.f32 %v1356_v13, %v1256_v8  ;;  %v5528_v26 = vpop.f32.mrb[9].mxu0 }
 0x439   : > { %v1365_v27 = vadd.f32 %v6745_v20, %v1357_v15 }
 0x43a   : > { %v1617_v25 = vpop.f32.mrb[10].mxu0 }
 0x43b   : > { %v1366_v28 = vmax.f32 %v1365_v27, 0.0  ;;  %v1618_v58 = vadd.f32 %v1617_v25, %v1524_v37  ;;  %v5538_v22 = vpop.f32.mrb[11].mxu0 }
 0x43d   : > { %v1368_v30 = vcombine.high %v1366_v28, %v1366_v28  ;;  %v1375_v34 = vrot.slane %v1366_v28, %v6749_v18  ;;  %v1621_v31 = vadd.f32 %v1618_v58, %v6745_v20 }
 0x43e   : > { %v1872_v62 = vpop.f32.mrb[12].mxu0 }
 0x43f   : > { %v1382_v29 = vrot.slane %v1368_v30, %v6749_v18  ;;  %v1383_v16 = vcombine.high %v1375_v34, %v1375_v34  ;;  %v1391_v19 = vrot.slane %v1375_v34, %v6749_v18  ;;  %v1622_v48 = vmax.f32 %v1621_v31, 0.0  ;;  %v5548_v60 = vpop.f32.mrb[13].mxu0 }
 0x440   : > { %v1873_v6 = vadd.f32 %v1872_v62, %v1779_v38 }
 0x441   : > { %v1384_v24 = vcombine.high %v1382_v29, %v1382_v29  ;;  %v1398_v32 = vrot.slane %v1382_v29, %v6749_v18  ;;  %v1405_v21 = vrot.slane %v1383_v16, %v6749_v18  ;;  %v1413_v33 = vcombine.high %v1391_v19, %v1391_v19  ;;  %1426 = vst.msk [vmem:[%s6760_s25] sm:$0x1] %vm1425_vm0, %v1391_v19 }
 0x442   : > { %v1624_v7 = vcombine.high %v1622_v48, %v1622_v48  ;;  %v1631_v35 = vrot.slane %v1622_v48, %v6749_v18  ;;  %v1876_v0 = vadd.f32 %v1873_v6, %v6745_v20  ;;  %v2127_v17 = vpop.f32.mrb[14].mxu0 }
 0x443   : > { %v1412_v5 = vrot.slane %v1384_v24, %v6749_v18  ;;  %v1414_v8 = vcombine.high %v1398_v32, %v1398_v32  ;;  %v1415_v36 = vcombine.high %v1405_v21, %v1405_v21  ;;  %1427 = vst.msk [vmem:[%s6760_s25 + $0x10] sm:$0x1] %vm1425_vm0, %v1405_v21  ;;  %1428 = vst.msk [vmem:[%s6760_s25 + $0x20] sm:$0x1] %vm1425_vm0, %v1413_v33  ;;  %v5558_v9 = vpop.f32.mrb[15].mxu0 }
 0x444   : > { %1430 = vst.msk [vmem:[%s6760_s25 + $0x40] sm:$0x1] %vm1425_vm0, %v1398_v32  ;;  %v2128_v37 = vadd.f32 %v2127_v17, %v6719_v54  ;;  %v1638_v38 = vrot.slane %v1624_v7, %v6749_v18  ;;  %v1639_v4 = vcombine.high %v1631_v35, %v1631_v35  ;;  %v1647_v23 = vrot.slane %v1631_v35, %v6749_v18 }
 0x445   : > { %v1877_v40 = vmax.f32 %v1876_v0, 0.0  ;;  %v1416_v12 = vcombine.high %v1412_v5, %v1412_v5  ;;  %1429 = vst.msk [vmem:[%s6760_s25 + $0x30] sm:$0x1] %vm1425_vm0, %v1415_v36  ;;  %1431 = vst.msk [vmem:[%s6760_s25 + $0x50] sm:$0x1] %vm1425_vm0, %v1412_v5 }
 0x446   : > { %1432 = vst.msk [vmem:[%s6760_s25 + $0x60] sm:$0x1] %vm1425_vm0, %v1414_v8  ;;  %v2131_v11 = vadd.f32 %v2128_v37, %v6745_v20  ;;  %v1640_v2 = vcombine.high %v1638_v38, %v1638_v38  ;;  %v1654_v54 = vrot.slane %v1638_v38, %v6749_v18  ;;  %v1661_v14 = vrot.slane %v1639_v4, %v6749_v18  ;;  %v2382_v47 = vpop.f32.mrb[16].mxu0 }
 0x447   : > { %v1669_v45 = vcombine.high %v1647_v23, %v1647_v23  ;;  %1681 = vst.msk [vmem:[%s6760_s25 + $0x1] sm:$0x1] %vm1425_vm0, %v1647_v23  ;;  %1433 = vst.msk [vmem:[%s6760_s25 + $0x70] sm:$0x1] %vm1425_vm0, %v1416_v12  ;;  %v1879_v49 = vcombine.high %v1877_v40, %v1877_v40  ;;  %v1886_v51 = vrot.slane %v1877_v40, %v6749_v18  ;;  %v5568_v61 = vpop.f32.mrb[17].mxu0 }
 0x448   : > { %v2132_v55 = vmax.f32 %v2131_v11, 0.0  ;;  %v2383_v57 = vadd.f32 %v2382_v47, %v6721_v39  ;;  %v1668_v63 = vrot.slane %v1640_v2, %v6749_v18  ;;  %v1670_v1 = vcombine.high %v1654_v54, %v1654_v54  ;;  %1682 = vst.msk [vmem:[%s6760_s25 + $0x11] sm:$0x1] %vm1425_vm0, %v1661_v14  ;;  %1685 = vst.msk [vmem:[%s6760_s25 + $0x41] sm:$0x1] %vm1425_vm0, %v1654_v54 }
 0x449   : > { %v1671_v3 = vcombine.high %v1661_v14, %v1661_v14  ;;  %1683 = vst.msk [vmem:[%s6760_s25 + $0x21] sm:$0x1] %vm1425_vm0, %v1669_v45  ;;  %v1893_v13 = vrot.slane %v1879_v49, %v6749_v18  ;;  %v1894_v15 = vcombine.high %v1886_v51, %v1886_v51  ;;  %v1902_v26 = vrot.slane %v1886_v51, %v6749_v18 }
 0x44a   : > { %v2134_v27 = vcombine.high %v2132_v55, %v2132_v55  ;;  %v1672_v39 = vcombine.high %v1668_v63, %v1668_v63  ;;  %1686 = vst.msk [vmem:[%s6760_s25 + $0x51] sm:$0x1] %vm1425_vm0, %v1668_v63  ;;  %1687 = vst.msk [vmem:[%s6760_s25 + $0x61] sm:$0x1] %vm1425_vm0, %v1670_v1  ;;  %v2141_v25 = vrot.slane %v2132_v55, %v6749_v18  ;;  %v2637_v58 = vpop.f32.mrb[18].mxu0 }
 0x44b   : > { %1684 = vst.msk [vmem:[%s6760_s25 + $0x31] sm:$0x1] %vm1425_vm0, %v1671_v3  ;;  %v2386_v28 = vadd.f32 %v2383_v57, %v6745_v20  ;;  %v1895_v22 = vcombine.high %v1893_v13, %v1893_v13  ;;  %v1909_v30 = vrot.slane %v1893_v13, %v6749_v18  ;;  %v1916_v34 = vrot.slane %v1894_v15, %v6749_v18  ;;  %v5578_v62 = vpop.f32.mrb[19].mxu0 }
 0x44c   : > { %v1924_v31 = vcombine.high %v1902_v26, %v1902_v26  ;;  %1936 = vst.msk [vmem:[%s6760_s25 + $0x2] sm:$0x1] %vm1425_vm0, %v1902_v26  ;;  %1688 = vst.msk [vmem:[%s6760_s25 + $0x71] sm:$0x1] %vm1425_vm0, %v1672_v39  ;;  %v2148_v29 = vrot.slane %v2134_v27, %v6749_v18  ;;  %v2149_v16 = vcombine.high %v2141_v25, %v2141_v25 }
 0x44d   : > { %v2157_v19 = vrot.slane %v2141_v25, %v6749_v18  ;;  %v2387_v48 = vmax.f32 %v2386_v28, 0.0  ;;  %v1923_v60 = vrot.slane %v1895_v22, %v6749_v18  ;;  %v1925_v6 = vcombine.high %v1909_v30, %v1909_v30  ;;  %1937 = vst.msk [vmem:[%s6760_s25 + $0x12] sm:$0x1] %vm1425_vm0, %v1916_v34  ;;  %1940 = vst.msk [vmem:[%s6760_s25 + $0x42] sm:$0x1] %vm1425_vm0, %v1909_v30 }
 0x44e   : > { %v1926_v24 = vcombine.high %v1916_v34, %v1916_v34  ;;  %1938 = vst.msk [vmem:[%s6760_s25 + $0x22] sm:$0x1] %vm1425_vm0, %v1924_v31  ;;  %v2638_v32 = vadd.f32 %v2637_v58, %v6723_v41  ;;  %v2150_v21 = vcombine.high %v2148_v29, %v2148_v29  ;;  %v2164_v33 = vrot.slane %v2148_v29, %v6749_v18  ;;  %v2892_v0 = vpop.f32.mrb[20].mxu0 }
 0x44f   : > { %v2171_v7 = vrot.slane %v2149_v16, %v6749_v18  ;;  %v2179_v35 = vcombine.high %v2157_v19, %v2157_v19  ;;  %2191 = vst.msk [vmem:[%s6760_s25 + $0x3] sm:$0x1] %vm1425_vm0, %v2157_v19  ;;  %v1927_v17 = vcombine.high %v1923_v60, %v1923_v60  ;;  %1941 = vst.msk [vmem:[%s6760_s25 + $0x52] sm:$0x1] %vm1425_vm0, %v1923_v60  ;;  %v5588_v36 = vpop.f32.mrb[21].mxu0 }
 0x450   : > { %1939 = vst.msk [vmem:[%s6760_s25 + $0x32] sm:$0x1] %vm1425_vm0, %v1926_v24  ;;  %1942 = vst.msk [vmem:[%s6760_s25 + $0x62] sm:$0x1] %vm1425_vm0, %v1925_v6  ;;  %v2389_v41 = vcombine.high %v2387_v48, %v2387_v48  ;;  %v2396_v5 = vrot.slane %v2387_v48, %v6749_v18  ;;  %v2641_v8 = vadd.f32 %v2638_v32, %v6745_v20 }
 0x451   : > { %v2178_v37 = vrot.slane %v2150_v21, %v6749_v18  ;;  %v2180_v9 = vcombine.high %v2164_v33, %v2164_v33  ;;  %v2181_v38 = vcombine.high %v2171_v7, %v2171_v7  ;;  %2192 = vst.msk [vmem:[%s6760_s25 + $0x13] sm:$0x1] %vm1425_vm0, %v2171_v7  ;;  %2193 = vst.msk [vmem:[%s6760_s25 + $0x23] sm:$0x1] %vm1425_vm0, %v2179_v35 }
 0x452   : > { %2195 = vst.msk [vmem:[%s6760_s25 + $0x43] sm:$0x1] %vm1425_vm0, %v2164_v33  ;;  %v2893_v4 = vadd.f32 %v2892_v0, %v6725_v42  ;;  %1943 = vst.msk [vmem:[%s6760_s25 + $0x72] sm:$0x1] %vm1425_vm0, %v1927_v17  ;;  %v2403_v23 = vrot.slane %v2389_v41, %v6749_v18  ;;  %v2404_v40 = vcombine.high %v2396_v5, %v2396_v5  ;;  %v2642_v11 = vmax.f32 %v2641_v8, 0.0  ;;  %v3147_v42 = vpop.f32.mrb[22].mxu0 }
 0x453   : > { %v2412_v12 = vrot.slane %v2396_v5, %v6749_v18  ;;  %v2182_v2 = vcombine.high %v2178_v37, %v2178_v37  ;;  %2194 = vst.msk [vmem:[%s6760_s25 + $0x33] sm:$0x1] %vm1425_vm0, %v2181_v38  ;;  %2196 = vst.msk [vmem:[%s6760_s25 + $0x53] sm:$0x1] %vm1425_vm0, %v2178_v37  ;;  %v5598_v51 = vpop.f32.mrb[23].mxu0  ;;  %v3148_v63 = vadd.f32 %v3147_v42, %v6727_v53 }
 0x454   : > { %2197 = vst.msk [vmem:[%s6760_s25 + $0x63] sm:$0x1] %vm1425_vm0, %v2180_v9  ;;  %v2896_v54 = vadd.f32 %v2893_v4, %v6745_v20  ;;  %v2405_v14 = vcombine.high %v2403_v23, %v2403_v23  ;;  %v2419_v45 = vrot.slane %v2403_v23, %v6749_v18  ;;  %v2426_v47 = vrot.slane %v2404_v40, %v6749_v18 }
 0x455   : > { %v2434_v49 = vcombine.high %v2412_v12, %v2412_v12  ;;  %2446 = vst.msk [vmem:[%s6760_s25 + $0x4] sm:$0x1] %vm1425_vm0, %v2412_v12  ;;  %2198 = vst.msk [vmem:[%s6760_s25 + $0x73] sm:$0x1] %vm1425_vm0, %v2182_v2  ;;  %v2644_v55 = vcombine.high %v2642_v11, %v2642_v11  ;;  %v2651_v57 = vrot.slane %v2642_v11, %v6749_v18 }
 0x456   : > { %v2897_v61 = vmax.f32 %v2896_v54, 0.0  ;;  %v2433_v1 = vrot.slane %v2405_v14, %v6749_v18  ;;  %v2435_v3 = vcombine.high %v2419_v45, %v2419_v45  ;;  %v2436_v13 = vcombine.high %v2426_v47, %v2426_v47  ;;  %2447 = vst.msk [vmem:[%s6760_s25 + $0x14] sm:$0x1] %vm1425_vm0, %v2426_v47  ;;  %2450 = vst.msk [vmem:[%s6760_s25 + $0x44] sm:$0x1] %vm1425_vm0, %v2419_v45  ;;  %v3402_v25 = vpop.f32.mrb[24].mxu0 }
 0x457   : > { %2448 = vst.msk [vmem:[%s6760_s25 + $0x24] sm:$0x1] %vm1425_vm0, %v2434_v49  ;;  %v2658_v15 = vrot.slane %v2644_v55, %v6749_v18  ;;  %v2659_v26 = vcombine.high %v2651_v57, %v2651_v57  ;;  %v2667_v27 = vrot.slane %v2651_v57, %v6749_v18  ;;  %v3151_v58 = vadd.f32 %v3148_v63, %v6745_v20  ;;  %v5608_v30 = vpop.f32.mrb[25].mxu0 }
 0x458   : > { %v2899_v39 = vcombine.high %v2897_v61, %v2897_v61  ;;  %v2437_v53 = vcombine.high %v2433_v1, %v2433_v1  ;;  %2449 = vst.msk [vmem:[%s6760_s25 + $0x34] sm:$0x1] %vm1425_vm0, %v2436_v13  ;;  %2451 = vst.msk [vmem:[%s6760_s25 + $0x54] sm:$0x1] %vm1425_vm0, %v2433_v1  ;;  %v2906_v28 = vrot.slane %v2897_v61, %v6749_v18 }
 0x459   : > { %2452 = vst.msk [vmem:[%s6760_s25 + $0x64] sm:$0x1] %vm1425_vm0, %v2435_v3  ;;  %v3403_v22 = vadd.f32 %v3402_v25, %v6729_v43  ;;  %v2660_v34 = vcombine.high %v2658_v15, %v2658_v15  ;;  %v2674_v31 = vrot.slane %v2658_v15, %v6749_v18  ;;  %v2681_v62 = vrot.slane %v2659_v26, %v6749_v18 }
 0x45a   : > { %v2689_v29 = vcombine.high %v2667_v27, %v2667_v27  ;;  %2701 = vst.msk [vmem:[%s6760_s25 + $0x5] sm:$0x1] %vm1425_vm0, %v2667_v27  ;;  %2453 = vst.msk [vmem:[%s6760_s25 + $0x74] sm:$0x1] %vm1425_vm0, %v2437_v53  ;;  %v2913_v16 = vrot.slane %v2899_v39, %v6749_v18  ;;  %v2914_v19 = vcombine.high %v2906_v28, %v2906_v28  ;;  %v3152_v43 = vmax.f32 %v3151_v58, 0.0  ;;  %v3657_v21 = vpop.f32.mrb[26].mxu0 }
 0x45b   : > { %v2922_v48 = vrot.slane %v2906_v28, %v6749_v18  ;;  %v2688_v60 = vrot.slane %v2660_v34, %v6749_v18  ;;  %v2690_v6 = vcombine.high %v2674_v31, %v2674_v31  ;;  %v2691_v24 = vcombine.high %v2681_v62, %v2681_v62  ;;  %2702 = vst.msk [vmem:[%s6760_s25 + $0x15] sm:$0x1] %vm1425_vm0, %v2681_v62  ;;  %v5618_v17 = vpop.f32.mrb[27].mxu0 }
 0x45c   : > { %2703 = vst.msk [vmem:[%s6760_s25 + $0x25] sm:$0x1] %vm1425_vm0, %v2689_v29  ;;  %2705 = vst.msk [vmem:[%s6760_s25 + $0x45] sm:$0x1] %vm1425_vm0, %v2674_v31  ;;  %v3406_v32 = vadd.f32 %v3403_v22, %v6745_v20  ;;  %v2915_v33 = vcombine.high %v2913_v16, %v2913_v16  ;;  %v2929_v7 = vrot.slane %v2913_v16, %v6749_v18 }
 0x45d   : > { %v2936_v35 = vrot.slane %v2914_v19, %v6749_v18  ;;  %v2944_v0 = vcombine.high %v2922_v48, %v2922_v48  ;;  %2956 = vst.msk [vmem:[%s6760_s25 + $0x6] sm:$0x1] %vm1425_vm0, %v2922_v48  ;;  %v2692_v41 = vcombine.high %v2688_v60, %v2688_v60  ;;  %2704 = vst.msk [vmem:[%s6760_s25 + $0x35] sm:$0x1] %vm1425_vm0, %v2691_v24 }
 0x45e   : > { %2706 = vst.msk [vmem:[%s6760_s25 + $0x55] sm:$0x1] %vm1425_vm0, %v2688_v60  ;;  %2707 = vst.msk [vmem:[%s6760_s25 + $0x65] sm:$0x1] %vm1425_vm0, %v2690_v6  ;;  %v3154_v5 = vcombine.high %v3152_v43, %v3152_v43  ;;  %v3161_v8 = vrot.slane %v3152_v43, %v6749_v18  ;;  %v3407_v36 = vmax.f32 %v3406_v32, 0.0  ;;  %v2943_v37 = vrot.slane %v2915_v33, %v6749_v18  ;;  %v3912_v2 = vpop.f32.mrb[28].mxu0 }
 0x45f   : > { %v2945_v9 = vcombine.high %v2929_v7, %v2929_v7  ;;  %v2946_v38 = vcombine.high %v2936_v35, %v2936_v35  ;;  %2957 = vst.msk [vmem:[%s6760_s25 + $0x16] sm:$0x1] %vm1425_vm0, %v2936_v35  ;;  %2958 = vst.msk [vmem:[%s6760_s25 + $0x26] sm:$0x1] %vm1425_vm0, %v2944_v0  ;;  %v3658_v4 = vadd.f32 %v3657_v21, %v6731_v44  ;;  %v5628_v45 = vpop.f32.mrb[29].mxu0 }
 0x460   : > { %2960 = vst.msk [vmem:[%s6760_s25 + $0x46] sm:$0x1] %vm1425_vm0, %v2929_v7  ;;  %2708 = vst.msk [vmem:[%s6760_s25 + $0x75] sm:$0x1] %vm1425_vm0, %v2692_v41  ;;  %v3168_v23 = vrot.slane %v3154_v5, %v6749_v18  ;;  %v3169_v40 = vcombine.high %v3161_v8, %v3161_v8  ;;  %v3177_v12 = vrot.slane %v3161_v8, %v6749_v18 }
 0x461   : > { %v3409_v11 = vcombine.high %v3407_v36, %v3407_v36  ;;  %v2947_v54 = vcombine.high %v2943_v37, %v2943_v37  ;;  %2959 = vst.msk [vmem:[%s6760_s25 + $0x36] sm:$0x1] %vm1425_vm0, %v2946_v38  ;;  %2961 = vst.msk [vmem:[%s6760_s25 + $0x56] sm:$0x1] %vm1425_vm0, %v2943_v37  ;;  %v3416_v44 = vrot.slane %v3407_v36, %v6749_v18 }
 0x462   : > { %2962 = vst.msk [vmem:[%s6760_s25 + $0x66] sm:$0x1] %vm1425_vm0, %v2945_v9  ;;  %v3661_v42 = vadd.f32 %v3658_v4, %v6745_v20  ;;  %v3913_v14 = vadd.f32 %v3912_v2, %v6733_v10  ;;  %v3170_v47 = vcombine.high %v3168_v23, %v3168_v23  ;;  %v3184_v49 = vrot.slane %v3168_v23, %v6749_v18  ;;  %v4167_v26 = vpop.f32.mrb[30].mxu0 }
 0x463   : > { %v3191_v51 = vrot.slane %v3169_v40, %v6749_v18  ;;  %v3199_v55 = vcombine.high %v3177_v12, %v3177_v12  ;;  %3211 = vst.msk [vmem:[%s6760_s25 + $0x7] sm:$0x1] %vm1425_vm0, %v3177_v12  ;;  %2963 = vst.msk [vmem:[%s6760_s25 + $0x76] sm:$0x1] %vm1425_vm0, %v2947_v54  ;;  %v3423_v57 = vrot.slane %v3409_v11, %v6749_v18  ;;  %v5638_v28 = vpop.f32.mrb[31].mxu0 }
 0x464   : > { %v3424_v61 = vcombine.high %v3416_v44, %v3416_v44  ;;  %v3432_v63 = vrot.slane %v3416_v44, %v6749_v18  ;;  %v3662_v10 = vmax.f32 %v3661_v42, 0.0  ;;  %v3198_v1 = vrot.slane %v3170_v47, %v6749_v18  ;;  %3215 = vst.msk [vmem:[%s6760_s25 + $0x47] sm:$0x1] %vm1425_vm0, %v3184_v49 }
 0x465   : > { %v3200_v3 = vcombine.high %v3184_v49, %v3184_v49  ;;  %v3201_v13 = vcombine.high %v3191_v51, %v3191_v51  ;;  %3212 = vst.msk [vmem:[%s6760_s25 + $0x17] sm:$0x1] %vm1425_vm0, %v3191_v51  ;;  %3213 = vst.msk [vmem:[%s6760_s25 + $0x27] sm:$0x1] %vm1425_vm0, %v3199_v55  ;;  %v3916_v15 = vadd.f32 %v3913_v14, %v6745_v20 }
 0x466   : > { %v3425_v27 = vcombine.high %v3423_v57, %v3423_v57  ;;  %v3439_v39 = vrot.slane %v3423_v57, %v6749_v18  ;;  %v3446_v25 = vrot.slane %v3424_v61, %v6749_v18  ;;  %v3454_v53 = vcombine.high %v3432_v63, %v3432_v63  ;;  %3466 = vst.msk [vmem:[%s6760_s25 + $0x8] sm:$0x1] %vm1425_vm0, %v3432_v63  ;;  %v4422_v6 = vpop.f32.mrb[32].mxu0 }
 0x467   : > { %v3202_v58 = vcombine.high %v3198_v1, %v3198_v1  ;;  %3214 = vst.msk [vmem:[%s6760_s25 + $0x37] sm:$0x1] %vm1425_vm0, %v3201_v13  ;;  %3216 = vst.msk [vmem:[%s6760_s25 + $0x57] sm:$0x1] %vm1425_vm0, %v3198_v1  ;;  %v3664_v22 = vcombine.high %v3662_v10, %v3662_v10  ;;  %v3671_v30 = vrot.slane %v3662_v10, %v6749_v18  ;;  %v3917_v34 = vmax.f32 %v3916_v15, 0.0  ;;  %v5648_v33 = vpop.f32.mrb[33].mxu0 }
 0x468   : > { %3217 = vst.msk [vmem:[%s6760_s25 + $0x67] sm:$0x1] %vm1425_vm0, %v3200_v3  ;;  %v3453_v31 = vrot.slane %v3425_v27, %v6749_v18  ;;  %v3455_v62 = vcombine.high %v3439_v39, %v3439_v39  ;;  %v3456_v29 = vcombine.high %v3446_v25, %v3446_v25  ;;  %3467 = vst.msk [vmem:[%s6760_s25 + $0x18] sm:$0x1] %vm1425_vm0, %v3446_v25 }
 0x469   : > { %3468 = vst.msk [vmem:[%s6760_s25 + $0x28] sm:$0x1] %vm1425_vm0, %v3454_v53  ;;  %3470 = vst.msk [vmem:[%s6760_s25 + $0x48] sm:$0x1] %vm1425_vm0, %v3439_v39  ;;  %v4168_v16 = vadd.f32 %v4167_v26, %v6735_v46  ;;  %v3678_v19 = vrot.slane %v3664_v22, %v6749_v18  ;;  %v3679_v48 = vcombine.high %v3671_v30, %v3671_v30 }
 0x46a   : > { %3218 = vst.msk [vmem:[%s6760_s25 + $0x77] sm:$0x1] %vm1425_vm0, %v3202_v58  ;;  %v3687_v43 = vrot.slane %v3671_v30, %v6749_v18  ;;  %v3919_v60 = vcombine.high %v3917_v34, %v3917_v34  ;;  %v3457_v24 = vcombine.high %v3453_v31, %v3453_v31  ;;  %3469 = vst.msk [vmem:[%s6760_s25 + $0x38] sm:$0x1] %vm1425_vm0, %v3456_v29  ;;  %v4677_v4 = vpop.f32.mrb[34].mxu0 }
 0x46b   : > { %3471 = vst.msk [vmem:[%s6760_s25 + $0x58] sm:$0x1] %vm1425_vm0, %v3453_v31  ;;  %3472 = vst.msk [vmem:[%s6760_s25 + $0x68] sm:$0x1] %vm1425_vm0, %v3455_v62  ;;  %v3926_v46 = vrot.slane %v3917_v34, %v6749_v18  ;;  %v4171_v32 = vadd.f32 %v4168_v16, %v6745_v20  ;;  %v4423_v21 = vadd.f32 %v4422_v6, %v6737_v50  ;;  %v5658_v2 = vpop.f32.mrb[35].mxu0 }
 0x46c   : > { %v3680_v7 = vcombine.high %v3678_v19, %v3678_v19  ;;  %v3694_v35 = vrot.slane %v3678_v19, %v6749_v18  ;;  %v3701_v0 = vrot.slane %v3679_v48, %v6749_v18  ;;  %v3709_v17 = vcombine.high %v3687_v43, %v3687_v43  ;;  %3721 = vst.msk [vmem:[%s6760_s25 + $0x9] sm:$0x1] %vm1425_vm0, %v3687_v43 }
 0x46d   : > { %3473 = vst.msk [vmem:[%s6760_s25 + $0x78] sm:$0x1] %vm1425_vm0, %v3457_v24  ;;  %v3933_v41 = vrot.slane %v3919_v60, %v6749_v18  ;;  %v3934_v5 = vcombine.high %v3926_v46, %v3926_v46  ;;  %v3942_v8 = vrot.slane %v3926_v46, %v6749_v18  ;;  %v4172_v50 = vmax.f32 %v4171_v32, 0.0 }
 0x46e   : > { %v3708_v36 = vrot.slane %v3680_v7, %v6749_v18  ;;  %v3710_v37 = vcombine.high %v3694_v35, %v3694_v35  ;;  %v3711_v9 = vcombine.high %v3701_v0, %v3701_v0  ;;  %3722 = vst.msk [vmem:[%s6760_s25 + $0x19] sm:$0x1] %vm1425_vm0, %v3701_v0  ;;  %3723 = vst.msk [vmem:[%s6760_s25 + $0x29] sm:$0x1] %vm1425_vm0, %v3709_v17  ;;  %v4932_v10 = vpop.f32.mrb[36].mxu0 }
 0x46f   : > { %3725 = vst.msk [vmem:[%s6760_s25 + $0x49] sm:$0x1] %vm1425_vm0, %v3694_v35  ;;  %v4426_v38 = vadd.f32 %v4423_v21, %v6745_v20  ;;  %v3935_v23 = vcombine.high %v3933_v41, %v3933_v41  ;;  %v3949_v40 = vrot.slane %v3933_v41, %v6749_v18  ;;  %v3956_v12 = vrot.slane %v3934_v5, %v6749_v18  ;;  %v5668_v15 = vpop.f32.mrb[37].mxu0 }
 0x470   : > { %v3964_v11 = vcombine.high %v3942_v8, %v3942_v8  ;;  %3976 = vst.msk [vmem:[%s6760_s25 + $0xa] sm:$0x1] %vm1425_vm0, %v3942_v8  ;;  %v3712_v54 = vcombine.high %v3708_v36, %v3708_v36  ;;  %3724 = vst.msk [vmem:[%s6760_s25 + $0x39] sm:$0x1] %vm1425_vm0, %v3711_v9  ;;  %v4174_v44 = vcombine.high %v4172_v50, %v4172_v50 }
 0x471   : > { %3726 = vst.msk [vmem:[%s6760_s25 + $0x59] sm:$0x1] %vm1425_vm0, %v3708_v36  ;;  %3727 = vst.msk [vmem:[%s6760_s25 + $0x69] sm:$0x1] %vm1425_vm0, %v3710_v37  ;;  %v4181_v42 = vrot.slane %v4172_v50, %v6749_v18  ;;  %v4427_v14 = vmax.f32 %v4426_v38, 0.0  ;;  %v3963_v45 = vrot.slane %v3935_v23, %v6749_v18  ;;  %v3965_v47 = vcombine.high %v3949_v40, %v3949_v40 }
 0x472   : > { %v3966_v49 = vcombine.high %v3956_v12, %v3956_v12  ;;  %3977 = vst.msk [vmem:[%s6760_s25 + $0x1a] sm:$0x1] %vm1425_vm0, %v3956_v12  ;;  %3978 = vst.msk [vmem:[%s6760_s25 + $0x2a] sm:$0x1] %vm1425_vm0, %v3964_v11  ;;  %v4678_v51 = vadd.f32 %v4677_v4, %v6739_v52  ;;  %v4188_v55 = vrot.slane %v4174_v44, %v6749_v18  ;;  %v5187_v62 = vpop.f32.mrb[38].mxu0 }
 0x473   : > { %3980 = vst.msk [vmem:[%s6760_s25 + $0x4a] sm:$0x1] %vm1425_vm0, %v3949_v40  ;;  %3728 = vst.msk [vmem:[%s6760_s25 + $0x79] sm:$0x1] %vm1425_vm0, %v3712_v54  ;;  %v4189_v57 = vcombine.high %v4181_v42, %v4181_v42  ;;  %v4197_v61 = vrot.slane %v4181_v42, %v6749_v18  ;;  %v4429_v63 = vcombine.high %v4427_v14, %v4427_v14  ;;  %v5678_v43 = vpop.f32.mrb[39].mxu0 }
 0x474   : > { %v3967_v1 = vcombine.high %v3963_v45, %v3963_v45  ;;  %3979 = vst.msk [vmem:[%s6760_s25 + $0x3a] sm:$0x1] %vm1425_vm0, %v3966_v49  ;;  %3981 = vst.msk [vmem:[%s6760_s25 + $0x5a] sm:$0x1] %vm1425_vm0, %v3963_v45  ;;  %v4436_v52 = vrot.slane %v4427_v14, %v6749_v18  ;;  %v4681_v3 = vadd.f32 %v4678_v51, %v6745_v20 }
 0x475   : > { %3982 = vst.msk [vmem:[%s6760_s25 + $0x6a] sm:$0x1] %vm1425_vm0, %v3965_v47  ;;  %v4933_v13 = vadd.f32 %v4932_v10, %v6741_v56  ;;  %v4190_v26 = vcombine.high %v4188_v55, %v4188_v55  ;;  %v4204_v27 = vrot.slane %v4188_v55, %v6749_v18  ;;  %v4211_v39 = vrot.slane %v4189_v57, %v6749_v18 }
 0x476   : > { %v4219_v25 = vcombine.high %v4197_v61, %v4197_v61  ;;  %4231 = vst.msk [vmem:[%s6760_s25 + $0xb] sm:$0x1] %vm1425_vm0, %v4197_v61  ;;  %3983 = vst.msk [vmem:[%s6760_s25 + $0x7a] sm:$0x1] %vm1425_vm0, %v3967_v1  ;;  %v4443_v53 = vrot.slane %v4429_v63, %v6749_v18  ;;  %v4444_v28 = vcombine.high %v4436_v52, %v4436_v52  ;;  %v4682_v56 = vmax.f32 %v4681_v3, 0.0 }
 0x477   : > { %v4452_v58 = vrot.slane %v4436_v52, %v6749_v18  ;;  %v4218_v22 = vrot.slane %v4190_v26, %v6749_v18  ;;  %v4220_v30 = vcombine.high %v4204_v27, %v4204_v27  ;;  %v4221_v34 = vcombine.high %v4211_v39, %v4211_v39  ;;  %4232 = vst.msk [vmem:[%s6760_s25 + $0x1b] sm:$0x1] %vm1425_vm0, %v4211_v39 }
 0x478   : > { %4233 = vst.msk [vmem:[%s6760_s25 + $0x2b] sm:$0x1] %vm1425_vm0, %v4219_v25  ;;  %4235 = vst.msk [vmem:[%s6760_s25 + $0x4b] sm:$0x1] %vm1425_vm0, %v4204_v27  ;;  %v4936_v31 = vadd.f32 %v4933_v13, %v6745_v20  ;;  %v4445_v29 = vcombine.high %v4443_v53, %v4443_v53  ;;  %v4459_v16 = vrot.slane %v4443_v53, %v6749_v18 }
 0x479   : > { %v4466_v19 = vrot.slane %v4444_v28, %v6749_v18  ;;  %v4474_v48 = vcombine.high %v4452_v58, %v4452_v58  ;;  %4486 = vst.msk [vmem:[%s6760_s25 + $0xc] sm:$0x1] %vm1425_vm0, %v4452_v58  ;;  %v4222_v60 = vcombine.high %v4218_v22, %v4218_v22  ;;  %4234 = vst.msk [vmem:[%s6760_s25 + $0x3b] sm:$0x1] %vm1425_vm0, %v4221_v34 }
 0x47a   : > { %4236 = vst.msk [vmem:[%s6760_s25 + $0x5b] sm:$0x1] %vm1425_vm0, %v4218_v22  ;;  %4237 = vst.msk [vmem:[%s6760_s25 + $0x6b] sm:$0x1] %vm1425_vm0, %v4220_v30  ;;  %v4684_v6 = vcombine.high %v4682_v56, %v4682_v56  ;;  %v4691_v24 = vrot.slane %v4682_v56, %v6749_v18  ;;  %v4937_v46 = vmax.f32 %v4936_v31, 0.0  ;;  %v4473_v32 = vrot.slane %v4445_v29, %v6749_v18 }
 0x47b   : > { %v4475_v21 = vcombine.high %v4459_v16, %v4459_v16  ;;  %v4476_v33 = vcombine.high %v4466_v19, %v4466_v19  ;;  %4487 = vst.msk [vmem:[%s6760_s25 + $0x1c] sm:$0x1] %vm1425_vm0, %v4466_v19  ;;  %4488 = vst.msk [vmem:[%s6760_s25 + $0x2c] sm:$0x1] %vm1425_vm0, %v4474_v48  ;;  %v5188_v7 = vadd.f32 %v5187_v62, %v6743_v59 }
 0x47c   : > { %4490 = vst.msk [vmem:[%s6760_s25 + $0x4c] sm:$0x1] %vm1425_vm0, %v4459_v16  ;;  %4238 = vst.msk [vmem:[%s6760_s25 + $0x7b] sm:$0x1] %vm1425_vm0, %v4222_v60  ;;  %v4698_v35 = vrot.slane %v4684_v6, %v6749_v18  ;;  %v4699_v0 = vcombine.high %v4691_v24, %v4691_v24  ;;  %v4707_v17 = vrot.slane %v4691_v24, %v6749_v18 }
 0x47d   : > { %v4939_v41 = vcombine.high %v4937_v46, %v4937_v46  ;;  %v4477_v5 = vcombine.high %v4473_v32, %v4473_v32  ;;  %4489 = vst.msk [vmem:[%s6760_s25 + $0x3c] sm:$0x1] %vm1425_vm0, %v4476_v33  ;;  %4491 = vst.msk [vmem:[%s6760_s25 + $0x5c] sm:$0x1] %vm1425_vm0, %v4473_v32  ;;  %v4946_v59 = vrot.slane %v4937_v46, %v6749_v18 }
 0x47e   : > { %4492 = vst.msk [vmem:[%s6760_s25 + $0x6c] sm:$0x1] %vm1425_vm0, %v4475_v21  ;;  %v5191_v8 = vadd.f32 %v5188_v7, %v6745_v20  ;;  %v4700_v50 = vcombine.high %v4698_v35, %v4698_v35  ;;  %v4714_v36 = vrot.slane %v4698_v35, %v6749_v18  ;;  %v4721_v37 = vrot.slane %v4699_v0, %v6749_v18 }
 0x47f   : > { %v4729_v9 = vcombine.high %v4707_v17, %v4707_v17  ;;  %4741 = vst.msk [vmem:[%s6760_s25 + $0xd] sm:$0x1] %vm1425_vm0, %v4707_v17  ;;  %4493 = vst.msk [vmem:[%s6760_s25 + $0x7c] sm:$0x1] %vm1425_vm0, %v4477_v5  ;;  %v4953_v38 = vrot.slane %v4939_v41, %v6749_v18  ;;  %v4954_v4 = vcombine.high %v4946_v59, %v4946_v59 }
 0x480   : > { %v4962_v23 = vrot.slane %v4946_v59, %v6749_v18  ;;  %v5192_v20 = vmax.f32 %v5191_v8, 0.0  ;;  %v4728_v40 = vrot.slane %v4700_v50, %v6749_v18  ;;  %v4730_v12 = vcombine.high %v4714_v36, %v4714_v36  ;;  %4742 = vst.msk [vmem:[%s6760_s25 + $0x1d] sm:$0x1] %vm1425_vm0, %v4721_v37  ;;  %4745 = vst.msk [vmem:[%s6760_s25 + $0x4d] sm:$0x1] %vm1425_vm0, %v4714_v36 }
 0x481   : > { %v4731_v11 = vcombine.high %v4721_v37, %v4721_v37  ;;  %4743 = vst.msk [vmem:[%s6760_s25 + $0x2d] sm:$0x1] %vm1425_vm0, %v4729_v9  ;;  %v4955_v2 = vcombine.high %v4953_v38, %v4953_v38  ;;  %v4969_v54 = vrot.slane %v4953_v38, %v6749_v18  ;;  %v4976_v44 = vrot.slane %v4954_v4, %v6749_v18 }
 0x482   : > { %v4984_v42 = vcombine.high %v4962_v23, %v4962_v23  ;;  %4996 = vst.msk [vmem:[%s6760_s25 + $0xe] sm:$0x1] %vm1425_vm0, %v4962_v23  ;;  %v4732_v14 = vcombine.high %v4728_v40, %v4728_v40  ;;  %4746 = vst.msk [vmem:[%s6760_s25 + $0x5d] sm:$0x1] %vm1425_vm0, %v4728_v40  ;;  %v5194_v45 = vcombine.high %v5192_v20, %v5192_v20 }
 0x483   : > { %4744 = vst.msk [vmem:[%s6760_s25 + $0x3d] sm:$0x1] %vm1425_vm0, %v4731_v11  ;;  %4747 = vst.msk [vmem:[%s6760_s25 + $0x6d] sm:$0x1] %vm1425_vm0, %v4730_v12  ;;  %v5201_v47 = vrot.slane %v5192_v20, %v6749_v18  ;;  %v4983_v49 = vrot.slane %v4955_v2, %v6749_v18  ;;  %v4985_v51 = vcombine.high %v4969_v54, %v4969_v54 }
 0x484   : > { %v4986_v55 = vcombine.high %v4976_v44, %v4976_v44  ;;  %4997 = vst.msk [vmem:[%s6760_s25 + $0x1e] sm:$0x1] %vm1425_vm0, %v4976_v44  ;;  %4998 = vst.msk [vmem:[%s6760_s25 + $0x2e] sm:$0x1] %vm1425_vm0, %v4984_v42  ;;  %v5208_v57 = vrot.slane %v5194_v45, %v6749_v18 }
 0x485   : > { %5000 = vst.msk [vmem:[%s6760_s25 + $0x4e] sm:$0x1] %vm1425_vm0, %v4969_v54  ;;  %4748 = vst.msk [vmem:[%s6760_s25 + $0x7d] sm:$0x1] %vm1425_vm0, %v4732_v14  ;;  %v5209_v61 = vcombine.high %v5201_v47, %v5201_v47  ;;  %v5217_v63 = vrot.slane %v5201_v47, %v6749_v18  ;;  %v4987_v10 = vcombine.high %v4983_v49, %v4983_v49 }
 0x486   : > { %4999 = vst.msk [vmem:[%s6760_s25 + $0x3e] sm:$0x1] %vm1425_vm0, %v4986_v55  ;;  %5001 = vst.msk [vmem:[%s6760_s25 + $0x5e] sm:$0x1] %vm1425_vm0, %v4983_v49  ;;  %v5210_v1 = vcombine.high %v5208_v57, %v5208_v57  ;;  %v5224_v52 = vrot.slane %v5208_v57, %v6749_v18 }
 0x487   : > { %5002 = vst.msk [vmem:[%s6760_s25 + $0x6e] sm:$0x1] %vm1425_vm0, %v4985_v51  ;;  %v5231_v3 = vrot.slane %v5209_v61, %v6749_v18  ;;  %v5239_v13 = vcombine.high %v5217_v63, %v5217_v63  ;;  %5251 = vst.msk [vmem:[%s6760_s25 + $0xf] sm:$0x1] %vm1425_vm0, %v5217_v63 }
 0x488   : > { %5003 = vst.msk [vmem:[%s6760_s25 + $0x7e] sm:$0x1] %vm1425_vm0, %v4987_v10  ;;  %v5238_v15 = vrot.slane %v5210_v1, %v6749_v18  ;;  %v5240_v26 = vcombine.high %v5224_v52, %v5224_v52  ;;  %5255 = vst.msk [vmem:[%s6760_s25 + $0x4f] sm:$0x1] %vm1425_vm0, %v5224_v52 }
 0x489   : > { %v5241_v27 = vcombine.high %v5231_v3, %v5231_v3  ;;  %5252 = vst.msk [vmem:[%s6760_s25 + $0x1f] sm:$0x1] %vm1425_vm0, %v5231_v3  ;;  %5253 = vst.msk [vmem:[%s6760_s25 + $0x2f] sm:$0x1] %vm1425_vm0, %v5239_v13 }
 0x48a   : > { %v5242_v18 = vcombine.high %v5238_v15, %v5238_v15  ;;  %5256 = vst.msk [vmem:[%s6760_s25 + $0x5f] sm:$0x1] %vm1425_vm0, %v5238_v15  ;;  %5257 = vst.msk [vmem:[%s6760_s25 + $0x6f] sm:$0x1] %vm1425_vm0, %v5240_v26 }
 0x48b   : > { %5254 = vst.msk [vmem:[%s6760_s25 + $0x3f] sm:$0x1] %vm1425_vm0, %v5241_v27 }
 0x48c   : > { %5258 = vst.msk [vmem:[%s6760_s25 + $0x7f] sm:$0x1] %vm1425_vm0, %v5242_v18 }
 0x48d   : > { %5755 = shalt.err (!%p5752_p3)
}
 0x48e   : > { %s5756_s16 = scalar_lea.hbm %s7133_s24, 2048  ;;  %s5760_s26 = scalar_lea.hbm %s7197_s9, 4096 }
 0x48f   : > { %p5757_p4 = scmp.ne.s32.totalorder %s7133_s24, %s5756_s16  ;;  %p5761_p9 = scmp.lt.u32.totalorder %s7133_s24, %s7197_s9 }
 0x490   : > { %p5762_p10 = scmp.lt.u32.totalorder %s5760_s26, %s5756_s16  ;;  %p5764_p12 = scmp.lt.u32.totalorder %s5756_s16, %s7133_s24 }
 0x491   : > { %p5758_p7 = pnand %p5757_p4, %p5917_p5 }
 0x492   : > { %p5763_p11 = por %p5762_p10, %p5761_p9 }
 0x493   : > { %p5759_p8 = pneg %p5758_p7 }
 0x494   : > { %p5765_p13 = por %p5764_p12, %p5763_p11 }
 0x496   : > { %p5766_p0 = pnand %p5765_p13, %p5759_p8 }
 0x498   : > { %5769 = shalt.err (!%p5766_p0)
}
 0x499   : > { %s5827_s17 = smov 128   ;;  %s5828_s28 = smov 8  }
 0x49a   : > { %5679 = dma.vmem_to_hbm [thread:$0]  (%p5917_p5), %s7135_s21, 2048, %s7133_s24, %s7147_s13, %s5827_s17, %s5827_s17, %s5828_s28  }
 0x49b PF: > { %p5685_p1 = scmp.ge.s32.totalorder %s5804_s12, 2  ;;  %s5288_s14 = sand.u32 1, %s5792_s30  }
 0x49c   : > { %s5289_s29 = scalar_lea.sflag [#allocation4], %s5288_s14 }
 0x49d   : > { %p5682_p2 = pnand %p5685_p1, %p5921_p6 }
 0x49f   : > { %5787 = dma.done.wait (!%p5682_p2), %s5289_s29, 2048  }
 0x4a0   : > { %5789 = vsyncadd (!%p5682_p2), %s5289_s29, 4294965248  ;;  %p19_p3 = scmp.ge.s32.totalorder %s5904_s15, 4   ;;  %s7200_s30 = smov %s5796_s10 }
 0x4a1   : > { %s7201_s10 = smov %s5800_s11  ;;  %s7202_s11 = smov %s5915_s18 }
 0x4a2   : > { %s7203_s12 = smov %s5904_s15  ;;  %21 = sbr.rel (!%p19_p3) target bundleno = 3 (0x3), region = 109 }
 0x4a9   :  { %5294 = vsyncpa [#allocation4], 1 }
 0x4aa   :  { %5296 = vsyncpa [#allocation4 + $0x1], 1 }

</bundles_post_ra>
